<compile_context>
chip_gen: v7x
topology: tpu7x:2x2x1
jax: 0.10.0
libtpu: 0.0.40
codegen_flags: <defaults>
</compile_context>

<pallas_src>
import jax
import jax.numpy as jnp
from jax import lax
from jax.experimental import pallas as pl
from jax.experimental.pallas import tpu as pltpu

EMB_DIM = 1024          # as in the original module
BN_EPS = 1e-3           # nn.BatchNorm1d(eps=0.001)

# Keep the resident f32 LHS small enough that even a megacore-duplicated copy
# (v7x) fits alongside double-buffered weight/out tiles on every generation.
_MAX_RESIDENT_LHS_BYTES = 16 << 20


def res_kernel(x_ref, w_ref, gb_ref, o_ref):
    # x_ref  : (N, C)   f32  -- resident matmul LHS (same block every step)
    # w_ref  : (C, TN)  bf16 -- conv1x1 weight tile, layout w[cin, cout]
    # gb_ref : (2, C)   f32  -- resident [gamma; beta]
    # o_ref  : (N, TN)  f32
    tn = o_ref.shape[1]
    off = pl.multiple_of(pl.program_id(0) * tn, 128)      # tile-aligned lanes

    # 1x1 conv == (N, C) @ (C, TN) matmul; bf16 on the MXU, f32 accumulation.
    x = x_ref[...]
    y = jnp.dot(x.astype(jnp.bfloat16), w_ref[...],
                preferred_element_type=jnp.float32)
    # Conv1d bias intentionally omitted: with batch-statistic BatchNorm it is
    # exactly cancelled (mean absorbs it, variance is unchanged).

    # BatchNorm1d with batch statistics (track_running_stats=False):
    # per-channel mean / biased variance over all rows, two-pass for stability.
    inv_n = 1.0 / y.shape[0]
    mean = jnp.sum(y, axis=0, keepdims=True) * inv_n
    d = y - mean
    var = jnp.sum(d * d, axis=0, keepdims=True) * inv_n   # biased variance

    gb = gb_ref[:, pl.ds(off, tn)]                         # (2, TN)
    scale = gb[0:1] * lax.rsqrt(var + BN_EPS)

    # Residual columns sliced from the resident f32 LHS (no second x input).
    xres = x_ref[:, pl.ds(off, tn)]
    o_ref[...] = jnp.maximum(xres + d * scale + gb[1:2], 0.0)


def res_forward_rows(x_rows, params, *, tile_n=None):
    """Channels-last Res block: x_rows (N, C) f32 -> (N, C) f32.

    Use this entry point when stacking Res blocks: keep activations in (N, C)
    rows across the whole stack and transpose only at the model boundary.
    """
    N, C = x_rows.shape
    assert C % 128 == 0, C

    if tile_n is None:
        # Collapse the grid when the full bf16 weight fits easily in VMEM:
        # per-grid-step overhead (~0.35us) dwarfs the tiny per-tile matmuls.
        tile_n = C if C * C * 2 <= (8 << 20) else 256
    tn = min(tile_n, C)
    assert C % tn == 0 and tn % 128 == 0, (C, tn)

    lhs_bytes = N * C * 4
    # TODO(synk): row-tiled two-pass-BN fallback for N*C exceeding this budget.
    assert lhs_bytes <= _MAX_RESIDENT_LHS_BYTES, (
        f"resident LHS of {lhs_bytes} bytes exceeds the single-pass VMEM budget")

    w_tile_bytes = C * tn * 2
    out_tile_bytes = N * tn * 4
    gb_bytes = 8 * C * 4                            # (2, C) padded to 8 sublanes
    vmem_bytes = 2 * (lhs_bytes + w_tile_bytes + out_tile_bytes + gb_bytes) + (2 << 20)
    vmem_bytes = min(100 << 20, max(vmem_bytes, 32 << 20))

    gb = jnp.concatenate([params["gamma"], params["beta"]], axis=0)   # (2, C)

    return pl.pallas_call(
        res_kernel,
        out_shape=jax.ShapeDtypeStruct((N, C), jnp.float32),
        grid_spec=pltpu.PrefetchScalarGridSpec(
            num_scalar_prefetch=0,
            grid=(C // tn,),                                 # output-channel tiles
            in_specs=[
                pl.BlockSpec((N, C), lambda j: (0, 0)),      # resident f32 LHS
                pl.BlockSpec((C, tn), lambda j: (0, j)),     # bf16 weight tile
                pl.BlockSpec((2, C), lambda j: (0, 0)),      # resident gamma/beta
            ],
            out_specs=pl.BlockSpec((N, tn), lambda j: (0, j)),
        ),
        compiler_params=pltpu.CompilerParams(
            dimension_semantics=("parallel",),
            vmem_limit_bytes=vmem_bytes),
    )(x_rows, params["w"], gb)


def res_forward(x, params, *, tile_n=None):
    """PyTorch-layout Res block: x (B, C, L) f32 NCW -> (B, C, L) f32.

    NOTE: each NCW<->channels-last transpose is a full HBM round trip of x;
    for chains of Res blocks call res_forward_rows on (B*L, C) rows directly.
    """
    B, C, L = x.shape
    x_rows = jnp.transpose(x, (0, 2, 1)).reshape(B * L, C)
    out_rows = res_forward_rows(x_rows, params, tile_n=tile_n)
    return jnp.transpose(out_rows.reshape(B, L, C), (0, 2, 1))


def res_reference(x, params):
    """Pure-JAX f32 reference of the PyTorch Res.forward (for validation)."""
    w = params["w"].astype(jnp.float32)                       # (Cin, Cout)
    y = jnp.einsum("bcl,cd->bdl", x, w) + params["b"].reshape(1, -1, 1)
    mean = jnp.mean(y, axis=(0, 2), keepdims=True)
    var = jnp.mean(jnp.square(y - mean), axis=(0, 2), keepdims=True)
    bn = (y - mean) * lax.rsqrt(var + BN_EPS)
    bn = bn * params["gamma"].reshape(1, -1, 1) + params["beta"].reshape(1, -1, 1)
    return jnp.maximum(x + bn, 0.0)


def init_params(key, c=EMB_DIM):
    k1, k2, k3, k4 = jax.random.split(key, 4)
    w = jax.random.normal(k1, (c, c), jnp.float32) * (c ** -0.5)
    return {
        # conv weight stored as (Cin, Cout), bf16 for the MXU fast path
        "w": w.astype(jnp.bfloat16),
        # conv bias kept for the reference; the kernel drops it (BN cancels it)
        "b": jax.random.normal(k2, (1, c), jnp.float32) * 0.05,
        "gamma": 1.0 + 0.1 * jax.random.normal(k3, (1, c), jnp.float32),
        "beta": 0.1 * jax.random.normal(k4, (1, c), jnp.float32),
    }


if __name__ == "__main__":
    key = jax.random.PRNGKey(0)
    kx, kp = jax.random.split(key)
    B, C, L = 2, EMB_DIM, 16        # small batch/length; C = EMB_DIM (1024)
    x = jax.random.normal(kx, (B, C, L), jnp.float32)
    params = init_params(kp, C)

    out = jax.jit(res_forward)(x, params)
    jax.block_until_ready(out)

    assert out.shape == (B, C, L), out.shape
    assert bool(jnp.all(jnp.isfinite(out)))

    ref = res_reference(x, params)
    max_err = float(jnp.max(jnp.abs(out - ref)))
    assert max_err < 5e-2, f"max abs error vs reference: {max_err}"

    print("KERNEL_OK")
</pallas_src>

<mosaic_0001>
module attributes {stable_mosaic.version = 11 : i64} {
  func.func @res_kernel(%arg0: i32, %arg1: memref<32x1024xf32, #tpu.memory_space<vmem>>, %arg2: memref<1024x1024xbf16, #tpu.memory_space<vmem>>, %arg3: memref<2x1024xf32, #tpu.memory_space<vmem>>, %arg4: memref<32x1024xf32, #tpu.memory_space<vmem>>) attributes {dimension_semantics = [#tpu.dimension_semantics<parallel>], iteration_bounds = array<i64: 1>, scalar_prefetch = 0 : i64, scratch_operands = 0 : i64, tpu.core_type = #tpu.core_type<tc>, window_params = [{pipeline_mode = #tpu.pipeline_mode<synchronous>, transform_indices = @transform_0, window_bounds = array<i64: 32, 1024>}, {transform_indices = @transform_1, window_bounds = array<i64: 1024, 1024>}, {pipeline_mode = #tpu.pipeline_mode<synchronous>, transform_indices = @transform_2, window_bounds = array<i64: 2, 1024>}, {transform_indices = @transform_3, window_bounds = array<i64: 32, 1024>}]} {
    %c1024_i32 = arith.constant 1024 : i32
    %0 = arith.muli %arg0, %c1024_i32 : i32
    %1 = tpu.assume_multiple %0, 128 : i32
    %c0 = arith.constant 0 : index
    %c0_0 = arith.constant 0 : index
    %2 = vector.load %arg1[%c0, %c0_0] : memref<32x1024xf32, #tpu.memory_space<vmem>>, vector<32x1024xf32>
    %3 = arith.truncf %2 : vector<32x1024xf32> to vector<32x1024xbf16>
    %c0_1 = arith.constant 0 : index
    %c0_2 = arith.constant 0 : index
    %4 = vector.load %arg2[%c0_1, %c0_2] : memref<1024x1024xbf16, #tpu.memory_space<vmem>>, vector<1024x1024xbf16>
    %cst = arith.constant dense<0.000000e+00> : vector<32x1024xf32>
    %5 = tpu.matmul %3, %4, %cst {dimension_numbers = #tpu.dot_dimension_numbers<[1], [0], [0], [1], [0, 0, 1, 1], [], []>} : vector<32x1024xbf16>, vector<1024x1024xbf16>, vector<32x1024xf32> -> vector<32x1024xf32>
    %cst_3 = arith.constant dense<0.000000e+00> : vector<1024xf32>
    %6 = vector.multi_reduction <add>, %5, %cst_3 [0] : vector<32x1024xf32> to vector<1024xf32>
    %7 = vector.shape_cast %6 : vector<1024xf32> to vector<1x1024xf32>
    %cst_4 = arith.constant 3.125000e-02 : f32
    %8 = vector.broadcast %cst_4 : f32 to vector<1x1024xf32>
    %9 = arith.mulf %7, %8 : vector<1x1024xf32>
    %10 = vector.broadcast %9 : vector<1x1024xf32> to vector<32x1024xf32>
    %11 = arith.subf %5, %10 : vector<32x1024xf32>
    %12 = arith.mulf %11, %11 : vector<32x1024xf32>
    %cst_5 = arith.constant dense<0.000000e+00> : vector<1024xf32>
    %13 = vector.multi_reduction <add>, %12, %cst_5 [0] : vector<32x1024xf32> to vector<1024xf32>
    %14 = vector.shape_cast %13 : vector<1024xf32> to vector<1x1024xf32>
    %cst_6 = arith.constant 3.125000e-02 : f32
    %15 = vector.broadcast %cst_6 : f32 to vector<1x1024xf32>
    %16 = arith.mulf %14, %15 : vector<1x1024xf32>
    %c0_7 = arith.constant 0 : index
    %17 = arith.index_cast %1 : i32 to index
    %18 = vector.load %arg3[%c0_7, %17] : memref<2x1024xf32, #tpu.memory_space<vmem>>, vector<2x1024xf32>
    %19 = vector.extract_strided_slice %18 {offsets = [0, 0], sizes = [1, 1024], strides = [1, 1]} : vector<2x1024xf32> to vector<1x1024xf32>
    %cst_8 = arith.constant 1.000000e-03 : f32
    %20 = vector.broadcast %cst_8 : f32 to vector<1x1024xf32>
    %21 = arith.addf %16, %20 : vector<1x1024xf32>
    %22 = math.rsqrt %21 : vector<1x1024xf32>
    %23 = arith.mulf %19, %22 : vector<1x1024xf32>
    %c0_9 = arith.constant 0 : index
    %24 = arith.index_cast %1 : i32 to index
    %25 = vector.load %arg1[%c0_9, %24] : memref<32x1024xf32, #tpu.memory_space<vmem>>, vector<32x1024xf32>
    %26 = vector.broadcast %23 : vector<1x1024xf32> to vector<32x1024xf32>
    %27 = arith.mulf %11, %26 : vector<32x1024xf32>
    %28 = arith.addf %25, %27 : vector<32x1024xf32>
    %29 = vector.extract_strided_slice %18 {offsets = [1, 0], sizes = [1, 1024], strides = [1, 1]} : vector<2x1024xf32> to vector<1x1024xf32>
    %30 = vector.broadcast %29 : vector<1x1024xf32> to vector<32x1024xf32>
    %31 = arith.addf %28, %30 : vector<32x1024xf32>
    %cst_10 = arith.constant 0.000000e+00 : f32
    %32 = vector.broadcast %cst_10 : f32 to vector<32x1024xf32>
    %33 = arith.maximumf %31, %32 : vector<32x1024xf32>
    %c0_11 = arith.constant 0 : index
    %c0_12 = arith.constant 0 : index
    %34 = vector.load %arg4[%c0_11, %c0_12] : memref<32x1024xf32, #tpu.memory_space<vmem>>, vector<32x1024xf32>
    tpu.vector_store %arg4[%c0_11, %c0_12], %33 {strides = array<i32>} : memref<32x1024xf32, #tpu.memory_space<vmem>>, vector<32x1024xf32>,
    return
  }
  func.func @transform_0(%arg0: i32) -> (i32, i32) {
    %c0_i32 = arith.constant 0 : i32
    %c0_i32_0 = arith.constant 0 : i32
    %c0_i32_1 = arith.constant 0 : i32
    return %c0_i32, %c0_i32_0 : i32, i32
  }
  func.func @transform_1(%arg0: i32) -> (i32, i32) {
    %c0_i32 = arith.constant 0 : i32
    %c0_i32_0 = arith.constant 0 : i32
    return %c0_i32, %arg0 : i32, i32
  }
  func.func @transform_2(%arg0: i32) -> (i32, i32) {
    %c0_i32 = arith.constant 0 : i32
    %c0_i32_0 = arith.constant 0 : i32
    %c0_i32_1 = arith.constant 0 : i32
    return %c0_i32, %c0_i32_0 : i32, i32
  }
  func.func @transform_3(%arg0: i32) -> (i32, i32) {
    %c0_i32 = arith.constant 0 : i32
    %c0_i32_0 = arith.constant 0 : i32
    return %c0_i32, %arg0 : i32, i32
  }
}

</mosaic_0001>

<bundles_post_ra>
// kernel: res_forward.1
= control target key start
LH: loop header
LB: loop body
LE: loop exit
PB: predicated region body
PF: predicated region fallthrough
CT: control target
= control target key end

     0   :  { %8 = vsyncpa [#allocation3], 0  ;;  %s5979_s0 = inlined_call_operand.hbm [shape: f32[32,1024], index: 0, kind: input, shape index: {}]   ;;  %s5980_s1 = inlined_call_operand.hbm [shape: bf16[1024,1024], index: 1, kind: input, shape index: {}]   ;;  %s5981_s2 = inlined_call_operand.vmem [shape: f32[2,1024], index: 2, kind: input, shape index: {}]   ;;  %s5982_s3 = inlined_call_operand.hbm [shape: f32[32,1024], index: 3, kind: output, shape index: {}]  }
   0x1   :  { %9 = vsyncpa [#allocation6], 0 }
   0x2   :  { %10 = vsyncpa [#allocation4], 0  ;;  %s5372_s12 = smov [#allocation2]   ;;  %s5300_s16 = scalar_lea.hbm %s5979_s0, 4096 }
   0x3   :  { %s16_s13 = sshll.u32 %s5372_s12, 4  ;;  %p5301_p0 = scmp.ne.s32.totalorder %s5979_s0, %s5300_s16  ;;  %s17_s13 = int_to_ptr.vmem [resolvable:$true] %s16_s13 }
   0x4   :  { %p5304_p1 = scmp.lt.u32.totalorder %s5300_s16, %s5979_s0 }
   0x6   :  { %p5306_p2 = pnand %p5304_p1, %p5301_p0 }
   0x8   :  { %5309 = shalt.err (!%p5306_p2)
}
   0x9   :  { %s5310_s21 = scalar_lea.vmem %s17_s13, 4096  ;;  %p5315_p4 = scmp.lt.s32.totalorder %s17_s13, %s17_s13 }
   0xa   :  { %p5311_p3 = scmp.ne.s32.totalorder %s17_s13, %s5310_s21  ;;  %p5316_p5 = scmp.lt.s32.totalorder %s5310_s21, %s5310_s21 }
   0xc   :  { %p5317_p6 = por %p5316_p5, %p5315_p4 }
   0xe   :  { %p5318_p7 = pnand %p5317_p6, %p5311_p3 }
  0x10   :  { %5321 = shalt.err (!%p5318_p7)
}
  0x11   :  { %s5373_s22 = smov 1024   ;;  %s5374_s23 = smov 64  }
  0x12   :  { %22 = dma.hbm_to_vmem [thread:$0]  %s5979_s0, 4096, %s17_s13, [#allocation3], %s5373_s22, %s5373_s22, %s5374_s23  }
  0x13   :  { %s5375_s26 = smov [#allocation5]   ;;  %s5322_s30 = scalar_lea.hbm %s5980_s1, 65536 }
  0x14   :  { %s28_s27 = sshll.u32 %s5375_s26, 4  ;;  %p5323_p8 = scmp.ne.s32.totalorder %s5980_s1, %s5322_s30  ;;  %s29_s27 = int_to_ptr.vmem [resolvable:$true] %s28_s27 }
  0x15   :  { %p5326_p9 = scmp.lt.u32.totalorder %s5322_s30, %s5980_s1 }
  0x17   :  { %p5328_p10 = pnand %p5326_p9, %p5323_p8 }
  0x19   :  { %5331 = shalt.err (!%p5328_p10)
}
  0x1a   :  { %s5332_s8 = scalar_lea.vmem %s29_s27, 65536  ;;  %p5337_p12 = scmp.lt.s32.totalorder %s29_s27, %s29_s27 }
  0x1b   :  { %p5333_p11 = scmp.ne.s32.totalorder %s29_s27, %s5332_s8  ;;  %p5338_p13 = scmp.lt.s32.totalorder %s5332_s8, %s5332_s8 }
  0x1d   :  { %p5339_p0 = por %p5338_p13, %p5337_p12 }
  0x1f   :  { %p5340_p1 = pnand %p5339_p0, %p5333_p11 }
  0x21   :  { %5343 = shalt.err (!%p5340_p1)
}
  0x22   :  { %s5376_s0 = smov 512   ;;  %s5377_s9 = smov 32  }
  0x23   :  { %34 = dma.hbm_to_vmem [thread:$0]  %s5980_s1, 65536, %s29_s27, [#allocation6], %s5376_s0, %s5376_s0, %s5377_s9  }
  0x24   :  { %5366 = dma.done.wait [#allocation3], 4096  }
  0x25   :  { %5367 = vsyncadd [#allocation3], 4294963200 }
  0x26   :  { %5368 = dma.done.wait [#allocation6], 65536  }
  0x27   :  { %5369 = vsyncadd [#allocation6], 4294901760  ;;  %v92_v0 = vld [vmem:[#allocation5] sm:$0xff]  ;;  %v93_v2 = vld [vmem:[#allocation5 + $0x8] sm:$0xff] }
  0x28   :  { %v96_v1 = vld [vmem:[#allocation5 + $0x20] sm:$0xff]  ;;  %v97_v4 = vld [vmem:[#allocation5 + $0x28] sm:$0xff] }
  0x29   :  { %v4669_v3 = vcombine.high %v92_v0, %v96_v1  ;;  %v4668_v5 = vcombine.low %v92_v0, %v96_v1  ;;  %v100_v6 = vld [vmem:[#allocation5 + $0x40] sm:$0xff]  ;;  %v4671_v8 = vcombine.high %v93_v2, %v97_v4  ;;  %v4670_v9 = vcombine.low %v93_v2, %v97_v4  ;;  %v101_v11 = vld [vmem:[#allocation5 + $0x48] sm:$0xff] }
  0x2a   :  { %v104_v7 = vld [vmem:[#allocation5 + $0x60] sm:$0xff]  ;;  %v105_v12 = vld [vmem:[#allocation5 + $0x68] sm:$0xff] }
  0x2b   :  { %v4677_v10 = vcombine.high %v100_v6, %v104_v7  ;;  %v108_v13 = vld [vmem:[#allocation5 + $0x80] sm:$0xff]  ;;  %3164 = vmatprep.subr.bf16.mxu0 %v4669_v3  ;;  %v4679_v14 = vcombine.high %v101_v11, %v105_v12  ;;  %v109_v16 = vld [vmem:[#allocation5 + $0x88] sm:$0xff]  ;;  %3376 = vmatprep.subr.bf16.mxu1 %v4671_v8  ;;  %v4676_v18 = vcombine.low %v100_v6, %v104_v7 }
  0x2c   :  { %v112_v15 = vld [vmem:[#allocation5 + $0xa0] sm:$0xff]  ;;  %v113_v17 = vld [vmem:[#allocation5 + $0xa8] sm:$0xff]  ;;  %3165 = vmatpush1.bf16.msra.mxu0 %v4668_v5  ;;  %3377 = vmatpush1.bf16.msra.mxu1 %v4670_v9  ;;  %v4678_v19 = vcombine.low %v101_v11, %v105_v12 }
  0x2d   :  { %3166 = vmatprep.subr.bf16.mxu0 %v4677_v10  ;;  %v4685_v20 = vcombine.high %v108_v13, %v112_v15  ;;  %3378 = vmatprep.subr.bf16.mxu1 %v4679_v14  ;;  %v4687_v21 = vcombine.high %v109_v16, %v113_v17  ;;  %v116_v22 = vld [vmem:[#allocation5 + $0xc0] sm:$0xff]  ;;  %v117_v24 = vld [vmem:[#allocation5 + $0xc8] sm:$0xff]  ;;  %v4684_v26 = vcombine.low %v108_v13, %v112_v15 }
  0x2e   :  { %v120_v23 = vld [vmem:[#allocation5 + $0xe0] sm:$0xff]  ;;  %v121_v25 = vld [vmem:[#allocation5 + $0xe8] sm:$0xff]  ;;  %v4686_v27 = vcombine.low %v109_v16, %v113_v17 }
  0x2f   :  { %v4693_v28 = vcombine.high %v116_v22, %v120_v23  ;;  %v4695_v29 = vcombine.high %v117_v24, %v121_v25  ;;  %v124_v30 = vld [vmem:[#allocation5 + $0x100] sm:$0xff]  ;;  %v125_v32 = vld [vmem:[#allocation5 + $0x108] sm:$0xff]  ;;  %v4692_v34 = vcombine.low %v116_v22, %v120_v23  ;;  %v4694_v35 = vcombine.low %v117_v24, %v121_v25 }
  0x30   :  { %3167 = vmatpush1.bf16.msra.mxu0 %v4676_v18  ;;  %3379 = vmatpush1.bf16.msra.mxu1 %v4678_v19  ;;  %v128_v31 = vld [vmem:[#allocation5 + $0x120] sm:$0xff]  ;;  %v129_v33 = vld [vmem:[#allocation5 + $0x128] sm:$0xff] }
  0x31   :  { %3168 = vmatprep.subr.bf16.mxu0 %v4685_v20  ;;  %3380 = vmatprep.subr.bf16.mxu1 %v4687_v21  ;;  %v4701_v36 = vcombine.high %v124_v30, %v128_v31  ;;  %v4703_v37 = vcombine.high %v125_v32, %v129_v33  ;;  %v132_v38 = vld [vmem:[#allocation5 + $0x140] sm:$0xff]  ;;  %v133_v40 = vld [vmem:[#allocation5 + $0x148] sm:$0xff]  ;;  %v4700_v42 = vcombine.low %v124_v30, %v128_v31 }
  0x32   :  { %v136_v39 = vld [vmem:[#allocation5 + $0x160] sm:$0xff]  ;;  %v137_v41 = vld [vmem:[#allocation5 + $0x168] sm:$0xff]  ;;  %v4702_v43 = vcombine.low %v125_v32, %v129_v33 }
  0x33   :  { %v4709_v44 = vcombine.high %v132_v38, %v136_v39  ;;  %v4711_v45 = vcombine.high %v133_v40, %v137_v41  ;;  %v140_v46 = vld [vmem:[#allocation5 + $0x180] sm:$0xff]  ;;  %v141_v48 = vld [vmem:[#allocation5 + $0x188] sm:$0xff]  ;;  %v4708_v50 = vcombine.low %v132_v38, %v136_v39  ;;  %v4710_v51 = vcombine.low %v133_v40, %v137_v41 }
  0x34   :  { %3169 = vmatpush1.bf16.msra.mxu0 %v4684_v26  ;;  %3381 = vmatpush1.bf16.msra.mxu1 %v4686_v27  ;;  %v144_v47 = vld [vmem:[#allocation5 + $0x1a0] sm:$0xff]  ;;  %v145_v49 = vld [vmem:[#allocation5 + $0x1a8] sm:$0xff] }
  0x35   :  { %3170 = vmatprep.subr.bf16.mxu0 %v4693_v28  ;;  %3382 = vmatprep.subr.bf16.mxu1 %v4695_v29  ;;  %v4717_v52 = vcombine.high %v140_v46, %v144_v47  ;;  %v45_v53 = vld [vmem:[#allocation2 + $0x8] sm:$0xff]  ;;  %v4719_v55 = vcombine.high %v141_v48, %v145_v49  ;;  %v148_v56 = vld [vmem:[#allocation5 + $0x1c0] sm:$0xff]  ;;  %v4716_v61 = vcombine.low %v140_v46, %v144_v47 }
  0x36   :  { %v53_v54 = vld [vmem:[#allocation2 + $0x48] sm:$0xff]  ;;  %v152_v57 = vld [vmem:[#allocation5 + $0x1e0] sm:$0xff]  ;;  %v4718_v62 = vcombine.low %v141_v48, %v145_v49 }
  0x37   :  { %v5427_v58 = vpack.c.bf16 %v53_v54, %v45_v53  ;;  %v149_v59 = vld [vmem:[#allocation5 + $0x1c8] sm:$0xff]  ;;  %v4725_v63 = vcombine.high %v148_v56, %v152_v57  ;;  %v156_v1 = vld [vmem:[#allocation5 + $0x200] sm:$0xff]  ;;  %v4724_v5 = vcombine.low %v148_v56, %v152_v57 }
  0x38   :  { %3171 = vmatpush1.bf16.msra.mxu0 %v4692_v34  ;;  %3383 = vmatpush1.bf16.msra.mxu1 %v4694_v35  ;;  %v153_v60 = vld [vmem:[#allocation5 + $0x1e8] sm:$0xff]  ;;  %v160_v2 = vld [vmem:[#allocation5 + $0x220] sm:$0xff] }
  0x39   :  { %3172 = vmatprep.subr.bf16.mxu0 %v4701_v36  ;;  %3384 = vmatprep.subr.bf16.mxu1 %v4703_v37  ;;  %v4727_v0 = vcombine.high %v149_v59, %v153_v60  ;;  %v157_v3 = vld [vmem:[#allocation5 + $0x208] sm:$0xff]  ;;  %v4726_v6 = vcombine.low %v149_v59, %v153_v60  ;;  %v4733_v7 = vcombine.high %v156_v1, %v160_v2  ;;  %v164_v9 = vld [vmem:[#allocation5 + $0x240] sm:$0xff] }
  0x3a   :  { %3196 = vmatprep.mubr.bf16.mxu0 %v5427_v58  ;;  %3408 = vmatprep.mubr.bf16.mxu1 %v5427_v58  ;;  %v161_v4 = vld [vmem:[#allocation5 + $0x228] sm:$0xff]  ;;  %v168_v10 = vld [vmem:[#allocation5 + $0x260] sm:$0xff]  ;;  %v4732_v13 = vcombine.low %v156_v1, %v160_v2 }
  0x3b   :  { %v4735_v8 = vcombine.high %v157_v3, %v161_v4  ;;  %v165_v11 = vld [vmem:[#allocation5 + $0x248] sm:$0xff]  ;;  %v4734_v14 = vcombine.low %v157_v3, %v161_v4  ;;  %v4741_v15 = vcombine.high %v164_v9, %v168_v10  ;;  %v172_v17 = vld [vmem:[#allocation5 + $0x280] sm:$0xff]  ;;  %v4740_v21 = vcombine.low %v164_v9, %v168_v10 }
  0x3c   :  { %3173 = vmatpush1.bf16.msra.mxu0 %v4700_v42  ;;  %3385 = vmatpush1.bf16.msra.mxu1 %v4702_v43  ;;  %v169_v12 = vld [vmem:[#allocation5 + $0x268] sm:$0xff]  ;;  %v176_v18 = vld [vmem:[#allocation5 + $0x2a0] sm:$0xff] }
  0x3d   :  { %3174 = vmatprep.subr.bf16.mxu0 %v4709_v44  ;;  %3386 = vmatprep.subr.bf16.mxu1 %v4711_v45  ;;  %v4743_v16 = vcombine.high %v165_v11, %v169_v12  ;;  %v173_v19 = vld [vmem:[#allocation5 + $0x288] sm:$0xff]  ;;  %v4742_v22 = vcombine.low %v165_v11, %v169_v12  ;;  %v4749_v23 = vcombine.high %v172_v17, %v176_v18  ;;  %v180_v25 = vld [vmem:[#allocation5 + $0x2c0] sm:$0xff] }
  0x3e   :  { %v177_v20 = vld [vmem:[#allocation5 + $0x2a8] sm:$0xff]  ;;  %v184_v26 = vld [vmem:[#allocation5 + $0x2e0] sm:$0xff]  ;;  %v4748_v29 = vcombine.low %v172_v17, %v176_v18 }
  0x3f   :  { %v4751_v24 = vcombine.high %v173_v19, %v177_v20  ;;  %v181_v27 = vld [vmem:[#allocation5 + $0x2c8] sm:$0xff]  ;;  %v4750_v30 = vcombine.low %v173_v19, %v177_v20  ;;  %v4757_v31 = vcombine.high %v180_v25, %v184_v26  ;;  %v188_v33 = vld [vmem:[#allocation5 + $0x300] sm:$0xff]  ;;  %v4756_v37 = vcombine.low %v180_v25, %v184_v26 }
  0x40   :  { %3175 = vmatpush1.bf16.msra.mxu0 %v4708_v50  ;;  %3387 = vmatpush1.bf16.msra.mxu1 %v4710_v51  ;;  %v185_v28 = vld [vmem:[#allocation5 + $0x2e8] sm:$0xff]  ;;  %v192_v34 = vld [vmem:[#allocation5 + $0x320] sm:$0xff] }
  0x41   :  { %3176 = vmatprep.subr.bf16.mxu0 %v4717_v52  ;;  %3388 = vmatprep.subr.bf16.mxu1 %v4719_v55  ;;  %v4759_v32 = vcombine.high %v181_v27, %v185_v28  ;;  %v189_v35 = vld [vmem:[#allocation5 + $0x308] sm:$0xff]  ;;  %v4758_v38 = vcombine.low %v181_v27, %v185_v28  ;;  %v4765_v39 = vcombine.high %v188_v33, %v192_v34  ;;  %v196_v41 = vld [vmem:[#allocation5 + $0x340] sm:$0xff] }
  0x42   :  { %v193_v36 = vld [vmem:[#allocation5 + $0x328] sm:$0xff]  ;;  %v200_v42 = vld [vmem:[#allocation5 + $0x360] sm:$0xff]  ;;  %v4764_v45 = vcombine.low %v188_v33, %v192_v34 }
  0x43   :  { %v4767_v40 = vcombine.high %v189_v35, %v193_v36  ;;  %v197_v43 = vld [vmem:[#allocation5 + $0x348] sm:$0xff]  ;;  %v4766_v46 = vcombine.low %v189_v35, %v193_v36  ;;  %v4773_v47 = vcombine.high %v196_v41, %v200_v42  ;;  %v204_v49 = vld [vmem:[#allocation5 + $0x380] sm:$0xff]  ;;  %v4772_v53 = vcombine.low %v196_v41, %v200_v42 }
  0x44   :  { %3177 = vmatpush1.bf16.msra.mxu0 %v4716_v61  ;;  %3389 = vmatpush1.bf16.msra.mxu1 %v4718_v62  ;;  %v201_v44 = vld [vmem:[#allocation5 + $0x368] sm:$0xff]  ;;  %v208_v50 = vld [vmem:[#allocation5 + $0x3a0] sm:$0xff] }
  0x45   :  { %3178 = vmatprep.subr.bf16.mxu0 %v4725_v63  ;;  %3390 = vmatprep.subr.bf16.mxu1 %v4727_v0  ;;  %v4775_v48 = vcombine.high %v197_v43, %v201_v44  ;;  %v205_v51 = vld [vmem:[#allocation5 + $0x388] sm:$0xff]  ;;  %v4774_v54 = vcombine.low %v197_v43, %v201_v44  ;;  %v4781_v55 = vcombine.high %v204_v49, %v208_v50  ;;  %v212_v57 = vld [vmem:[#allocation5 + $0x3c0] sm:$0xff] }
  0x46   :  { %v209_v52 = vld [vmem:[#allocation5 + $0x3a8] sm:$0xff]  ;;  %v216_v59 = vld [vmem:[#allocation5 + $0x3e0] sm:$0xff]  ;;  %v4780_v62 = vcombine.low %v204_v49, %v208_v50 }
  0x47   :  { %v4783_v56 = vcombine.high %v205_v51, %v209_v52  ;;  %v213_v60 = vld [vmem:[#allocation5 + $0x3c8] sm:$0xff]  ;;  %v4782_v63 = vcombine.low %v205_v51, %v209_v52  ;;  %v4789_v0 = vcombine.high %v212_v57, %v216_v59  ;;  %v220_v2 = vld [vmem:[#allocation5 + $0x400] sm:$0xff] }
  0x48   :  { %3179 = vmatpush1.bf16.msra.mxu0 %v4724_v5  ;;  %3391 = vmatpush1.bf16.msra.mxu1 %v4726_v6  ;;  %v217_v61 = vld [vmem:[#allocation5 + $0x3e8] sm:$0xff]  ;;  %v224_v3 = vld [vmem:[#allocation5 + $0x420] sm:$0xff]  ;;  %v4788_v6 = vcombine.low %v212_v57, %v216_v59 }
  0x49   :  { %3180 = vmatprep.subr.bf16.mxu0 %v4733_v7  ;;  %3392 = vmatprep.subr.bf16.mxu1 %v4735_v8  ;;  %v4791_v1 = vcombine.high %v213_v60, %v217_v61  ;;  %v221_v4 = vld [vmem:[#allocation5 + $0x408] sm:$0xff]  ;;  %v44_v7 = vld [vmem:[#allocation2] sm:$0xff]  ;;  %v4790_v9 = vcombine.low %v213_v60, %v217_v61  ;;  %v4797_v10 = vcombine.high %v220_v2, %v224_v3 }
  0x4a   :  { %v225_v5 = vld [vmem:[#allocation5 + $0x428] sm:$0xff]  ;;  %v52_v8 = vld [vmem:[#allocation2 + $0x40] sm:$0xff]  ;;  %v4796_v19 = vcombine.low %v220_v2, %v224_v3 }
  0x4b   :  { %v4799_v11 = vcombine.high %v221_v4, %v225_v5  ;;  %v228_v12 = vld [vmem:[#allocation5 + $0x440] sm:$0xff]  ;;  %v61_v17 = vld [vmem:[#allocation2 + $0x88] sm:$0xff]  ;;  %v4798_v20 = vcombine.low %v221_v4, %v225_v5 }
  0x4c   :  { %3181 = vmatpush1.bf16.msra.mxu0 %v4732_v13  ;;  %3393 = vmatpush1.bf16.msra.mxu1 %v4734_v14  ;;  %v232_v13 = vld [vmem:[#allocation5 + $0x460] sm:$0xff]  ;;  %v229_v14 = vld [vmem:[#allocation5 + $0x448] sm:$0xff] }
  0x4d   :  { %3182 = vmatprep.subr.bf16.mxu0 %v4741_v15  ;;  %3394 = vmatprep.subr.bf16.mxu1 %v4743_v16  ;;  %v5431_v15 = vpack.c.bf16 %v52_v8, %v44_v7  ;;  %v233_v16 = vld [vmem:[#allocation5 + $0x468] sm:$0xff]  ;;  %v4804_v28 = vcombine.low %v228_v12, %v232_v13  ;;  %v244_v34 = vld [vmem:[#allocation5 + $0x4c0] sm:$0xff] }
  0x4e   :  { %v69_v18 = vld [vmem:[#allocation2 + $0xc8] sm:$0xff]  ;;  %v248_v35 = vld [vmem:[#allocation5 + $0x4e0] sm:$0xff] }
  0x4f   :  { %v5433_v25 = vpack.c.bf16 %v69_v18, %v61_v17  ;;  %v237_v26 = vld [vmem:[#allocation5 + $0x488] sm:$0xff]  ;;  %v4821_v43 = vcombine.high %v244_v34, %v248_v35  ;;  %v4820_v50 = vcombine.low %v244_v34, %v248_v35  ;;  %v276_v7 = vld [vmem:[#allocation5 + $0x5c0] sm:$0xff] }
  0x50   :  { %3183 = vmatpush1.bf16.msra.mxu0 %v4740_v21  ;;  %3395 = vmatpush1.bf16.msra.mxu1 %v4742_v22  ;;  %v4805_v21 = vcombine.high %v228_v12, %v232_v13  ;;  %v4807_v22 = vcombine.high %v229_v14, %v233_v16  ;;  %v241_v27 = vld [vmem:[#allocation5 + $0x4a8] sm:$0xff]  ;;  %v280_v8 = vld [vmem:[#allocation5 + $0x5e0] sm:$0xff] }
  0x51   :  { %3184 = vmatprep.subr.bf16.mxu0 %v4749_v23  ;;  %3396 = vmatprep.subr.bf16.mxu1 %v4751_v24  ;;  %v236_v23 = vld [vmem:[#allocation5 + $0x480] sm:$0xff]  ;;  %v4815_v33 = vcombine.high %v237_v26, %v241_v27  ;;  %v245_v36 = vld [vmem:[#allocation5 + $0x4c8] sm:$0xff]  ;;  %v4814_v42 = vcombine.low %v237_v26, %v241_v27  ;;  %v4853_v13 = vcombine.high %v276_v7, %v280_v8 }
  0x52   :  { %v240_v24 = vld [vmem:[#allocation5 + $0x4a0] sm:$0xff]  ;;  %v257_v49 = vld [vmem:[#allocation5 + $0x528] sm:$0xff] }
  0x53   :  { %v4812_v41 = vcombine.low %v236_v23, %v240_v24  ;;  %v265_v57 = vld [vmem:[#allocation5 + $0x568] sm:$0xff]  ;;  %v288_v17 = vld [vmem:[#allocation5 + $0x620] sm:$0xff] }
  0x54   :  { %3185 = vmatpush1.bf16.msra.mxu0 %v4748_v29  ;;  %3397 = vmatpush1.bf16.msra.mxu1 %v4750_v30  ;;  %v60_v29 = vld [vmem:[#allocation2 + $0x80] sm:$0xff]  ;;  %v273_v2 = vld [vmem:[#allocation5 + $0x5a8] sm:$0xff] }
  0x55   :  { %3186 = vmatprep.subr.bf16.mxu0 %v4757_v31  ;;  %3398 = vmatprep.subr.bf16.mxu1 %v4759_v32  ;;  %v68_v30 = vld [vmem:[#allocation2 + $0xc0] sm:$0xff]  ;;  %v4806_v31 = vcombine.low %v229_v14, %v233_v16  ;;  %v4813_v32 = vcombine.high %v236_v23, %v240_v24  ;;  %v285_v18 = vld [vmem:[#allocation5 + $0x608] sm:$0xff] }
  0x56   :  { %v284_v16 = vld [vmem:[#allocation5 + $0x600] sm:$0xff]  ;;  %v293_v27 = vld [vmem:[#allocation5 + $0x648] sm:$0xff] }
  0x57   :  { %v292_v24 = vld [vmem:[#allocation5 + $0x640] sm:$0xff]  ;;  %v301_v35 = vld [vmem:[#allocation5 + $0x688] sm:$0xff] }
  0x58   :  { %3187 = vmatpush1.bf16.msra.mxu0 %v4756_v37  ;;  %3399 = vmatpush1.bf16.msra.mxu1 %v4758_v38  ;;  %v249_v37 = vld [vmem:[#allocation5 + $0x4e8] sm:$0xff]  ;;  %v5439_v38 = vpack.c.bf16 %v68_v30, %v60_v29  ;;  %v296_v26 = vld [vmem:[#allocation5 + $0x660] sm:$0xff]  ;;  %v4860_v29 = vcombine.low %v284_v16, %v288_v17 }
  0x59   :  { %3188 = vmatprep.subr.bf16.mxu0 %v4765_v39  ;;  %3400 = vmatprep.subr.bf16.mxu1 %v4767_v40  ;;  %v47_v39 = vld [vmem:[#allocation2 + $0x18] sm:$0xff]  ;;  %v4823_v44 = vcombine.high %v245_v36, %v249_v37  ;;  %v4822_v51 = vcombine.low %v245_v36, %v249_v37  ;;  %v304_v34 = vld [vmem:[#allocation5 + $0x6a0] sm:$0xff]  ;;  %v305_v36 = vld [vmem:[#allocation5 + $0x6a8] sm:$0xff]  ;;  %v4868_v37 = vcombine.low %v292_v24, %v296_v26 }
  0x5a   :  { %v55_v40 = vld [vmem:[#allocation2 + $0x58] sm:$0xff] }
  0x5c   :  { %3189 = vmatpush1.bf16.msra.mxu0 %v4764_v45  ;;  %3401 = vmatpush1.bf16.msra.mxu1 %v4766_v46  ;;  %v252_v45 = vld [vmem:[#allocation5 + $0x500] sm:$0xff] }
  0x5d   :  { %3190 = vmatprep.subr.bf16.mxu0 %v4773_v47  ;;  %3402 = vmatprep.subr.bf16.mxu1 %v4775_v48  ;;  %v256_v46 = vld [vmem:[#allocation5 + $0x520] sm:$0xff]  ;;  %v5441_v47 = vpack.c.bf16 %v55_v40, %v47_v39  ;;  %v253_v48 = vld [vmem:[#allocation5 + $0x508] sm:$0xff] }
  0x5e   :  { %v4829_v52 = vcombine.high %v252_v45, %v256_v46  ;;  %v4828_v59 = vcombine.low %v252_v45, %v256_v46  ;;  %v4830_v60 = vcombine.low %v253_v48, %v257_v49  ;;  %v313_v45 = vld [vmem:[#allocation5 + $0x6e8] sm:$0xff] }
  0x60   :  { %3191 = vmatpush1.bf16.msra.mxu0 %v4772_v53  ;;  %3403 = vmatpush1.bf16.msra.mxu1 %v4774_v54  ;;  %v4831_v53 = vcombine.high %v253_v48, %v257_v49  ;;  %v260_v54 = vld [vmem:[#allocation5 + $0x540] sm:$0xff]  ;;  %v4878_v48 = vcombine.low %v301_v35, %v305_v36 }
  0x61   :  { %3192 = vmatprep.subr.bf16.mxu0 %v4781_v55  ;;  %3404 = vmatprep.subr.bf16.mxu1 %v4783_v56  ;;  %v264_v55 = vld [vmem:[#allocation5 + $0x560] sm:$0xff]  ;;  %v261_v56 = vld [vmem:[#allocation5 + $0x548] sm:$0xff] }
  0x62   :  { %v4837_v61 = vcombine.high %v260_v54, %v264_v55  ;;  %v4836_v3 = vcombine.low %v260_v54, %v264_v55  ;;  %v4838_v4 = vcombine.low %v261_v56, %v265_v57  ;;  %v321_v54 = vld [vmem:[#allocation5 + $0x728] sm:$0xff] }
  0x64   :  { %3193 = vmatpush1.bf16.msra.mxu0 %v4780_v62  ;;  %3405 = vmatpush1.bf16.msra.mxu1 %v4782_v63  ;;  %v4839_v62 = vcombine.high %v261_v56, %v265_v57  ;;  %v268_v63 = vld [vmem:[#allocation5 + $0x580] sm:$0xff] }
  0x65   :  { %3194 = vmatprep.subr.bf16.mxu0 %v4789_v0  ;;  %3406 = vmatprep.subr.bf16.mxu1 %v4791_v1  ;;  %v272_v0 = vld [vmem:[#allocation5 + $0x5a0] sm:$0xff]  ;;  %v269_v1 = vld [vmem:[#allocation5 + $0x588] sm:$0xff] }
  0x66   :  { %v4845_v5 = vcombine.high %v268_v63, %v272_v0  ;;  %v4846_v12 = vcombine.low %v269_v1, %v273_v2 }
  0x68   :  { %3195 = vmatpush1.bf16.msra.mxu0 %v4788_v6  ;;  %3407 = vmatpush1.bf16.msra.mxu1 %v4790_v9  ;;  %v4847_v6 = vcombine.high %v269_v1, %v273_v2  ;;  %v277_v9 = vld [vmem:[#allocation5 + $0x5c8] sm:$0xff] }
  0x69   :  { %3217 = vmatprep.subr.bf16.mxu0 %v4797_v10  ;;  %3429 = vmatprep.subr.bf16.mxu1 %v4799_v11  ;;  %v281_v10 = vld [vmem:[#allocation5 + $0x5e8] sm:$0xff]  ;;  %v4844_v11 = vcombine.low %v268_v63, %v272_v0 }
  0x6a   :  { %v4855_v14 = vcombine.high %v277_v9, %v281_v10  ;;  %v329_v63 = vld [vmem:[#allocation5 + $0x768] sm:$0xff] }
  0x6b   :  { %3197 = vmatmul.mubr.bf16.vlgmr.msra.gmra.mrb[0].mxu0 %v5431_v15  ;;  %3409 = vmatmul.mubr.bf16.vlgmr.msra.gmra.mrb[0].mxu1 %v5431_v15 }
  0x6c   :  { %3218 = vmatpush1.bf16.msra.mxu0 %v4796_v19  ;;  %3430 = vmatpush1.bf16.msra.mxu1 %v4798_v20  ;;  %v289_v19 = vld [vmem:[#allocation5 + $0x628] sm:$0xff]  ;;  %v4852_v20 = vcombine.low %v276_v7, %v280_v8 }
  0x6d   :  { %3219 = vmatprep.subr.bf16.mxu0 %v4805_v21  ;;  %3431 = vmatprep.subr.bf16.mxu1 %v4807_v22  ;;  %v4854_v21 = vcombine.low %v277_v9, %v281_v10  ;;  %v4861_v22 = vcombine.high %v284_v16, %v288_v17  ;;  %v4863_v23 = vcombine.high %v285_v18, %v289_v19  ;;  %v337_v7 = vld [vmem:[#allocation5 + $0x7a8] sm:$0xff] }
  0x6e   :  { %3206 = vmatprep.mubr.bf16.mxu0 %v5433_v25  ;;  %3418 = vmatprep.mubr.bf16.mxu1 %v5433_v25  ;;  %v4862_v30 = vcombine.low %v285_v18, %v289_v19  ;;  %v345_v16 = vld [vmem:[#allocation5 + $0x7e8] sm:$0xff] }
  0x70   :  { %3220 = vmatpush1.bf16.msra.mxu0 %v4804_v28  ;;  %3432 = vmatpush1.bf16.msra.mxu1 %v4806_v31  ;;  %v297_v28 = vld [vmem:[#allocation5 + $0x668] sm:$0xff]  ;;  %v4869_v31 = vcombine.high %v292_v24, %v296_v26 }
  0x71   :  { %3221 = vmatprep.subr.bf16.mxu0 %v4813_v32  ;;  %3433 = vmatprep.subr.bf16.mxu1 %v4815_v33  ;;  %v4871_v32 = vcombine.high %v293_v27, %v297_v28  ;;  %v300_v33 = vld [vmem:[#allocation5 + $0x680] sm:$0xff]  ;;  %v4870_v39 = vcombine.low %v293_v27, %v297_v28  ;;  %v353_v24 = vld [vmem:[#allocation5 + $0x828] sm:$0xff]  ;;  %v46_v27 = vld [vmem:[#allocation2 + $0x10] sm:$0xff] }
  0x72   :  { %v4877_v40 = vcombine.high %v300_v33, %v304_v34  ;;  %v4876_v46 = vcombine.low %v300_v33, %v304_v34  ;;  %v54_v28 = vld [vmem:[#allocation2 + $0x50] sm:$0xff]  ;;  %v360_v33 = vld [vmem:[#allocation5 + $0x860] sm:$0xff]  ;;  %v357_v34 = vld [vmem:[#allocation5 + $0x848] sm:$0xff] }
  0x73   :  { %3207 = vmatmul.mubr.bf16.gmra.mrb[4].mxu0 %v5439_v38  ;;  %3419 = vmatmul.mubr.bf16.gmra.mrb[4].mxu1 %v5439_v38 }
  0x74   :  { %3222 = vmatpush1.bf16.msra.mxu0 %v4812_v41  ;;  %3434 = vmatpush1.bf16.msra.mxu1 %v4814_v42  ;;  %v4879_v41 = vcombine.high %v301_v35, %v305_v36  ;;  %v308_v42 = vld [vmem:[#allocation5 + $0x6c0] sm:$0xff]  ;;  %v5447_v35 = vpack.c.bf16 %v54_v28, %v46_v27  ;;  %v361_v36 = vld [vmem:[#allocation5 + $0x868] sm:$0xff] }
  0x75   :  { %3223 = vmatprep.subr.bf16.mxu0 %v4821_v43  ;;  %3435 = vmatprep.subr.bf16.mxu1 %v4823_v44  ;;  %v312_v43 = vld [vmem:[#allocation5 + $0x6e0] sm:$0xff]  ;;  %v309_v44 = vld [vmem:[#allocation5 + $0x6c8] sm:$0xff] }
  0x76   :  { %3249 = vmatprep.mubr.bf16.mxu0 %v5441_v47  ;;  %3461 = vmatprep.mubr.bf16.mxu1 %v5441_v47  ;;  %v4885_v49 = vcombine.high %v308_v42, %v312_v43  ;;  %v4884_v55 = vcombine.low %v308_v42, %v312_v43  ;;  %v4886_v56 = vcombine.low %v309_v44, %v313_v45 }
  0x77   :  { %v4935_v43 = vcombine.high %v357_v34, %v361_v36 }
  0x78   :  { %3224 = vmatpush1.bf16.msra.mxu0 %v4820_v50  ;;  %3436 = vmatpush1.bf16.msra.mxu1 %v4822_v51  ;;  %v4887_v50 = vcombine.high %v309_v44, %v313_v45  ;;  %v316_v51 = vld [vmem:[#allocation5 + $0x700] sm:$0xff] }
  0x79   :  { %3225 = vmatprep.subr.bf16.mxu0 %v4829_v52  ;;  %3437 = vmatprep.subr.bf16.mxu1 %v4831_v53  ;;  %v320_v52 = vld [vmem:[#allocation5 + $0x720] sm:$0xff]  ;;  %v317_v53 = vld [vmem:[#allocation5 + $0x708] sm:$0xff] }
  0x7a   :  { %v4893_v57 = vcombine.high %v316_v51, %v320_v52  ;;  %v4892_v0 = vcombine.low %v316_v51, %v320_v52  ;;  %v4894_v1 = vcombine.low %v317_v53, %v321_v54  ;;  %v364_v44 = vld [vmem:[#allocation5 + $0x880] sm:$0xff]  ;;  %v62_v51 = vld [vmem:[#allocation2 + $0x90] sm:$0xff] }
  0x7b   :  { %v368_v45 = vld [vmem:[#allocation5 + $0x8a0] sm:$0xff]  ;;  %v70_v52 = vld [vmem:[#allocation2 + $0xd0] sm:$0xff] }
  0x7c   :  { %3226 = vmatpush1.bf16.msra.mxu0 %v4828_v59  ;;  %3438 = vmatpush1.bf16.msra.mxu1 %v4830_v60  ;;  %v4895_v59 = vcombine.high %v317_v53, %v321_v54  ;;  %v324_v60 = vld [vmem:[#allocation5 + $0x740] sm:$0xff]  ;;  %v4934_v53 = vcombine.low %v357_v34, %v361_v36  ;;  %v4941_v54 = vcombine.high %v364_v44, %v368_v45  ;;  %v409_v34 = vld [vmem:[#allocation5 + $0x9e8] sm:$0xff] }
  0x7d   :  { %3227 = vmatprep.subr.bf16.mxu0 %v4837_v61  ;;  %3439 = vmatprep.subr.bf16.mxu1 %v4839_v62  ;;  %v328_v61 = vld [vmem:[#allocation5 + $0x760] sm:$0xff]  ;;  %v325_v62 = vld [vmem:[#allocation5 + $0x748] sm:$0xff] }
  0x7e   :  { %v4901_v2 = vcombine.high %v324_v60, %v328_v61  ;;  %v4900_v8 = vcombine.low %v324_v60, %v328_v61  ;;  %v4902_v9 = vcombine.low %v325_v62, %v329_v63  ;;  %v377_v60 = vld [vmem:[#allocation5 + $0x8e8] sm:$0xff]  ;;  %v5455_v61 = vpack.c.bf16 %v70_v52, %v62_v51  ;;  %v420_v51 = vld [vmem:[#allocation5 + $0xa40] sm:$0xff] }
  0x7f   :  { %v424_v52 = vld [vmem:[#allocation5 + $0xa60] sm:$0xff] }
  0x80   :  { %3228 = vmatpush1.bf16.msra.mxu0 %v4836_v3  ;;  %3440 = vmatpush1.bf16.msra.mxu1 %v4838_v4  ;;  %v4903_v3 = vcombine.high %v325_v62, %v329_v63  ;;  %v332_v4 = vld [vmem:[#allocation5 + $0x780] sm:$0xff]  ;;  %v49_v62 = vld [vmem:[#allocation2 + $0x28] sm:$0xff] }
  0x81   :  { %3229 = vmatprep.subr.bf16.mxu0 %v4845_v5  ;;  %3441 = vmatprep.subr.bf16.mxu1 %v4847_v6  ;;  %v336_v5 = vld [vmem:[#allocation5 + $0x7a0] sm:$0xff]  ;;  %v333_v6 = vld [vmem:[#allocation5 + $0x788] sm:$0xff] }
  0x82   :  { %v4909_v10 = vcombine.high %v332_v4, %v336_v5  ;;  %v4908_v17 = vcombine.low %v332_v4, %v336_v5  ;;  %v4910_v18 = vcombine.low %v333_v6, %v337_v7  ;;  %v57_v63 = vld [vmem:[#allocation2 + $0x68] sm:$0xff]  ;;  %v380_v4 = vld [vmem:[#allocation5 + $0x900] sm:$0xff] }
  0x83   :  { %v384_v5 = vld [vmem:[#allocation5 + $0x920] sm:$0xff] }
  0x84   :  { %3230 = vmatpush1.bf16.msra.mxu0 %v4844_v11  ;;  %3442 = vmatpush1.bf16.msra.mxu1 %v4846_v12  ;;  %v4911_v11 = vcombine.high %v333_v6, %v337_v7  ;;  %v340_v12 = vld [vmem:[#allocation5 + $0x7c0] sm:$0xff]  ;;  %v5457_v6 = vpack.c.bf16 %v57_v63, %v49_v62  ;;  %v381_v7 = vld [vmem:[#allocation5 + $0x908] sm:$0xff] }
  0x85   :  { %3231 = vmatprep.subr.bf16.mxu0 %v4853_v13  ;;  %3443 = vmatprep.subr.bf16.mxu1 %v4855_v14  ;;  %v344_v13 = vld [vmem:[#allocation5 + $0x7e0] sm:$0xff]  ;;  %v341_v14 = vld [vmem:[#allocation5 + $0x7c8] sm:$0xff] }
  0x86   :  { %v4917_v19 = vcombine.high %v340_v12, %v344_v13  ;;  %v4916_v26 = vcombine.low %v340_v12, %v344_v13  ;;  %v388_v13 = vld [vmem:[#allocation5 + $0x940] sm:$0xff]  ;;  %v429_v63 = vld [vmem:[#allocation5 + $0xa88] sm:$0xff] }
  0x87   :  { %v432_v62 = vld [vmem:[#allocation5 + $0xaa0] sm:$0xff] }
  0x88   :  { %3232 = vmatpush1.bf16.msra.mxu0 %v4852_v20  ;;  %3444 = vmatpush1.bf16.msra.mxu1 %v4854_v21  ;;  %v4919_v20 = vcombine.high %v341_v14, %v345_v16  ;;  %v348_v21 = vld [vmem:[#allocation5 + $0x800] sm:$0xff] }
  0x89   :  { %3233 = vmatprep.subr.bf16.mxu0 %v4861_v22  ;;  %3445 = vmatprep.subr.bf16.mxu1 %v4863_v23  ;;  %v352_v22 = vld [vmem:[#allocation5 + $0x820] sm:$0xff]  ;;  %v349_v23 = vld [vmem:[#allocation5 + $0x808] sm:$0xff] }
  0x8c   :  { %3234 = vmatpush1.bf16.msra.mxu0 %v4860_v29  ;;  %3446 = vmatpush1.bf16.msra.mxu1 %v4862_v30  ;;  %v4918_v29 = vcombine.low %v341_v14, %v345_v16  ;;  %v4925_v30 = vcombine.high %v348_v21, %v352_v22  ;;  %v392_v14 = vld [vmem:[#allocation5 + $0x960] sm:$0xff]  ;;  %v389_v16 = vld [vmem:[#allocation5 + $0x948] sm:$0xff] }
  0x8d   :  { %3235 = vmatprep.subr.bf16.mxu0 %v4869_v31  ;;  %3447 = vmatprep.subr.bf16.mxu1 %v4871_v32  ;;  %v4927_v31 = vcombine.high %v349_v23, %v353_v24  ;;  %v356_v32 = vld [vmem:[#allocation5 + $0x840] sm:$0xff]  ;;  %v4964_v27 = vcombine.low %v388_v13, %v392_v14 }
  0x8e   :  { %v4933_v42 = vcombine.high %v356_v32, %v360_v33 }
  0x90   :  { %3236 = vmatpush1.bf16.msra.mxu0 %v4868_v37  ;;  %3448 = vmatpush1.bf16.msra.mxu1 %v4870_v39  ;;  %v63_v37 = vld [vmem:[#allocation2 + $0x98] sm:$0xff] }
  0x91   :  { %3237 = vmatprep.subr.bf16.mxu0 %v4877_v40  ;;  %3449 = vmatprep.subr.bf16.mxu1 %v4879_v41  ;;  %v71_v39 = vld [vmem:[#allocation2 + $0xd8] sm:$0xff]  ;;  %v4924_v40 = vcombine.low %v348_v21, %v352_v22  ;;  %v4926_v41 = vcombine.low %v349_v23, %v353_v24  ;;  %v396_v22 = vld [vmem:[#allocation5 + $0x980] sm:$0xff]  ;;  %v397_v24 = vld [vmem:[#allocation5 + $0x988] sm:$0xff] }
  0x92   :  { %v400_v23 = vld [vmem:[#allocation5 + $0x9a0] sm:$0xff] }
  0x93   :  { %v4972_v36 = vcombine.low %v396_v22, %v400_v23 }
  0x94   :  { %3238 = vmatpush1.bf16.msra.mxu0 %v4876_v46  ;;  %3450 = vmatpush1.bf16.msra.mxu1 %v4878_v48  ;;  %v5449_v46 = vpack.c.bf16 %v71_v39, %v63_v37  ;;  %v365_v48 = vld [vmem:[#allocation5 + $0x888] sm:$0xff] }
  0x95   :  { %3239 = vmatprep.subr.bf16.mxu0 %v4885_v49  ;;  %3451 = vmatprep.subr.bf16.mxu1 %v4887_v50  ;;  %v369_v49 = vld [vmem:[#allocation5 + $0x8a8] sm:$0xff]  ;;  %v4932_v50 = vcombine.low %v356_v32, %v360_v33  ;;  %v408_v32 = vld [vmem:[#allocation5 + $0x9e0] sm:$0xff] }
  0x96   :  { %v405_v33 = vld [vmem:[#allocation5 + $0x9c8] sm:$0xff] }
  0x98   :  { %3240 = vmatpush1.bf16.msra.mxu0 %v4884_v55  ;;  %3452 = vmatpush1.bf16.msra.mxu1 %v4886_v56  ;;  %v4943_v55 = vcombine.high %v365_v48, %v369_v49  ;;  %v372_v56 = vld [vmem:[#allocation5 + $0x8c0] sm:$0xff] }
  0x99   :  { %3241 = vmatprep.subr.bf16.mxu0 %v4893_v57  ;;  %3453 = vmatprep.subr.bf16.mxu1 %v4895_v59  ;;  %v376_v57 = vld [vmem:[#allocation5 + $0x8e0] sm:$0xff]  ;;  %v373_v59 = vld [vmem:[#allocation5 + $0x8c8] sm:$0xff] }
  0x9c   :  { %3242 = vmatpush1.bf16.msra.mxu0 %v4892_v0  ;;  %3454 = vmatpush1.bf16.msra.mxu1 %v4894_v1  ;;  %v4940_v0 = vcombine.low %v364_v44, %v368_v45  ;;  %v4942_v1 = vcombine.low %v365_v48, %v369_v49  ;;  %v417_v44 = vld [vmem:[#allocation5 + $0xa28] sm:$0xff]  ;;  %v4982_v48 = vcombine.low %v405_v33, %v409_v34 }
  0x9d   :  { %3243 = vmatprep.subr.bf16.mxu0 %v4901_v2  ;;  %3455 = vmatprep.subr.bf16.mxu1 %v4903_v3  ;;  %v4949_v2 = vcombine.high %v372_v56, %v376_v57  ;;  %v4951_v3 = vcombine.high %v373_v59, %v377_v60 }
  0xa0   :  { %3244 = vmatpush1.bf16.msra.mxu0 %v4900_v8  ;;  %3456 = vmatpush1.bf16.msra.mxu1 %v4902_v9  ;;  %v385_v8 = vld [vmem:[#allocation5 + $0x928] sm:$0xff]  ;;  %v4948_v9 = vcombine.low %v372_v56, %v376_v57  ;;  %v4997_v57 = vcombine.high %v420_v51, %v424_v52 }
  0xa1   :  { %3245 = vmatprep.subr.bf16.mxu0 %v4909_v10  ;;  %3457 = vmatprep.subr.bf16.mxu1 %v4911_v11  ;;  %v4950_v10 = vcombine.low %v373_v59, %v377_v60  ;;  %v4957_v11 = vcombine.high %v380_v4, %v384_v5  ;;  %v4959_v12 = vcombine.high %v381_v7, %v385_v8  ;;  %v428_v60 = vld [vmem:[#allocation5 + $0xa80] sm:$0xff] }
  0xa4   :  { %3246 = vmatpush1.bf16.msra.mxu0 %v4908_v17  ;;  %3458 = vmatpush1.bf16.msra.mxu1 %v4910_v18  ;;  %v393_v17 = vld [vmem:[#allocation5 + $0x968] sm:$0xff]  ;;  %v4956_v18 = vcombine.low %v380_v4, %v384_v5  ;;  %v436_v5 = vld [vmem:[#allocation5 + $0xac0] sm:$0xff] }
  0xa5   :  { %3247 = vmatprep.subr.bf16.mxu0 %v4917_v19  ;;  %3459 = vmatprep.subr.bf16.mxu1 %v4919_v20  ;;  %v4958_v19 = vcombine.low %v381_v7, %v385_v8  ;;  %v4965_v20 = vcombine.high %v388_v13, %v392_v14  ;;  %v4967_v21 = vcombine.high %v389_v16, %v393_v17  ;;  %v440_v7 = vld [vmem:[#allocation5 + $0xae0] sm:$0xff]  ;;  %v437_v8 = vld [vmem:[#allocation5 + $0xac8] sm:$0xff] }
  0xa6   :  { %v4966_v28 = vcombine.low %v389_v16, %v393_v17  ;;  %v444_v14 = vld [vmem:[#allocation5 + $0xb00] sm:$0xff]  ;;  %v445_v17 = vld [vmem:[#allocation5 + $0xb08] sm:$0xff] }
  0xa7   :  { %v448_v16 = vld [vmem:[#allocation5 + $0xb20] sm:$0xff] }
  0xa8   :  { %3248 = vmatpush1.bf16.msra.mxu0 %v4916_v26  ;;  %3460 = vmatpush1.bf16.msra.mxu1 %v4918_v29  ;;  %v401_v26 = vld [vmem:[#allocation5 + $0x9a8] sm:$0xff]  ;;  %v4973_v29 = vcombine.high %v396_v22, %v400_v23  ;;  %v452_v23 = vld [vmem:[#allocation5 + $0xb40] sm:$0xff] }
  0xa9   :  { %3270 = vmatprep.subr.bf16.mxu0 %v4925_v30  ;;  %3482 = vmatprep.subr.bf16.mxu1 %v4927_v31  ;;  %v4975_v30 = vcombine.high %v397_v24, %v401_v26  ;;  %v404_v31 = vld [vmem:[#allocation5 + $0x9c0] sm:$0xff]  ;;  %v4974_v37 = vcombine.low %v397_v24, %v401_v26  ;;  %v453_v26 = vld [vmem:[#allocation5 + $0xb48] sm:$0xff] }
  0xaa   :  { %v4981_v39 = vcombine.high %v404_v31, %v408_v32  ;;  %v4980_v45 = vcombine.low %v404_v31, %v408_v32  ;;  %v456_v24 = vld [vmem:[#allocation5 + $0xb60] sm:$0xff] }
  0xab   :  { %3250 = vmatmul.mubr.bf16.vlgmr.msra.gmra.mrb[0].mxu0 %v5447_v35  ;;  %3462 = vmatmul.mubr.bf16.vlgmr.msra.gmra.mrb[0].mxu1 %v5447_v35  ;;  %v460_v32 = vld [vmem:[#allocation5 + $0xb80] sm:$0xff] }
  0xac   :  { %3271 = vmatpush1.bf16.msra.mxu0 %v4924_v40  ;;  %3483 = vmatpush1.bf16.msra.mxu1 %v4926_v41  ;;  %v4983_v40 = vcombine.high %v405_v33, %v409_v34  ;;  %v412_v41 = vld [vmem:[#allocation5 + $0xa00] sm:$0xff]  ;;  %v461_v34 = vld [vmem:[#allocation5 + $0xb88] sm:$0xff] }
  0xad   :  { %3272 = vmatprep.subr.bf16.mxu0 %v4933_v42  ;;  %3484 = vmatprep.subr.bf16.mxu1 %v4935_v43  ;;  %v416_v42 = vld [vmem:[#allocation5 + $0xa20] sm:$0xff]  ;;  %v413_v43 = vld [vmem:[#allocation5 + $0xa08] sm:$0xff] }
  0xae   :  { %3259 = vmatprep.mubr.bf16.mxu0 %v5449_v46  ;;  %3471 = vmatprep.mubr.bf16.mxu1 %v5449_v46  ;;  %v4989_v49 = vcombine.high %v412_v41, %v416_v42  ;;  %v4990_v56 = vcombine.low %v413_v43, %v417_v44  ;;  %v464_v33 = vld [vmem:[#allocation5 + $0xba0] sm:$0xff] }
  0xb0   :  { %3273 = vmatpush1.bf16.msra.mxu0 %v4932_v50  ;;  %3485 = vmatpush1.bf16.msra.mxu1 %v4934_v53  ;;  %v4991_v50 = vcombine.high %v413_v43, %v417_v44  ;;  %v421_v53 = vld [vmem:[#allocation5 + $0xa48] sm:$0xff]  ;;  %v472_v43 = vld [vmem:[#allocation5 + $0xbe0] sm:$0xff] }
  0xb1   :  { %3274 = vmatprep.subr.bf16.mxu0 %v4941_v54  ;;  %3486 = vmatprep.subr.bf16.mxu1 %v4943_v55  ;;  %v425_v54 = vld [vmem:[#allocation5 + $0xa68] sm:$0xff]  ;;  %v4988_v55 = vcombine.low %v412_v41, %v416_v42  ;;  %v468_v42 = vld [vmem:[#allocation5 + $0xbc0] sm:$0xff] }
  0xb2   :  { %v4999_v59 = vcombine.high %v421_v53, %v425_v54  ;;  %v469_v44 = vld [vmem:[#allocation5 + $0xbc8] sm:$0xff] }
  0xb3   :  { %3260 = vmatmul.mubr.bf16.gmra.mrb[4].mxu0 %v5455_v61  ;;  %3472 = vmatmul.mubr.bf16.gmra.mrb[4].mxu1 %v5455_v61 }
  0xb4   :  { %3275 = vmatpush1.bf16.msra.mxu0 %v4940_v0  ;;  %3487 = vmatpush1.bf16.msra.mxu1 %v4942_v1  ;;  %v433_v0 = vld [vmem:[#allocation5 + $0xaa8] sm:$0xff]  ;;  %v4996_v1 = vcombine.low %v420_v51, %v424_v52  ;;  %v476_v52 = vld [vmem:[#allocation5 + $0xc00] sm:$0xff] }
  0xb5   :  { %3276 = vmatprep.subr.bf16.mxu0 %v4949_v2  ;;  %3488 = vmatprep.subr.bf16.mxu1 %v4951_v3  ;;  %v4998_v2 = vcombine.low %v421_v53, %v425_v54  ;;  %v5005_v3 = vcombine.high %v428_v60, %v432_v62  ;;  %v5007_v4 = vcombine.high %v429_v63, %v433_v0  ;;  %v480_v53 = vld [vmem:[#allocation5 + $0xc20] sm:$0xff]  ;;  %v477_v54 = vld [vmem:[#allocation5 + $0xc08] sm:$0xff] }
  0xb6   :  { %3302 = vmatprep.mubr.bf16.mxu0 %v5457_v6  ;;  %3514 = vmatprep.mubr.bf16.mxu1 %v5457_v6 }
  0xb8   :  { %3277 = vmatpush1.bf16.msra.mxu0 %v4948_v9  ;;  %3489 = vmatpush1.bf16.msra.mxu1 %v4950_v10  ;;  %v441_v9 = vld [vmem:[#allocation5 + $0xae8] sm:$0xff]  ;;  %v5004_v10 = vcombine.low %v428_v60, %v432_v62  ;;  %v5053_v62 = vcombine.high %v476_v52, %v480_v53 }
  0xb9   :  { %3278 = vmatprep.subr.bf16.mxu0 %v4957_v11  ;;  %3490 = vmatprep.subr.bf16.mxu1 %v4959_v12  ;;  %v5006_v11 = vcombine.low %v429_v63, %v433_v0  ;;  %v5013_v12 = vcombine.high %v436_v5, %v440_v7  ;;  %v5015_v13 = vcombine.high %v437_v8, %v441_v9  ;;  %v484_v0 = vld [vmem:[#allocation5 + $0xc40] sm:$0xff] }
  0xbc   :  { %3279 = vmatpush1.bf16.msra.mxu0 %v4956_v18  ;;  %3491 = vmatpush1.bf16.msra.mxu1 %v4958_v19  ;;  %v449_v18 = vld [vmem:[#allocation5 + $0xb28] sm:$0xff]  ;;  %v5012_v19 = vcombine.low %v436_v5, %v440_v7 }
  0xbd   :  { %3280 = vmatprep.subr.bf16.mxu0 %v4965_v20  ;;  %3492 = vmatprep.subr.bf16.mxu1 %v4967_v21  ;;  %v5014_v20 = vcombine.low %v437_v8, %v441_v9  ;;  %v5021_v21 = vcombine.high %v444_v14, %v448_v16  ;;  %v5023_v22 = vcombine.high %v445_v17, %v449_v18  ;;  %v65_v5 = vld [vmem:[#allocation2 + $0xa8] sm:$0xff] }
  0xbe   :  { %v73_v7 = vld [vmem:[#allocation2 + $0xe8] sm:$0xff]  ;;  %v5052_v8 = vcombine.low %v476_v52, %v480_v53 }
  0xbf   :  { %v521_v52 = vld [vmem:[#allocation5 + $0xd68] sm:$0xff] }
  0xc0   :  { %3281 = vmatpush1.bf16.msra.mxu0 %v4964_v27  ;;  %3493 = vmatpush1.bf16.msra.mxu1 %v4966_v28  ;;  %v457_v27 = vld [vmem:[#allocation5 + $0xb68] sm:$0xff]  ;;  %v5020_v28 = vcombine.low %v444_v14, %v448_v16  ;;  %v5465_v14 = vpack.c.bf16 %v73_v7, %v65_v5  ;;  %v536_v5 = vld [vmem:[#allocation5 + $0xde0] sm:$0xff] }
  0xc1   :  { %3282 = vmatprep.subr.bf16.mxu0 %v4973_v29  ;;  %3494 = vmatprep.subr.bf16.mxu1 %v4975_v30  ;;  %v5022_v29 = vcombine.low %v445_v17, %v449_v18  ;;  %v5029_v30 = vcombine.high %v452_v23, %v456_v24  ;;  %v5031_v31 = vcombine.high %v453_v26, %v457_v27  ;;  %v493_v16 = vld [vmem:[#allocation5 + $0xc88] sm:$0xff] }
  0xc2   :  { %v497_v17 = vld [vmem:[#allocation5 + $0xca8] sm:$0xff] }
  0xc3   :  { %v533_v7 = vld [vmem:[#allocation5 + $0xdc8] sm:$0xff] }
  0xc4   :  { %3283 = vmatpush1.bf16.msra.mxu0 %v4972_v36  ;;  %3495 = vmatpush1.bf16.msra.mxu1 %v4974_v37  ;;  %v465_v36 = vld [vmem:[#allocation5 + $0xba8] sm:$0xff]  ;;  %v5028_v37 = vcombine.low %v452_v23, %v456_v24  ;;  %v5071_v23 = vcombine.high %v493_v16, %v497_v17  ;;  %v500_v24 = vld [vmem:[#allocation5 + $0xcc0] sm:$0xff] }
  0xc5   :  { %3284 = vmatprep.subr.bf16.mxu0 %v4981_v39  ;;  %3496 = vmatprep.subr.bf16.mxu1 %v4983_v40  ;;  %v5030_v39 = vcombine.low %v453_v26, %v457_v27  ;;  %v5037_v40 = vcombine.high %v460_v32, %v464_v33  ;;  %v5039_v41 = vcombine.high %v461_v34, %v465_v36  ;;  %v504_v26 = vld [vmem:[#allocation5 + $0xce0] sm:$0xff]  ;;  %v501_v27 = vld [vmem:[#allocation5 + $0xcc8] sm:$0xff] }
  0xc8   :  { %3285 = vmatpush1.bf16.msra.mxu0 %v4980_v45  ;;  %3497 = vmatpush1.bf16.msra.mxu1 %v4982_v48  ;;  %v473_v45 = vld [vmem:[#allocation5 + $0xbe8] sm:$0xff]  ;;  %v5036_v48 = vcombine.low %v460_v32, %v464_v33  ;;  %v5070_v33 = vcombine.low %v493_v16, %v497_v17  ;;  %v544_v16 = vld [vmem:[#allocation5 + $0xe20] sm:$0xff] }
  0xc9   :  { %3286 = vmatprep.subr.bf16.mxu0 %v4989_v49  ;;  %3498 = vmatprep.subr.bf16.mxu1 %v4991_v50  ;;  %v5038_v49 = vcombine.low %v461_v34, %v465_v36  ;;  %v5045_v50 = vcombine.high %v468_v42, %v472_v43  ;;  %v5047_v51 = vcombine.high %v469_v44, %v473_v45  ;;  %v541_v17 = vld [vmem:[#allocation5 + $0xe08] sm:$0xff] }
  0xca   :  { %v5046_v60 = vcombine.low %v469_v44, %v473_v45  ;;  %v5077_v34 = vcombine.high %v500_v24, %v504_v26 }
  0xcc   :  { %3287 = vmatpush1.bf16.msra.mxu0 %v4988_v55  ;;  %3499 = vmatpush1.bf16.msra.mxu1 %v4990_v56  ;;  %v481_v55 = vld [vmem:[#allocation5 + $0xc28] sm:$0xff]  ;;  %v5044_v56 = vcombine.low %v468_v42, %v472_v43  ;;  %v5076_v43 = vcombine.low %v500_v24, %v504_v26  ;;  %v552_v24 = vld [vmem:[#allocation5 + $0xe60] sm:$0xff] }
  0xcd   :  { %3288 = vmatprep.subr.bf16.mxu0 %v4997_v57  ;;  %3500 = vmatprep.subr.bf16.mxu1 %v4999_v59  ;;  %v48_v57 = vld [vmem:[#allocation2 + $0x20] sm:$0xff]  ;;  %v5055_v63 = vcombine.high %v477_v54, %v481_v55  ;;  %v5054_v9 = vcombine.low %v477_v54, %v481_v55  ;;  %v513_v42 = vld [vmem:[#allocation5 + $0xd28] sm:$0xff] }
  0xce   :  { %v56_v59 = vld [vmem:[#allocation2 + $0x60] sm:$0xff]  ;;  %v549_v26 = vld [vmem:[#allocation5 + $0xe48] sm:$0xff] }
  0xd0   :  { %3289 = vmatpush1.bf16.msra.mxu0 %v4996_v1  ;;  %3501 = vmatpush1.bf16.msra.mxu1 %v4998_v2  ;;  %v488_v1 = vld [vmem:[#allocation5 + $0xc60] sm:$0xff]  ;;  %v485_v2 = vld [vmem:[#allocation5 + $0xc48] sm:$0xff] }
  0xd1   :  { %3290 = vmatprep.subr.bf16.mxu0 %v5005_v3  ;;  %3502 = vmatprep.subr.bf16.mxu1 %v5007_v4  ;;  %v5463_v3 = vpack.c.bf16 %v56_v59, %v48_v57  ;;  %v489_v4 = vld [vmem:[#allocation5 + $0xc68] sm:$0xff]  ;;  %v5060_v18 = vcombine.low %v484_v0, %v488_v1  ;;  %v524_v57 = vld [vmem:[#allocation5 + $0xd80] sm:$0xff] }
  0xd2   :  { %v528_v59 = vld [vmem:[#allocation5 + $0xda0] sm:$0xff] }
  0xd4   :  { %3291 = vmatpush1.bf16.msra.mxu0 %v5004_v10  ;;  %3503 = vmatpush1.bf16.msra.mxu1 %v5006_v11  ;;  %v5061_v10 = vcombine.high %v484_v0, %v488_v1  ;;  %v5063_v11 = vcombine.high %v485_v2, %v489_v4  ;;  %v5101_v1 = vcombine.high %v524_v57, %v528_v59 }
  0xd5   :  { %3292 = vmatprep.subr.bf16.mxu0 %v5013_v12  ;;  %3504 = vmatprep.subr.bf16.mxu1 %v5015_v13  ;;  %v492_v12 = vld [vmem:[#allocation5 + $0xc80] sm:$0xff] }
  0xd6   :  { %v496_v13 = vld [vmem:[#allocation5 + $0xca0] sm:$0xff] }
  0xd7   :  { %v5068_v32 = vcombine.low %v492_v12, %v496_v13 }
  0xd8   :  { %3293 = vmatpush1.bf16.msra.mxu0 %v5012_v19  ;;  %3505 = vmatpush1.bf16.msra.mxu1 %v5014_v20  ;;  %v64_v19 = vld [vmem:[#allocation2 + $0xa0] sm:$0xff] }
  0xd9   :  { %3294 = vmatprep.subr.bf16.mxu0 %v5021_v21  ;;  %3506 = vmatprep.subr.bf16.mxu1 %v5023_v22  ;;  %v72_v20 = vld [vmem:[#allocation2 + $0xe0] sm:$0xff]  ;;  %v5062_v21 = vcombine.low %v485_v2, %v489_v4  ;;  %v5069_v22 = vcombine.high %v492_v12, %v496_v13 }
  0xda   :  { %v532_v4 = vld [vmem:[#allocation5 + $0xdc0] sm:$0xff] }
  0xdb   :  { %v540_v13 = vld [vmem:[#allocation5 + $0xe00] sm:$0xff] }
  0xdc   :  { %3295 = vmatpush1.bf16.msra.mxu0 %v5020_v28  ;;  %3507 = vmatpush1.bf16.msra.mxu1 %v5022_v29  ;;  %v505_v28 = vld [vmem:[#allocation5 + $0xce8] sm:$0xff]  ;;  %v5471_v29 = vpack.c.bf16 %v72_v20, %v64_v19  ;;  %v5108_v19 = vcombine.low %v532_v4, %v536_v5 }
  0xdd   :  { %3296 = vmatprep.subr.bf16.mxu0 %v5029_v30  ;;  %3508 = vmatprep.subr.bf16.mxu1 %v5031_v31  ;;  %v51_v30 = vld [vmem:[#allocation2 + $0x38] sm:$0xff]  ;;  %v5079_v36 = vcombine.high %v501_v27, %v505_v28  ;;  %v5078_v44 = vcombine.low %v501_v27, %v505_v28  ;;  %v553_v27 = vld [vmem:[#allocation5 + $0xe68] sm:$0xff]  ;;  %v5116_v28 = vcombine.low %v540_v13, %v544_v16 }
  0xde   :  { %v59_v31 = vld [vmem:[#allocation2 + $0x78] sm:$0xff] }
  0xe0   :  { %3297 = vmatpush1.bf16.msra.mxu0 %v5028_v37  ;;  %3509 = vmatpush1.bf16.msra.mxu1 %v5030_v39  ;;  %v508_v37 = vld [vmem:[#allocation5 + $0xd00] sm:$0xff] }
  0xe1   :  { %3298 = vmatprep.subr.bf16.mxu0 %v5037_v40  ;;  %3510 = vmatprep.subr.bf16.mxu1 %v5039_v41  ;;  %v512_v39 = vld [vmem:[#allocation5 + $0xd20] sm:$0xff]  ;;  %v5473_v40 = vpack.c.bf16 %v59_v31, %v51_v30  ;;  %v509_v41 = vld [vmem:[#allocation5 + $0xd08] sm:$0xff] }
  0xe2   :  { %v5085_v45 = vcombine.high %v508_v37, %v512_v39  ;;  %v5084_v53 = vcombine.low %v508_v37, %v512_v39  ;;  %v5086_v54 = vcombine.low %v509_v41, %v513_v42  ;;  %v561_v37 = vld [vmem:[#allocation5 + $0xea8] sm:$0xff] }
  0xe4   :  { %3299 = vmatpush1.bf16.msra.mxu0 %v5036_v48  ;;  %3511 = vmatpush1.bf16.msra.mxu1 %v5038_v49  ;;  %v5087_v48 = vcombine.high %v509_v41, %v513_v42  ;;  %v516_v49 = vld [vmem:[#allocation5 + $0xd40] sm:$0xff]  ;;  %v5126_v41 = vcombine.low %v549_v26, %v553_v27 }
  0xe5   :  { %3300 = vmatprep.subr.bf16.mxu0 %v5045_v50  ;;  %3512 = vmatprep.subr.bf16.mxu1 %v5047_v51  ;;  %v520_v50 = vld [vmem:[#allocation5 + $0xd60] sm:$0xff]  ;;  %v517_v51 = vld [vmem:[#allocation5 + $0xd48] sm:$0xff] }
  0xe6   :  { %v5093_v55 = vcombine.high %v516_v49, %v520_v50  ;;  %v5094_v0 = vcombine.low %v517_v51, %v521_v52 }
  0xe8   :  { %3301 = vmatpush1.bf16.msra.mxu0 %v5044_v56  ;;  %3513 = vmatpush1.bf16.msra.mxu1 %v5046_v60  ;;  %v5095_v56 = vcombine.high %v517_v51, %v521_v52  ;;  %v525_v60 = vld [vmem:[#allocation5 + $0xd88] sm:$0xff] }
  0xe9   :  { %3323 = vmatprep.subr.bf16.mxu0 %v5053_v62  ;;  %3535 = vmatprep.subr.bf16.mxu1 %v5055_v63  ;;  %v529_v62 = vld [vmem:[#allocation5 + $0xda8] sm:$0xff]  ;;  %v5092_v63 = vcombine.low %v516_v49, %v520_v50 }
  0xea   :  { %v5103_v2 = vcombine.high %v525_v60, %v529_v62  ;;  %v569_v49 = vld [vmem:[#allocation5 + $0xee8] sm:$0xff] }
  0xeb   :  { %3303 = vmatmul.mubr.bf16.vlgmr.msra.gmra.mrb[0].mxu0 %v5463_v3  ;;  %3515 = vmatmul.mubr.bf16.vlgmr.msra.gmra.mrb[0].mxu1 %v5463_v3 }
  0xec   :  { %3324 = vmatpush1.bf16.msra.mxu0 %v5052_v8  ;;  %3536 = vmatpush1.bf16.msra.mxu1 %v5054_v9  ;;  %v537_v8 = vld [vmem:[#allocation5 + $0xde8] sm:$0xff]  ;;  %v5100_v9 = vcombine.low %v524_v57, %v528_v59 }
  0xed   :  { %3325 = vmatprep.subr.bf16.mxu0 %v5061_v10  ;;  %3537 = vmatprep.subr.bf16.mxu1 %v5063_v11  ;;  %v5102_v10 = vcombine.low %v525_v60, %v529_v62  ;;  %v5109_v11 = vcombine.high %v532_v4, %v536_v5  ;;  %v5111_v12 = vcombine.high %v533_v7, %v537_v8  ;;  %v577_v57 = vld [vmem:[#allocation5 + $0xf28] sm:$0xff] }
  0xee   :  { %3312 = vmatprep.mubr.bf16.mxu0 %v5465_v14  ;;  %3524 = vmatprep.mubr.bf16.mxu1 %v5465_v14  ;;  %v5110_v20 = vcombine.low %v533_v7, %v537_v8  ;;  %v585_v4 = vld [vmem:[#allocation5 + $0xf68] sm:$0xff] }
  0xf0   :  { %3326 = vmatpush1.bf16.msra.mxu0 %v5060_v18  ;;  %3538 = vmatpush1.bf16.msra.mxu1 %v5062_v21  ;;  %v545_v18 = vld [vmem:[#allocation5 + $0xe28] sm:$0xff]  ;;  %v5117_v21 = vcombine.high %v540_v13, %v544_v16 }
  0xf1   :  { %3327 = vmatprep.subr.bf16.mxu0 %v5069_v22  ;;  %3539 = vmatprep.subr.bf16.mxu1 %v5071_v23  ;;  %v5119_v22 = vcombine.high %v541_v17, %v545_v18  ;;  %v548_v23 = vld [vmem:[#allocation5 + $0xe40] sm:$0xff]  ;;  %v5118_v30 = vcombine.low %v541_v17, %v545_v18  ;;  %v593_v13 = vld [vmem:[#allocation5 + $0xfa8] sm:$0xff] }
  0xf2   :  { %v5125_v31 = vcombine.high %v548_v23, %v552_v24  ;;  %v5124_v39 = vcombine.low %v548_v23, %v552_v24  ;;  %v601_v23 = vld [vmem:[#allocation5 + $0xfe8] sm:$0xff] }
  0xf3   :  { %3313 = vmatmul.mubr.bf16.gmra.mrb[4].mxu0 %v5471_v29  ;;  %3525 = vmatmul.mubr.bf16.gmra.mrb[4].mxu1 %v5471_v29 }
  0xf4   :  { %3328 = vmatpush1.bf16.msra.mxu0 %v5068_v32  ;;  %3540 = vmatpush1.bf16.msra.mxu1 %v5070_v33  ;;  %v5127_v32 = vcombine.high %v549_v26, %v553_v27  ;;  %v556_v33 = vld [vmem:[#allocation5 + $0xe80] sm:$0xff] }
  0xf5   :  { %3329 = vmatprep.subr.bf16.mxu0 %v5077_v34  ;;  %3541 = vmatprep.subr.bf16.mxu1 %v5079_v36  ;;  %v560_v34 = vld [vmem:[#allocation5 + $0xea0] sm:$0xff]  ;;  %v557_v36 = vld [vmem:[#allocation5 + $0xe88] sm:$0xff] }
  0xf6   :  { %3355 = vmatprep.mubr.bf16.mxu0 %v5473_v40  ;;  %3567 = vmatprep.mubr.bf16.mxu1 %v5473_v40  ;;  %v5133_v42 = vcombine.high %v556_v33, %v560_v34  ;;  %v5132_v50 = vcombine.low %v556_v33, %v560_v34  ;;  %v5134_v51 = vcombine.low %v557_v36, %v561_v37  ;;  %v99_v33 = vld [vmem:[#allocation5 + $0x38] sm:$0xff] }
  0xf8   :  { %3330 = vmatpush1.bf16.msra.mxu0 %v5076_v43  ;;  %3542 = vmatpush1.bf16.msra.mxu1 %v5078_v44  ;;  %v5135_v43 = vcombine.high %v557_v36, %v561_v37  ;;  %v564_v44 = vld [vmem:[#allocation5 + $0xec0] sm:$0xff]  ;;  %v50_v36 = vld [vmem:[#allocation2 + $0x30] sm:$0xff] }
  0xf9   :  { %3331 = vmatprep.subr.bf16.mxu0 %v5085_v45  ;;  %3543 = vmatprep.subr.bf16.mxu1 %v5087_v48  ;;  %v568_v45 = vld [vmem:[#allocation5 + $0xee0] sm:$0xff]  ;;  %v565_v48 = vld [vmem:[#allocation5 + $0xec8] sm:$0xff]  ;;  %v58_v37 = vld [vmem:[#allocation2 + $0x70] sm:$0xff] }
  0xfa   :  { %v5141_v52 = vcombine.high %v564_v44, %v568_v45  ;;  %v5140_v59 = vcombine.low %v564_v44, %v568_v45  ;;  %v5142_v60 = vcombine.low %v565_v48, %v569_v49  ;;  %v106_v44 = vld [vmem:[#allocation5 + $0x70] sm:$0xff]  ;;  %v103_v45 = vld [vmem:[#allocation5 + $0x58] sm:$0xff] }
  0xfc   :  { %3332 = vmatpush1.bf16.msra.mxu0 %v5084_v53  ;;  %3544 = vmatpush1.bf16.msra.mxu1 %v5086_v54  ;;  %v5143_v53 = vcombine.high %v565_v48, %v569_v49  ;;  %v572_v54 = vld [vmem:[#allocation5 + $0xf00] sm:$0xff]  ;;  %v5479_v48 = vpack.c.bf16 %v58_v37, %v50_v36  ;;  %v107_v49 = vld [vmem:[#allocation5 + $0x78] sm:$0xff]  ;;  %v142_v37 = vld [vmem:[#allocation5 + $0x190] sm:$0xff] }
  0xfd   :  { %3333 = vmatprep.subr.bf16.mxu0 %v5093_v55  ;;  %3545 = vmatprep.subr.bf16.mxu1 %v5095_v56  ;;  %v576_v55 = vld [vmem:[#allocation5 + $0xf20] sm:$0xff]  ;;  %v573_v56 = vld [vmem:[#allocation5 + $0xf08] sm:$0xff] }
  0xfe   :  { %v5149_v62 = vcombine.high %v572_v54, %v576_v55  ;;  %v5148_v5 = vcombine.low %v572_v54, %v576_v55  ;;  %v5150_v7 = vcombine.low %v573_v56, %v577_v57  ;;  %v4683_v55 = vcombine.high %v103_v45, %v107_v49 }
 0x100   :  { %3334 = vmatpush1.bf16.msra.mxu0 %v5092_v63  ;;  %3546 = vmatpush1.bf16.msra.mxu1 %v5094_v0  ;;  %v5151_v63 = vcombine.high %v573_v56, %v577_v57  ;;  %v580_v0 = vld [vmem:[#allocation5 + $0xf40] sm:$0xff]  ;;  %v110_v57 = vld [vmem:[#allocation5 + $0x90] sm:$0xff] }
 0x101   :  { %3335 = vmatprep.subr.bf16.mxu0 %v5101_v1  ;;  %3547 = vmatprep.subr.bf16.mxu1 %v5103_v2  ;;  %v584_v1 = vld [vmem:[#allocation5 + $0xf60] sm:$0xff]  ;;  %v581_v2 = vld [vmem:[#allocation5 + $0xf48] sm:$0xff] }
 0x102   :  { %v5157_v8 = vcombine.high %v580_v0, %v584_v1  ;;  %v5156_v16 = vcombine.low %v580_v0, %v584_v1  ;;  %v5158_v17 = vcombine.low %v581_v2, %v585_v4  ;;  %v66_v0 = vld [vmem:[#allocation2 + $0xb0] sm:$0xff] }
 0x103   :  { %v74_v1 = vld [vmem:[#allocation2 + $0xf0] sm:$0xff] }
 0x104   :  { %3336 = vmatpush1.bf16.msra.mxu0 %v5100_v9  ;;  %3548 = vmatpush1.bf16.msra.mxu1 %v5102_v10  ;;  %v5159_v9 = vcombine.high %v581_v2, %v585_v4  ;;  %v588_v10 = vld [vmem:[#allocation5 + $0xf80] sm:$0xff]  ;;  %v4682_v2 = vcombine.low %v103_v45, %v107_v49  ;;  %v150_v49 = vld [vmem:[#allocation5 + $0x1d0] sm:$0xff] }
 0x105   :  { %3337 = vmatprep.subr.bf16.mxu0 %v5109_v11  ;;  %3549 = vmatprep.subr.bf16.mxu1 %v5111_v12  ;;  %v592_v11 = vld [vmem:[#allocation5 + $0xfa0] sm:$0xff]  ;;  %v589_v12 = vld [vmem:[#allocation5 + $0xf88] sm:$0xff] }
 0x106   :  { %v5165_v18 = vcombine.high %v588_v10, %v592_v11  ;;  %v5164_v24 = vcombine.low %v588_v10, %v592_v11  ;;  %v5166_v26 = vcombine.low %v589_v12, %v593_v13  ;;  %v119_v10 = vld [vmem:[#allocation5 + $0xd8] sm:$0xff] }
 0x107   :  { %v123_v11 = vld [vmem:[#allocation5 + $0xf8] sm:$0xff] }
 0x108   :  { %3338 = vmatpush1.bf16.msra.mxu0 %v5108_v19  ;;  %3550 = vmatpush1.bf16.msra.mxu1 %v5110_v20  ;;  %v5167_v19 = vcombine.high %v589_v12, %v593_v13  ;;  %v596_v20 = vld [vmem:[#allocation5 + $0xfc0] sm:$0xff] }
 0x109   :  { %3339 = vmatprep.subr.bf16.mxu0 %v5117_v21  ;;  %3551 = vmatprep.subr.bf16.mxu1 %v5119_v22  ;;  %v600_v21 = vld [vmem:[#allocation5 + $0xfe0] sm:$0xff]  ;;  %v597_v22 = vld [vmem:[#allocation5 + $0xfc8] sm:$0xff] }
 0x10a   :  { %v5173_v27 = vcombine.high %v596_v20, %v600_v21  ;;  %v5172_v34 = vcombine.low %v596_v20, %v600_v21  ;;  %v127_v20 = vld [vmem:[#allocation5 + $0x118] sm:$0xff] }
 0x10b   :  { %v131_v21 = vld [vmem:[#allocation5 + $0x138] sm:$0xff] }
 0x10c   :  { %3340 = vmatpush1.bf16.msra.mxu0 %v5116_v28  ;;  %3552 = vmatpush1.bf16.msra.mxu1 %v5118_v30  ;;  %v5175_v28 = vcombine.high %v597_v22, %v601_v23  ;;  %v94_v30 = vld [vmem:[#allocation5 + $0x10] sm:$0xff] }
 0x10d   :  { %3341 = vmatprep.subr.bf16.mxu0 %v5125_v31  ;;  %3553 = vmatprep.subr.bf16.mxu1 %v5127_v32  ;;  %v98_v31 = vld [vmem:[#allocation5 + $0x30] sm:$0xff]  ;;  %v95_v32 = vld [vmem:[#allocation5 + $0x18] sm:$0xff] }
 0x110   :  { %3342 = vmatpush1.bf16.msra.mxu0 %v5124_v39  ;;  %3554 = vmatpush1.bf16.msra.mxu1 %v5126_v41  ;;  %v5174_v39 = vcombine.low %v597_v22, %v601_v23  ;;  %v4673_v41 = vcombine.high %v94_v30, %v98_v31  ;;  %v4698_v23 = vcombine.low %v119_v10, %v123_v11 }
 0x111   :  { %3343 = vmatprep.subr.bf16.mxu0 %v5133_v42  ;;  %3555 = vmatprep.subr.bf16.mxu1 %v5135_v43  ;;  %v4675_v42 = vcombine.high %v95_v32, %v99_v33  ;;  %v102_v43 = vld [vmem:[#allocation5 + $0x50] sm:$0xff] }
 0x112   :  { %v4681_v54 = vcombine.high %v102_v43, %v106_v44 }
 0x114   :  { %3344 = vmatpush1.bf16.msra.mxu0 %v5132_v50  ;;  %3556 = vmatpush1.bf16.msra.mxu1 %v5134_v51  ;;  %v67_v50 = vld [vmem:[#allocation2 + $0xb8] sm:$0xff] }
 0x115   :  { %3345 = vmatprep.subr.bf16.mxu0 %v5141_v52  ;;  %3557 = vmatprep.subr.bf16.mxu1 %v5143_v53  ;;  %v75_v51 = vld [vmem:[#allocation2 + $0xf8] sm:$0xff]  ;;  %v4672_v52 = vcombine.low %v94_v30, %v98_v31  ;;  %v4674_v53 = vcombine.low %v95_v32, %v99_v33  ;;  %v4706_v33 = vcombine.low %v127_v20, %v131_v21 }
 0x116   :  { %v5481_v56 = vpack.c.bf16 %v75_v51, %v67_v50  ;;  %v135_v30 = vld [vmem:[#allocation5 + $0x158] sm:$0xff]  ;;  %v154_v50 = vld [vmem:[#allocation5 + $0x1f0] sm:$0xff] }
 0x117   :  { %v139_v31 = vld [vmem:[#allocation5 + $0x178] sm:$0xff] }
 0x118   :  { %3346 = vmatpush1.bf16.msra.mxu0 %v5140_v59  ;;  %3558 = vmatpush1.bf16.msra.mxu1 %v5142_v60  ;;  %v114_v59 = vld [vmem:[#allocation5 + $0xb0] sm:$0xff]  ;;  %v111_v60 = vld [vmem:[#allocation5 + $0x98] sm:$0xff]  ;;  %v4715_v36 = vcombine.high %v135_v30, %v139_v31 }
 0x119   :  { %3347 = vmatprep.subr.bf16.mxu0 %v5149_v62  ;;  %3559 = vmatprep.subr.bf16.mxu1 %v5151_v63  ;;  %v115_v62 = vld [vmem:[#allocation5 + $0xb8] sm:$0xff]  ;;  %v4680_v63 = vcombine.low %v102_v43, %v106_v44  ;;  %v4689_v4 = vcombine.high %v110_v57, %v114_v59  ;;  %v4688_v12 = vcombine.low %v110_v57, %v114_v59  ;;  %v158_v59 = vld [vmem:[#allocation5 + $0x210] sm:$0xff] }
 0x11a   :  { %v4690_v13 = vcombine.low %v111_v60, %v115_v62  ;;  %v4714_v44 = vcombine.low %v135_v30, %v139_v31  ;;  %v151_v51 = vld [vmem:[#allocation5 + $0x1d8] sm:$0xff] }
 0x11b   :  { %v187_v30 = vld [vmem:[#allocation5 + $0x2f8] sm:$0xff] }
 0x11c   :  { %3348 = vmatpush1.bf16.msra.mxu0 %v5148_v5  ;;  %3560 = vmatpush1.bf16.msra.mxu1 %v5150_v7  ;;  %v4691_v5 = vcombine.high %v111_v60, %v115_v62  ;;  %v118_v7 = vld [vmem:[#allocation5 + $0xd0] sm:$0xff]  ;;  %v159_v62 = vld [vmem:[#allocation5 + $0x218] sm:$0xff] }
 0x11d   :  { %3349 = vmatprep.subr.bf16.mxu0 %v5157_v8  ;;  %3561 = vmatprep.subr.bf16.mxu1 %v5159_v9  ;;  %v122_v8 = vld [vmem:[#allocation5 + $0xf0] sm:$0xff]  ;;  %v5487_v9 = vpack.c.bf16 %v74_v1, %v66_v0  ;;  %v4728_v0 = vcombine.low %v150_v49, %v154_v50 }
 0x11e   :  { %v4696_v22 = vcombine.low %v118_v7, %v122_v8  ;;  %v162_v60 = vld [vmem:[#allocation5 + $0x230] sm:$0xff] }
 0x120   :  { %3350 = vmatpush1.bf16.msra.mxu0 %v5156_v16  ;;  %3562 = vmatpush1.bf16.msra.mxu1 %v5158_v17  ;;  %v4697_v16 = vcombine.high %v118_v7, %v122_v8  ;;  %v4699_v17 = vcombine.high %v119_v10, %v123_v11  ;;  %v170_v7 = vld [vmem:[#allocation5 + $0x270] sm:$0xff]  ;;  %v167_v8 = vld [vmem:[#allocation5 + $0x258] sm:$0xff]  ;;  %v4736_v11 = vcombine.low %v158_v59, %v162_v60 }
 0x121   :  { %3351 = vmatprep.subr.bf16.mxu0 %v5165_v18  ;;  %3563 = vmatprep.subr.bf16.mxu1 %v5167_v19  ;;  %v126_v18 = vld [vmem:[#allocation5 + $0x110] sm:$0xff]  ;;  %v171_v10 = vld [vmem:[#allocation5 + $0x278] sm:$0xff] }
 0x122   :  { %v130_v19 = vld [vmem:[#allocation5 + $0x130] sm:$0xff] }
 0x123   :  { %v4704_v32 = vcombine.low %v126_v18, %v130_v19 }
 0x124   :  { %3352 = vmatpush1.bf16.msra.mxu0 %v5164_v24  ;;  %3564 = vmatpush1.bf16.msra.mxu1 %v5166_v26  ;;  %v4705_v24 = vcombine.high %v126_v18, %v130_v19  ;;  %v4707_v26 = vcombine.high %v127_v20, %v131_v21  ;;  %v178_v18 = vld [vmem:[#allocation5 + $0x2b0] sm:$0xff]  ;;  %v175_v19 = vld [vmem:[#allocation5 + $0x298] sm:$0xff] }
 0x125   :  { %3353 = vmatprep.subr.bf16.mxu0 %v5173_v27  ;;  %3565 = vmatprep.subr.bf16.mxu1 %v5175_v28  ;;  %v134_v27 = vld [vmem:[#allocation5 + $0x150] sm:$0xff]  ;;  %v179_v20 = vld [vmem:[#allocation5 + $0x2b8] sm:$0xff] }
 0x126   :  { %v138_v28 = vld [vmem:[#allocation5 + $0x170] sm:$0xff] }
 0x127   :  { %v4712_v43 = vcombine.low %v134_v27, %v138_v28 }
 0x128   :  { %3354 = vmatpush1.bf16.msra.mxu0 %v5172_v34  ;;  %3566 = vmatpush1.bf16.msra.mxu1 %v5174_v39  ;;  %v4713_v34 = vcombine.high %v134_v27, %v138_v28  ;;  %v146_v39 = vld [vmem:[#allocation5 + $0x1b0] sm:$0xff]  ;;  %v183_v28 = vld [vmem:[#allocation5 + $0x2d8] sm:$0xff] }
 0x129   :  { %3588 = vmatprep.subr.bf16.mxu0 %v4673_v41  ;;  %3800 = vmatprep.subr.bf16.mxu1 %v4675_v42  ;;  %v143_v41 = vld [vmem:[#allocation5 + $0x198] sm:$0xff]  ;;  %v4721_v45 = vcombine.high %v142_v37, %v146_v39  ;;  %v186_v27 = vld [vmem:[#allocation5 + $0x2f0] sm:$0xff] }
 0x12a   :  { %v147_v42 = vld [vmem:[#allocation5 + $0x1b8] sm:$0xff] }
 0x12b   :  { %3356 = vmatmul.mubr.bf16.vlgmr.msra.gmra.mrb[0].mxu0 %v5479_v48  ;;  %3568 = vmatmul.mubr.bf16.vlgmr.msra.gmra.mrb[0].mxu1 %v5479_v48 }
 0x12c   :  { %3589 = vmatpush1.bf16.msra.mxu0 %v4672_v52  ;;  %3801 = vmatpush1.bf16.msra.mxu1 %v4674_v53  ;;  %v155_v52 = vld [vmem:[#allocation5 + $0x1f8] sm:$0xff]  ;;  %v4720_v53 = vcombine.low %v142_v37, %v146_v39  ;;  %v194_v37 = vld [vmem:[#allocation5 + $0x330] sm:$0xff] }
 0x12d   :  { %3590 = vmatprep.subr.bf16.mxu0 %v4681_v54  ;;  %3802 = vmatprep.subr.bf16.mxu1 %v4683_v55  ;;  %v4722_v54 = vcombine.low %v143_v41, %v147_v42  ;;  %v4729_v55 = vcombine.high %v150_v49, %v154_v50  ;;  %v4731_v57 = vcombine.high %v151_v51, %v155_v52  ;;  %v191_v39 = vld [vmem:[#allocation5 + $0x318] sm:$0xff]  ;;  %v202_v49 = vld [vmem:[#allocation5 + $0x370] sm:$0xff] }
 0x12e   :  { %3365 = vmatprep.mubr.bf16.mxu0 %v5481_v56  ;;  %3577 = vmatprep.mubr.bf16.mxu1 %v5481_v56  ;;  %v4730_v1 = vcombine.low %v151_v51, %v155_v52  ;;  %v199_v50 = vld [vmem:[#allocation5 + $0x358] sm:$0xff] }
 0x12f   :  { %v203_v51 = vld [vmem:[#allocation5 + $0x378] sm:$0xff] }
 0x130   :  { %3591 = vmatpush1.bf16.msra.mxu0 %v4680_v63  ;;  %3803 = vmatpush1.bf16.msra.mxu1 %v4682_v2  ;;  %v163_v63 = vld [vmem:[#allocation5 + $0x238] sm:$0xff]  ;;  %v4737_v2 = vcombine.high %v158_v59, %v162_v60  ;;  %v210_v59 = vld [vmem:[#allocation5 + $0x3b0] sm:$0xff] }
 0x131   :  { %3592 = vmatprep.subr.bf16.mxu0 %v4689_v4  ;;  %3804 = vmatprep.subr.bf16.mxu1 %v4691_v5  ;;  %v4739_v4 = vcombine.high %v159_v62, %v163_v63  ;;  %v166_v5 = vld [vmem:[#allocation5 + $0x250] sm:$0xff]  ;;  %v207_v60 = vld [vmem:[#allocation5 + $0x398] sm:$0xff] }
 0x132   :  { %v4744_v21 = vcombine.low %v166_v5, %v170_v7 }
 0x133   :  { %3366 = vmatmul.mubr.bf16.gmra.mrb[4].mxu0 %v5487_v9  ;;  %3578 = vmatmul.mubr.bf16.gmra.mrb[4].mxu1 %v5487_v9 }
 0x134   :  { %3593 = vmatpush1.bf16.msra.mxu0 %v4688_v12  ;;  %3805 = vmatpush1.bf16.msra.mxu1 %v4690_v13  ;;  %v4738_v12 = vcombine.low %v159_v62, %v163_v63  ;;  %v4745_v13 = vcombine.high %v166_v5, %v170_v7  ;;  %v211_v62 = vld [vmem:[#allocation5 + $0x3b8] sm:$0xff]  ;;  %v218_v5 = vld [vmem:[#allocation5 + $0x3f0] sm:$0xff] }
 0x135   :  { %3594 = vmatprep.subr.bf16.mxu0 %v4697_v16  ;;  %3806 = vmatprep.subr.bf16.mxu1 %v4699_v17  ;;  %v4747_v16 = vcombine.high %v167_v8, %v171_v10  ;;  %v174_v17 = vld [vmem:[#allocation5 + $0x290] sm:$0xff]  ;;  %v215_v7 = vld [vmem:[#allocation5 + $0x3d8] sm:$0xff] }
 0x136   :  { %3620 = vmatprep.mubr.bf16.mxu0 %v5427_v58  ;;  %3832 = vmatprep.mubr.bf16.mxu1 %v5427_v58  ;;  %v4723_v58 = vcombine.high %v143_v41, %v147_v42  ;;  %v4752_v31 = vcombine.low %v174_v17, %v178_v18  ;;  %v195_v41 = vld [vmem:[#allocation5 + $0x338] sm:$0xff] }
 0x138   :  { %3595 = vmatpush1.bf16.msra.mxu0 %v4696_v22  ;;  %3807 = vmatpush1.bf16.msra.mxu1 %v4698_v23  ;;  %v4746_v22 = vcombine.low %v167_v8, %v171_v10  ;;  %v4753_v23 = vcombine.high %v174_v17, %v178_v18  ;;  %v219_v8 = vld [vmem:[#allocation5 + $0x3f8] sm:$0xff]  ;;  %v226_v17 = vld [vmem:[#allocation5 + $0x430] sm:$0xff] }
 0x139   :  { %3596 = vmatprep.subr.bf16.mxu0 %v4705_v24  ;;  %3808 = vmatprep.subr.bf16.mxu1 %v4707_v26  ;;  %v4755_v24 = vcombine.high %v175_v19, %v179_v20  ;;  %v182_v26 = vld [vmem:[#allocation5 + $0x2d0] sm:$0xff]  ;;  %v223_v18 = vld [vmem:[#allocation5 + $0x418] sm:$0xff] }
 0x13a   :  { %v4760_v42 = vcombine.low %v182_v26, %v186_v27 }
 0x13c   :  { %3597 = vmatpush1.bf16.msra.mxu0 %v4704_v32  ;;  %3809 = vmatpush1.bf16.msra.mxu1 %v4706_v33  ;;  %v4754_v32 = vcombine.low %v175_v19, %v179_v20  ;;  %v4761_v33 = vcombine.high %v182_v26, %v186_v27  ;;  %v227_v19 = vld [vmem:[#allocation5 + $0x438] sm:$0xff]  ;;  %v234_v26 = vld [vmem:[#allocation5 + $0x470] sm:$0xff] }
 0x13d   :  { %3598 = vmatprep.subr.bf16.mxu0 %v4713_v34  ;;  %3810 = vmatprep.subr.bf16.mxu1 %v4715_v36  ;;  %v4763_v34 = vcombine.high %v183_v28, %v187_v30  ;;  %v190_v36 = vld [vmem:[#allocation5 + $0x310] sm:$0xff]  ;;  %v231_v27 = vld [vmem:[#allocation5 + $0x458] sm:$0xff] }
 0x13e   :  { %v4768_v52 = vcombine.low %v190_v36, %v194_v37 }
 0x140   :  { %3599 = vmatpush1.bf16.msra.mxu0 %v4712_v43  ;;  %3811 = vmatpush1.bf16.msra.mxu1 %v4714_v44  ;;  %v4762_v43 = vcombine.low %v183_v28, %v187_v30  ;;  %v4769_v44 = vcombine.high %v190_v36, %v194_v37  ;;  %v235_v28 = vld [vmem:[#allocation5 + $0x478] sm:$0xff]  ;;  %v242_v36 = vld [vmem:[#allocation5 + $0x4b0] sm:$0xff] }
 0x141   :  { %3600 = vmatprep.subr.bf16.mxu0 %v4721_v45  ;;  %3812 = vmatprep.subr.bf16.mxu1 %v4723_v58  ;;  %v4771_v45 = vcombine.high %v191_v39, %v195_v41  ;;  %v198_v58 = vld [vmem:[#allocation5 + $0x350] sm:$0xff]  ;;  %v239_v37 = vld [vmem:[#allocation5 + $0x498] sm:$0xff] }
 0x142   :  { %v4776_v63 = vcombine.low %v198_v58, %v202_v49 }
 0x144   :  { %3601 = vmatpush1.bf16.msra.mxu0 %v4720_v53  ;;  %3813 = vmatpush1.bf16.msra.mxu1 %v4722_v54  ;;  %v4770_v53 = vcombine.low %v191_v39, %v195_v41  ;;  %v4777_v54 = vcombine.high %v198_v58, %v202_v49  ;;  %v243_v39 = vld [vmem:[#allocation5 + $0x4b8] sm:$0xff]  ;;  %v250_v58 = vld [vmem:[#allocation5 + $0x4f0] sm:$0xff] }
 0x145   :  { %3602 = vmatprep.subr.bf16.mxu0 %v4729_v55  ;;  %3814 = vmatprep.subr.bf16.mxu1 %v4731_v57  ;;  %v4779_v55 = vcombine.high %v199_v50, %v203_v51  ;;  %v206_v57 = vld [vmem:[#allocation5 + $0x390] sm:$0xff]  ;;  %v247_v49 = vld [vmem:[#allocation5 + $0x4d8] sm:$0xff] }
 0x146   :  { %v4784_v10 = vcombine.low %v206_v57, %v210_v59 }
 0x148   :  { %3603 = vmatpush1.bf16.msra.mxu0 %v4728_v0  ;;  %3815 = vmatpush1.bf16.msra.mxu1 %v4730_v1  ;;  %v4778_v0 = vcombine.low %v199_v50, %v203_v51  ;;  %v4785_v1 = vcombine.high %v206_v57, %v210_v59  ;;  %v251_v50 = vld [vmem:[#allocation5 + $0x4f8] sm:$0xff] }
 0x149   :  { %3604 = vmatprep.subr.bf16.mxu0 %v4737_v2  ;;  %3816 = vmatprep.subr.bf16.mxu1 %v4739_v4  ;;  %v4787_v2 = vcombine.high %v207_v60, %v211_v62  ;;  %v214_v4 = vld [vmem:[#allocation5 + $0x3d0] sm:$0xff]  ;;  %v255_v57 = vld [vmem:[#allocation5 + $0x518] sm:$0xff] }
 0x14a   :  { %v4792_v20 = vcombine.low %v214_v4, %v218_v5  ;;  %v259_v59 = vld [vmem:[#allocation5 + $0x538] sm:$0xff] }
 0x14c   :  { %3605 = vmatpush1.bf16.msra.mxu0 %v4736_v11  ;;  %3817 = vmatpush1.bf16.msra.mxu1 %v4738_v12  ;;  %v4786_v11 = vcombine.low %v207_v60, %v211_v62  ;;  %v4793_v12 = vcombine.high %v214_v4, %v218_v5  ;;  %v267_v4 = vld [vmem:[#allocation5 + $0x578] sm:$0xff] }
 0x14d   :  { %3606 = vmatprep.subr.bf16.mxu0 %v4745_v13  ;;  %3818 = vmatprep.subr.bf16.mxu1 %v4747_v16  ;;  %v4795_v13 = vcombine.high %v215_v7, %v219_v8  ;;  %v222_v16 = vld [vmem:[#allocation5 + $0x410] sm:$0xff] }
 0x14e   :  { %v4800_v30 = vcombine.low %v222_v16, %v226_v17 }
 0x150   :  { %3607 = vmatpush1.bf16.msra.mxu0 %v4744_v21  ;;  %3819 = vmatpush1.bf16.msra.mxu1 %v4746_v22  ;;  %v4794_v21 = vcombine.low %v215_v7, %v219_v8  ;;  %v4801_v22 = vcombine.high %v222_v16, %v226_v17  ;;  %v4834_v7 = vcombine.low %v255_v57, %v259_v59 }
 0x151   :  { %3608 = vmatprep.subr.bf16.mxu0 %v4753_v23  ;;  %3820 = vmatprep.subr.bf16.mxu1 %v4755_v24  ;;  %v4803_v23 = vcombine.high %v223_v18, %v227_v19  ;;  %v230_v24 = vld [vmem:[#allocation5 + $0x450] sm:$0xff] }
 0x152   :  { %v4808_v41 = vcombine.low %v230_v24, %v234_v26 }
 0x154   :  { %3609 = vmatpush1.bf16.msra.mxu0 %v4752_v31  ;;  %3821 = vmatpush1.bf16.msra.mxu1 %v4754_v32  ;;  %v4802_v31 = vcombine.low %v223_v18, %v227_v19  ;;  %v4809_v32 = vcombine.high %v230_v24, %v234_v26  ;;  %v278_v19 = vld [vmem:[#allocation5 + $0x5d0] sm:$0xff] }
 0x155   :  { %3610 = vmatprep.subr.bf16.mxu0 %v4761_v33  ;;  %3822 = vmatprep.subr.bf16.mxu1 %v4763_v34  ;;  %v4811_v33 = vcombine.high %v231_v27, %v235_v28  ;;  %v238_v34 = vld [vmem:[#allocation5 + $0x490] sm:$0xff] }
 0x156   :  { %v4816_v51 = vcombine.low %v238_v34, %v242_v36 }
 0x158   :  { %3611 = vmatpush1.bf16.msra.mxu0 %v4760_v42  ;;  %3823 = vmatpush1.bf16.msra.mxu1 %v4762_v43  ;;  %v4810_v42 = vcombine.low %v231_v27, %v235_v28  ;;  %v4817_v43 = vcombine.high %v238_v34, %v242_v36  ;;  %v286_v28 = vld [vmem:[#allocation5 + $0x610] sm:$0xff] }
 0x159   :  { %3612 = vmatprep.subr.bf16.mxu0 %v4769_v44  ;;  %3824 = vmatprep.subr.bf16.mxu1 %v4771_v45  ;;  %v4819_v44 = vcombine.high %v239_v37, %v243_v39  ;;  %v246_v45 = vld [vmem:[#allocation5 + $0x4d0] sm:$0xff] }
 0x15a   :  { %v4824_v60 = vcombine.low %v246_v45, %v250_v58 }
 0x15c   :  { %3613 = vmatpush1.bf16.msra.mxu0 %v4768_v52  ;;  %3825 = vmatpush1.bf16.msra.mxu1 %v4770_v53  ;;  %v4825_v52 = vcombine.high %v246_v45, %v250_v58  ;;  %v4827_v53 = vcombine.high %v247_v49, %v251_v50 }
 0x15d   :  { %3614 = vmatprep.subr.bf16.mxu0 %v4777_v54  ;;  %3826 = vmatprep.subr.bf16.mxu1 %v4779_v55  ;;  %v254_v54 = vld [vmem:[#allocation5 + $0x510] sm:$0xff] }
 0x15e   :  { %v258_v55 = vld [vmem:[#allocation5 + $0x530] sm:$0xff] }
 0x15f   :  { %v4833_v62 = vcombine.high %v254_v54, %v258_v55  ;;  %v4832_v5 = vcombine.low %v254_v54, %v258_v55 }
 0x160   :  { %3615 = vmatpush1.bf16.msra.mxu0 %v4776_v63  ;;  %3827 = vmatpush1.bf16.msra.mxu1 %v4778_v0  ;;  %v4835_v63 = vcombine.high %v255_v57, %v259_v59  ;;  %v262_v0 = vld [vmem:[#allocation5 + $0x550] sm:$0xff] }
 0x161   :  { %3616 = vmatprep.subr.bf16.mxu0 %v4785_v1  ;;  %3828 = vmatprep.subr.bf16.mxu1 %v4787_v2  ;;  %v266_v1 = vld [vmem:[#allocation5 + $0x570] sm:$0xff]  ;;  %v263_v2 = vld [vmem:[#allocation5 + $0x558] sm:$0xff] }
 0x162   :  { %v4843_v8 = vcombine.high %v263_v2, %v267_v4  ;;  %v4840_v16 = vcombine.low %v262_v0, %v266_v1  ;;  %v4842_v17 = vcombine.low %v263_v2, %v267_v4  ;;  %v310_v59 = vld [vmem:[#allocation5 + $0x6d0] sm:$0xff] }
 0x163   :  { %v318_v4 = vld [vmem:[#allocation5 + $0x710] sm:$0xff] }
 0x164   :  { %3617 = vmatpush1.bf16.msra.mxu0 %v4784_v10  ;;  %3829 = vmatpush1.bf16.msra.mxu1 %v4786_v11  ;;  %v270_v10 = vld [vmem:[#allocation5 + $0x590] sm:$0xff] }
 0x165   :  { %3618 = vmatprep.subr.bf16.mxu0 %v4793_v12  ;;  %3830 = vmatprep.subr.bf16.mxu1 %v4795_v13  ;;  %v274_v11 = vld [vmem:[#allocation5 + $0x5b0] sm:$0xff]  ;;  %v271_v12 = vld [vmem:[#allocation5 + $0x598] sm:$0xff] }
 0x166   :  { %v275_v13 = vld [vmem:[#allocation5 + $0x5b8] sm:$0xff]  ;;  %v4849_v18 = vcombine.high %v270_v10, %v274_v11 }
 0x167   :  { %v4850_v24 = vcombine.low %v271_v12, %v275_v13 }
 0x168   :  { %3619 = vmatpush1.bf16.msra.mxu0 %v4792_v20  ;;  %3831 = vmatpush1.bf16.msra.mxu1 %v4794_v21  ;;  %v282_v20 = vld [vmem:[#allocation5 + $0x5f0] sm:$0xff]  ;;  %v279_v21 = vld [vmem:[#allocation5 + $0x5d8] sm:$0xff] }
 0x169   :  { %3641 = vmatprep.subr.bf16.mxu0 %v4801_v22  ;;  %3853 = vmatprep.subr.bf16.mxu1 %v4803_v23  ;;  %v283_v22 = vld [vmem:[#allocation5 + $0x5f8] sm:$0xff]  ;;  %v4848_v23 = vcombine.low %v270_v10, %v274_v11  ;;  %v4857_v26 = vcombine.high %v278_v19, %v282_v20 }
 0x16a   :  { %v4859_v27 = vcombine.high %v279_v21, %v283_v22  ;;  %v4858_v34 = vcombine.low %v279_v21, %v283_v22  ;;  %v334_v22 = vld [vmem:[#allocation5 + $0x790] sm:$0xff] }
 0x16b   :  { %3621 = vmatmul.mubr.bf16.vlgmr.msra.gmra.mrb[8].mxu0 %v5431_v15  ;;  %3833 = vmatmul.mubr.bf16.vlgmr.msra.gmra.mrb[8].mxu1 %v5431_v15  ;;  %v4818_v15 = vcombine.low %v239_v37, %v243_v39  ;;  %v294_v39 = vld [vmem:[#allocation5 + $0x650] sm:$0xff] }
 0x16c   :  { %3642 = vmatpush1.bf16.msra.mxu0 %v4800_v30  ;;  %3854 = vmatpush1.bf16.msra.mxu1 %v4802_v31  ;;  %v290_v30 = vld [vmem:[#allocation5 + $0x630] sm:$0xff]  ;;  %v287_v31 = vld [vmem:[#allocation5 + $0x618] sm:$0xff] }
 0x16d   :  { %3643 = vmatprep.subr.bf16.mxu0 %v4809_v32  ;;  %3855 = vmatprep.subr.bf16.mxu1 %v4811_v33  ;;  %v291_v32 = vld [vmem:[#allocation5 + $0x638] sm:$0xff]  ;;  %v4856_v33 = vcombine.low %v278_v19, %v282_v20  ;;  %v4865_v36 = vcombine.high %v286_v28, %v290_v30 }
 0x16e   :  { %3630 = vmatprep.mubr.bf16.mxu0 %v5433_v25  ;;  %3842 = vmatprep.mubr.bf16.mxu1 %v5433_v25  ;;  %v4826_v25 = vcombine.low %v247_v49, %v251_v50  ;;  %v4867_v37 = vcombine.high %v287_v31, %v291_v32  ;;  %v4866_v45 = vcombine.low %v287_v31, %v291_v32  ;;  %v302_v50 = vld [vmem:[#allocation5 + $0x690] sm:$0xff] }
 0x16f   :  { %v342_v32 = vld [vmem:[#allocation5 + $0x7d0] sm:$0xff] }
 0x170   :  { %3644 = vmatpush1.bf16.msra.mxu0 %v4808_v41  ;;  %3856 = vmatpush1.bf16.msra.mxu1 %v4810_v42  ;;  %v298_v41 = vld [vmem:[#allocation5 + $0x670] sm:$0xff]  ;;  %v295_v42 = vld [vmem:[#allocation5 + $0x658] sm:$0xff] }
 0x171   :  { %3645 = vmatprep.subr.bf16.mxu0 %v4817_v43  ;;  %3857 = vmatprep.subr.bf16.mxu1 %v4819_v44  ;;  %v299_v43 = vld [vmem:[#allocation5 + $0x678] sm:$0xff]  ;;  %v4864_v44 = vcombine.low %v286_v28, %v290_v30  ;;  %v4873_v58 = vcombine.high %v294_v39, %v298_v41 }
 0x172   :  { %v4875_v49 = vcombine.high %v295_v42, %v299_v43  ;;  %v4874_v54 = vcombine.low %v295_v42, %v299_v43  ;;  %v350_v43 = vld [vmem:[#allocation5 + $0x810] sm:$0xff] }
 0x173   :  { %3631 = vmatmul.mubr.bf16.gmra.mrb[12].mxu0 %v5439_v38  ;;  %3843 = vmatmul.mubr.bf16.gmra.mrb[12].mxu1 %v5439_v38  ;;  %v4841_v38 = vcombine.high %v262_v0, %v266_v1 }
 0x174   :  { %3646 = vmatpush1.bf16.msra.mxu0 %v4816_v51  ;;  %3858 = vmatpush1.bf16.msra.mxu1 %v4818_v15  ;;  %v306_v51 = vld [vmem:[#allocation5 + $0x6b0] sm:$0xff]  ;;  %v303_v15 = vld [vmem:[#allocation5 + $0x698] sm:$0xff] }
 0x175   :  { %3647 = vmatprep.subr.bf16.mxu0 %v4825_v52  ;;  %3859 = vmatprep.subr.bf16.mxu1 %v4827_v53  ;;  %v307_v52 = vld [vmem:[#allocation5 + $0x6b8] sm:$0xff]  ;;  %v4872_v53 = vcombine.low %v294_v39, %v298_v41  ;;  %v4881_v55 = vcombine.high %v302_v50, %v306_v51 }
 0x176   :  { %3673 = vmatprep.mubr.bf16.mxu0 %v5441_v47  ;;  %3885 = vmatprep.mubr.bf16.mxu1 %v5441_v47  ;;  %v4851_v47 = vcombine.high %v271_v12, %v275_v13  ;;  %v4883_v57 = vcombine.high %v303_v15, %v307_v52  ;;  %v4882_v0 = vcombine.low %v303_v15, %v307_v52  ;;  %v326_v13 = vld [vmem:[#allocation5 + $0x750] sm:$0xff] }
 0x177   :  { %v358_v52 = vld [vmem:[#allocation5 + $0x850] sm:$0xff] }
 0x178   :  { %3648 = vmatpush1.bf16.msra.mxu0 %v4824_v60  ;;  %3860 = vmatpush1.bf16.msra.mxu1 %v4826_v25  ;;  %v314_v60 = vld [vmem:[#allocation5 + $0x6f0] sm:$0xff]  ;;  %v311_v25 = vld [vmem:[#allocation5 + $0x6d8] sm:$0xff] }
 0x179   :  { %3649 = vmatprep.subr.bf16.mxu0 %v4833_v62  ;;  %3861 = vmatprep.subr.bf16.mxu1 %v4835_v63  ;;  %v315_v62 = vld [vmem:[#allocation5 + $0x6f8] sm:$0xff]  ;;  %v4880_v63 = vcombine.low %v302_v50, %v306_v51  ;;  %v4889_v1 = vcombine.high %v310_v59, %v314_v60 }
 0x17a   :  { %v4891_v2 = vcombine.high %v311_v25, %v315_v62  ;;  %v4890_v10 = vcombine.low %v311_v25, %v315_v62  ;;  %v366_v62 = vld [vmem:[#allocation5 + $0x890] sm:$0xff] }
 0x17c   :  { %3650 = vmatpush1.bf16.msra.mxu0 %v4832_v5  ;;  %3862 = vmatpush1.bf16.msra.mxu1 %v4834_v7  ;;  %v322_v5 = vld [vmem:[#allocation5 + $0x730] sm:$0xff]  ;;  %v319_v7 = vld [vmem:[#allocation5 + $0x718] sm:$0xff] }
 0x17d   :  { %3651 = vmatprep.subr.bf16.mxu0 %v4841_v38  ;;  %3863 = vmatprep.subr.bf16.mxu1 %v4843_v8  ;;  %v323_v38 = vld [vmem:[#allocation5 + $0x738] sm:$0xff]  ;;  %v4888_v8 = vcombine.low %v310_v59, %v314_v60  ;;  %v4897_v11 = vcombine.high %v318_v4, %v322_v5 }
 0x17e   :  { %v4899_v12 = vcombine.high %v319_v7, %v323_v38  ;;  %v4898_v19 = vcombine.low %v319_v7, %v323_v38  ;;  %v374_v38 = vld [vmem:[#allocation5 + $0x8d0] sm:$0xff] }
 0x180   :  { %3652 = vmatpush1.bf16.msra.mxu0 %v4840_v16  ;;  %3864 = vmatpush1.bf16.msra.mxu1 %v4842_v17  ;;  %v330_v16 = vld [vmem:[#allocation5 + $0x770] sm:$0xff]  ;;  %v327_v17 = vld [vmem:[#allocation5 + $0x758] sm:$0xff] }
 0x181   :  { %3653 = vmatprep.subr.bf16.mxu0 %v4849_v18  ;;  %3865 = vmatprep.subr.bf16.mxu1 %v4851_v47  ;;  %v331_v18 = vld [vmem:[#allocation5 + $0x778] sm:$0xff]  ;;  %v4896_v47 = vcombine.low %v318_v4, %v322_v5  ;;  %v4905_v20 = vcombine.high %v326_v13, %v330_v16 }
 0x182   :  { %v4907_v21 = vcombine.high %v327_v17, %v331_v18  ;;  %v4906_v28 = vcombine.low %v327_v17, %v331_v18  ;;  %v382_v17 = vld [vmem:[#allocation5 + $0x910] sm:$0xff] }
 0x183   :  { %v386_v18 = vld [vmem:[#allocation5 + $0x930] sm:$0xff] }
 0x184   :  { %3654 = vmatpush1.bf16.msra.mxu0 %v4848_v23  ;;  %3866 = vmatpush1.bf16.msra.mxu1 %v4850_v24  ;;  %v338_v23 = vld [vmem:[#allocation5 + $0x7b0] sm:$0xff]  ;;  %v335_v24 = vld [vmem:[#allocation5 + $0x798] sm:$0xff] }
 0x185   :  { %3655 = vmatprep.subr.bf16.mxu0 %v4857_v26  ;;  %3867 = vmatprep.subr.bf16.mxu1 %v4859_v27  ;;  %v339_v26 = vld [vmem:[#allocation5 + $0x7b8] sm:$0xff]  ;;  %v4904_v27 = vcombine.low %v326_v13, %v330_v16  ;;  %v4913_v30 = vcombine.high %v334_v22, %v338_v23 }
 0x186   :  { %v4915_v31 = vcombine.high %v335_v24, %v339_v26  ;;  %v4914_v39 = vcombine.low %v335_v24, %v339_v26  ;;  %v394_v24 = vld [vmem:[#allocation5 + $0x970] sm:$0xff]  ;;  %v391_v26 = vld [vmem:[#allocation5 + $0x958] sm:$0xff] }
 0x188   :  { %3656 = vmatpush1.bf16.msra.mxu0 %v4856_v33  ;;  %3868 = vmatpush1.bf16.msra.mxu1 %v4858_v34  ;;  %v346_v33 = vld [vmem:[#allocation5 + $0x7f0] sm:$0xff]  ;;  %v343_v34 = vld [vmem:[#allocation5 + $0x7d8] sm:$0xff] }
 0x189   :  { %3657 = vmatprep.subr.bf16.mxu0 %v4865_v36  ;;  %3869 = vmatprep.subr.bf16.mxu1 %v4867_v37  ;;  %v347_v36 = vld [vmem:[#allocation5 + $0x7f8] sm:$0xff]  ;;  %v4912_v37 = vcombine.low %v334_v22, %v338_v23  ;;  %v4921_v41 = vcombine.high %v342_v32, %v346_v33  ;;  %v390_v23 = vld [vmem:[#allocation5 + $0x950] sm:$0xff] }
 0x18a   :  { %v4923_v42 = vcombine.high %v343_v34, %v347_v36  ;;  %v4922_v50 = vcombine.low %v343_v34, %v347_v36  ;;  %v399_v34 = vld [vmem:[#allocation5 + $0x998] sm:$0xff] }
 0x18b   :  { %v403_v36 = vld [vmem:[#allocation5 + $0x9b8] sm:$0xff] }
 0x18c   :  { %3658 = vmatpush1.bf16.msra.mxu0 %v4864_v44  ;;  %3870 = vmatpush1.bf16.msra.mxu1 %v4866_v45  ;;  %v354_v44 = vld [vmem:[#allocation5 + $0x830] sm:$0xff]  ;;  %v351_v45 = vld [vmem:[#allocation5 + $0x818] sm:$0xff] }
 0x18d   :  { %3659 = vmatprep.subr.bf16.mxu0 %v4873_v58  ;;  %3871 = vmatprep.subr.bf16.mxu1 %v4875_v49  ;;  %v355_v58 = vld [vmem:[#allocation5 + $0x838] sm:$0xff]  ;;  %v4920_v49 = vcombine.low %v342_v32, %v346_v33  ;;  %v4929_v51 = vcombine.high %v350_v43, %v354_v44  ;;  %v398_v32 = vld [vmem:[#allocation5 + $0x990] sm:$0xff] }
 0x18e   :  { %v4931_v15 = vcombine.high %v351_v45, %v355_v58  ;;  %v4930_v59 = vcombine.low %v351_v45, %v355_v58  ;;  %v402_v33 = vld [vmem:[#allocation5 + $0x9b0] sm:$0xff]  ;;  %v411_v45 = vld [vmem:[#allocation5 + $0x9f8] sm:$0xff] }
 0x18f   :  { %v4976_v58 = vcombine.low %v398_v32, %v402_v33 }
 0x190   :  { %3660 = vmatpush1.bf16.msra.mxu0 %v4872_v53  ;;  %3872 = vmatpush1.bf16.msra.mxu1 %v4874_v54  ;;  %v362_v53 = vld [vmem:[#allocation5 + $0x870] sm:$0xff]  ;;  %v359_v54 = vld [vmem:[#allocation5 + $0x858] sm:$0xff] }
 0x191   :  { %3661 = vmatprep.subr.bf16.mxu0 %v4881_v55  ;;  %3873 = vmatprep.subr.bf16.mxu1 %v4883_v57  ;;  %v363_v55 = vld [vmem:[#allocation5 + $0x878] sm:$0xff]  ;;  %v4928_v57 = vcombine.low %v350_v43, %v354_v44  ;;  %v4937_v60 = vcombine.high %v358_v52, %v362_v53  ;;  %v410_v43 = vld [vmem:[#allocation5 + $0x9f0] sm:$0xff] }
 0x192   :  { %v4939_v25 = vcombine.high %v359_v54, %v363_v55  ;;  %v4938_v4 = vcombine.low %v359_v54, %v363_v55  ;;  %v407_v44 = vld [vmem:[#allocation5 + $0x9d8] sm:$0xff] }
 0x193   :  { %v419_v54 = vld [vmem:[#allocation5 + $0xa38] sm:$0xff] }
 0x194   :  { %3662 = vmatpush1.bf16.msra.mxu0 %v4880_v63  ;;  %3874 = vmatpush1.bf16.msra.mxu1 %v4882_v0  ;;  %v370_v63 = vld [vmem:[#allocation5 + $0x8b0] sm:$0xff]  ;;  %v367_v0 = vld [vmem:[#allocation5 + $0x898] sm:$0xff] }
 0x195   :  { %3663 = vmatprep.subr.bf16.mxu0 %v4889_v1  ;;  %3875 = vmatprep.subr.bf16.mxu1 %v4891_v2  ;;  %v371_v1 = vld [vmem:[#allocation5 + $0x8b8] sm:$0xff]  ;;  %v4936_v2 = vcombine.low %v358_v52, %v362_v53  ;;  %v4945_v5 = vcombine.high %v366_v62, %v370_v63  ;;  %v418_v52 = vld [vmem:[#allocation5 + $0xa30] sm:$0xff] }
 0x196   :  { %v4947_v7 = vcombine.high %v367_v0, %v371_v1  ;;  %v415_v53 = vld [vmem:[#allocation5 + $0xa18] sm:$0xff] }
 0x198   :  { %3664 = vmatpush1.bf16.msra.mxu0 %v4888_v8  ;;  %3876 = vmatpush1.bf16.msra.mxu1 %v4890_v10  ;;  %v378_v8 = vld [vmem:[#allocation5 + $0x8f0] sm:$0xff]  ;;  %v375_v10 = vld [vmem:[#allocation5 + $0x8d8] sm:$0xff] }
 0x199   :  { %3665 = vmatprep.subr.bf16.mxu0 %v4897_v11  ;;  %3877 = vmatprep.subr.bf16.mxu1 %v4899_v12  ;;  %v379_v11 = vld [vmem:[#allocation5 + $0x8f8] sm:$0xff]  ;;  %v4944_v12 = vcombine.low %v366_v62, %v370_v63  ;;  %v4953_v13 = vcombine.high %v374_v38, %v378_v8  ;;  %v426_v62 = vld [vmem:[#allocation5 + $0xa70] sm:$0xff] }
 0x19a   :  { %v4955_v16 = vcombine.high %v375_v10, %v379_v11  ;;  %v423_v63 = vld [vmem:[#allocation5 + $0xa58] sm:$0xff] }
 0x19c   :  { %3666 = vmatpush1.bf16.msra.mxu0 %v4896_v47  ;;  %3878 = vmatpush1.bf16.msra.mxu1 %v4898_v19  ;;  %v383_v47 = vld [vmem:[#allocation5 + $0x918] sm:$0xff] }
 0x19d   :  { %3667 = vmatprep.subr.bf16.mxu0 %v4905_v20  ;;  %3879 = vmatprep.subr.bf16.mxu1 %v4907_v21  ;;  %v387_v19 = vld [vmem:[#allocation5 + $0x938] sm:$0xff]  ;;  %v4952_v20 = vcombine.low %v374_v38, %v378_v8  ;;  %v4961_v21 = vcombine.high %v382_v17, %v386_v18  ;;  %v434_v38 = vld [vmem:[#allocation5 + $0xab0] sm:$0xff] }
 0x19e   :  { %v4963_v22 = vcombine.high %v383_v47, %v387_v19  ;;  %v431_v8 = vld [vmem:[#allocation5 + $0xa98] sm:$0xff] }
 0x1a0   :  { %3668 = vmatpush1.bf16.msra.mxu0 %v4904_v27  ;;  %3880 = vmatpush1.bf16.msra.mxu1 %v4906_v28  ;;  %v395_v27 = vld [vmem:[#allocation5 + $0x978] sm:$0xff]  ;;  %v4960_v28 = vcombine.low %v382_v17, %v386_v18  ;;  %v442_v17 = vld [vmem:[#allocation5 + $0xaf0] sm:$0xff] }
 0x1a1   :  { %3669 = vmatprep.subr.bf16.mxu0 %v4913_v30  ;;  %3881 = vmatprep.subr.bf16.mxu1 %v4915_v31  ;;  %v4962_v30 = vcombine.low %v383_v47, %v387_v19  ;;  %v4971_v31 = vcombine.high %v391_v26, %v395_v27  ;;  %v439_v18 = vld [vmem:[#allocation5 + $0xad8] sm:$0xff] }
 0x1a2   :  { %v443_v47 = vld [vmem:[#allocation5 + $0xaf8] sm:$0xff] }
 0x1a4   :  { %3670 = vmatpush1.bf16.msra.mxu0 %v4912_v37  ;;  %3882 = vmatpush1.bf16.msra.mxu1 %v4914_v39  ;;  %v4968_v37 = vcombine.low %v390_v23, %v394_v24  ;;  %v4970_v39 = vcombine.low %v391_v26, %v395_v27  ;;  %v451_v26 = vld [vmem:[#allocation5 + $0xb38] sm:$0xff] }
 0x1a5   :  { %3671 = vmatprep.subr.bf16.mxu0 %v4921_v41  ;;  %3883 = vmatprep.subr.bf16.mxu1 %v4923_v42  ;;  %v4977_v41 = vcombine.high %v398_v32, %v402_v33  ;;  %v406_v42 = vld [vmem:[#allocation5 + $0x9d0] sm:$0xff]  ;;  %v455_v33 = vld [vmem:[#allocation5 + $0xb58] sm:$0xff] }
 0x1a6   :  { %v4984_v55 = vcombine.low %v406_v42, %v410_v43  ;;  %v458_v32 = vld [vmem:[#allocation5 + $0xb70] sm:$0xff] }
 0x1a8   :  { %3672 = vmatpush1.bf16.msra.mxu0 %v4920_v49  ;;  %3884 = vmatpush1.bf16.msra.mxu1 %v4922_v50  ;;  %v4978_v49 = vcombine.low %v399_v34, %v403_v36  ;;  %v4985_v50 = vcombine.high %v406_v42, %v410_v43  ;;  %v466_v42 = vld [vmem:[#allocation5 + $0xbb0] sm:$0xff]  ;;  %v463_v43 = vld [vmem:[#allocation5 + $0xb98] sm:$0xff] }
 0x1a9   :  { %3694 = vmatprep.subr.bf16.mxu0 %v4929_v51  ;;  %3906 = vmatprep.subr.bf16.mxu1 %v4931_v15  ;;  %v4987_v51 = vcombine.high %v407_v44, %v411_v45  ;;  %v414_v15 = vld [vmem:[#allocation5 + $0xa10] sm:$0xff] }
 0x1ab   :  { %3674 = vmatmul.mubr.bf16.vlgmr.msra.gmra.mrb[8].mxu0 %v5447_v35  ;;  %3886 = vmatmul.mubr.bf16.vlgmr.msra.gmra.mrb[8].mxu1 %v5447_v35  ;;  %v4946_v35 = vcombine.low %v367_v0, %v371_v1  ;;  %v427_v0 = vld [vmem:[#allocation5 + $0xa78] sm:$0xff]  ;;  %v4992_v1 = vcombine.low %v414_v15, %v418_v52 }
 0x1ac   :  { %3695 = vmatpush1.bf16.msra.mxu0 %v4928_v57  ;;  %3907 = vmatpush1.bf16.msra.mxu1 %v4930_v59  ;;  %v4986_v57 = vcombine.low %v407_v44, %v411_v45  ;;  %v4993_v59 = vcombine.high %v414_v15, %v418_v52  ;;  %v467_v44 = vld [vmem:[#allocation5 + $0xbb8] sm:$0xff]  ;;  %v474_v15 = vld [vmem:[#allocation5 + $0xbf0] sm:$0xff] }
 0x1ad   :  { %3696 = vmatprep.subr.bf16.mxu0 %v4937_v60  ;;  %3908 = vmatprep.subr.bf16.mxu1 %v4939_v25  ;;  %v4995_v60 = vcombine.high %v415_v53, %v419_v54  ;;  %v422_v25 = vld [vmem:[#allocation5 + $0xa50] sm:$0xff]  ;;  %v471_v52 = vld [vmem:[#allocation5 + $0xbd8] sm:$0xff] }
 0x1ae   :  { %3683 = vmatprep.mubr.bf16.mxu0 %v5449_v46  ;;  %3895 = vmatprep.mubr.bf16.mxu1 %v5449_v46  ;;  %v4954_v46 = vcombine.low %v375_v10, %v379_v11  ;;  %v435_v10 = vld [vmem:[#allocation5 + $0xab8] sm:$0xff]  ;;  %v5000_v11 = vcombine.low %v422_v25, %v426_v62 }
 0x1b0   :  { %3697 = vmatpush1.bf16.msra.mxu0 %v4936_v2  ;;  %3909 = vmatpush1.bf16.msra.mxu1 %v4938_v4  ;;  %v4994_v2 = vcombine.low %v415_v53, %v419_v54  ;;  %v5001_v4 = vcombine.high %v422_v25, %v426_v62  ;;  %v475_v53 = vld [vmem:[#allocation5 + $0xbf8] sm:$0xff]  ;;  %v482_v25 = vld [vmem:[#allocation5 + $0xc30] sm:$0xff] }
 0x1b1   :  { %3698 = vmatprep.subr.bf16.mxu0 %v4945_v5  ;;  %3910 = vmatprep.subr.bf16.mxu1 %v4947_v7  ;;  %v5003_v5 = vcombine.high %v423_v63, %v427_v0  ;;  %v430_v7 = vld [vmem:[#allocation5 + $0xa90] sm:$0xff]  ;;  %v479_v62 = vld [vmem:[#allocation5 + $0xc18] sm:$0xff] }
 0x1b2   :  { %v5008_v19 = vcombine.low %v430_v7, %v434_v38 }
 0x1b3   :  { %3684 = vmatmul.mubr.bf16.gmra.mrb[12].mxu0 %v5455_v61  ;;  %3896 = vmatmul.mubr.bf16.gmra.mrb[12].mxu1 %v5455_v61  ;;  %v4969_v61 = vcombine.high %v390_v23, %v394_v24  ;;  %v450_v23 = vld [vmem:[#allocation5 + $0xb30] sm:$0xff]  ;;  %v447_v24 = vld [vmem:[#allocation5 + $0xb18] sm:$0xff] }
 0x1b4   :  { %3699 = vmatpush1.bf16.msra.mxu0 %v4944_v12  ;;  %3911 = vmatpush1.bf16.msra.mxu1 %v4946_v35  ;;  %v5002_v12 = vcombine.low %v423_v63, %v427_v0  ;;  %v5009_v35 = vcombine.high %v430_v7, %v434_v38  ;;  %v483_v63 = vld [vmem:[#allocation5 + $0xc38] sm:$0xff]  ;;  %v490_v7 = vld [vmem:[#allocation5 + $0xc70] sm:$0xff] }
 0x1b5   :  { %3700 = vmatprep.subr.bf16.mxu0 %v4953_v13  ;;  %3912 = vmatprep.subr.bf16.mxu1 %v4955_v16  ;;  %v5011_v13 = vcombine.high %v431_v8, %v435_v10  ;;  %v438_v16 = vld [vmem:[#allocation5 + $0xad0] sm:$0xff]  ;;  %v487_v38 = vld [vmem:[#allocation5 + $0xc58] sm:$0xff] }
 0x1b6   :  { %3726 = vmatprep.mubr.bf16.mxu0 %v5457_v6  ;;  %3938 = vmatprep.mubr.bf16.mxu1 %v5457_v6  ;;  %v4979_v6 = vcombine.high %v399_v34, %v403_v36  ;;  %v5016_v27 = vcombine.low %v438_v16, %v442_v17  ;;  %v459_v34 = vld [vmem:[#allocation5 + $0xb78] sm:$0xff] }
 0x1b8   :  { %3701 = vmatpush1.bf16.msra.mxu0 %v4952_v20  ;;  %3913 = vmatpush1.bf16.msra.mxu1 %v4954_v46  ;;  %v5010_v20 = vcombine.low %v431_v8, %v435_v10  ;;  %v5017_v46 = vcombine.high %v438_v16, %v442_v17  ;;  %v491_v8 = vld [vmem:[#allocation5 + $0xc78] sm:$0xff]  ;;  %v498_v16 = vld [vmem:[#allocation5 + $0xcb0] sm:$0xff] }
 0x1b9   :  { %3702 = vmatprep.subr.bf16.mxu0 %v4961_v21  ;;  %3914 = vmatprep.subr.bf16.mxu1 %v4963_v22  ;;  %v5019_v21 = vcombine.high %v439_v18, %v443_v47  ;;  %v446_v22 = vld [vmem:[#allocation5 + $0xb10] sm:$0xff]  ;;  %v495_v17 = vld [vmem:[#allocation5 + $0xc98] sm:$0xff] }
 0x1ba   :  { %v5024_v36 = vcombine.low %v446_v22, %v450_v23 }
 0x1bc   :  { %3703 = vmatpush1.bf16.msra.mxu0 %v4960_v28  ;;  %3915 = vmatpush1.bf16.msra.mxu1 %v4962_v30  ;;  %v5018_v28 = vcombine.low %v439_v18, %v443_v47  ;;  %v5025_v30 = vcombine.high %v446_v22, %v450_v23  ;;  %v499_v18 = vld [vmem:[#allocation5 + $0xcb8] sm:$0xff]  ;;  %v506_v22 = vld [vmem:[#allocation5 + $0xcf0] sm:$0xff] }
 0x1bd   :  { %3704 = vmatprep.subr.bf16.mxu0 %v4969_v61  ;;  %3916 = vmatprep.subr.bf16.mxu1 %v4971_v31  ;;  %v5027_v61 = vcombine.high %v447_v24, %v451_v26  ;;  %v454_v31 = vld [vmem:[#allocation5 + $0xb50] sm:$0xff]  ;;  %v503_v23 = vld [vmem:[#allocation5 + $0xcd8] sm:$0xff] }
 0x1be   :  { %v5032_v45 = vcombine.low %v454_v31, %v458_v32 }
 0x1c0   :  { %3705 = vmatpush1.bf16.msra.mxu0 %v4968_v37  ;;  %3917 = vmatpush1.bf16.msra.mxu1 %v4970_v39  ;;  %v5026_v37 = vcombine.low %v447_v24, %v451_v26  ;;  %v5033_v39 = vcombine.high %v454_v31, %v458_v32  ;;  %v507_v24 = vld [vmem:[#allocation5 + $0xcf8] sm:$0xff] }
 0x1c1   :  { %3706 = vmatprep.subr.bf16.mxu0 %v4977_v41  ;;  %3918 = vmatprep.subr.bf16.mxu1 %v4979_v6  ;;  %v5035_v41 = vcombine.high %v455_v33, %v459_v34  ;;  %v462_v6 = vld [vmem:[#allocation5 + $0xb90] sm:$0xff]  ;;  %v511_v31 = vld [vmem:[#allocation5 + $0xd18] sm:$0xff] }
 0x1c2   :  { %v5040_v54 = vcombine.low %v462_v6, %v466_v42  ;;  %v515_v32 = vld [vmem:[#allocation5 + $0xd38] sm:$0xff] }
 0x1c4   :  { %3707 = vmatpush1.bf16.msra.mxu0 %v4976_v58  ;;  %3919 = vmatpush1.bf16.msra.mxu1 %v4978_v49  ;;  %v5034_v58 = vcombine.low %v455_v33, %v459_v34  ;;  %v5041_v49 = vcombine.high %v462_v6, %v466_v42  ;;  %v523_v6 = vld [vmem:[#allocation5 + $0xd78] sm:$0xff] }
 0x1c5   :  { %3708 = vmatprep.subr.bf16.mxu0 %v4985_v50  ;;  %3920 = vmatprep.subr.bf16.mxu1 %v4987_v51  ;;  %v5043_v50 = vcombine.high %v463_v43, %v467_v44  ;;  %v470_v51 = vld [vmem:[#allocation5 + $0xbd0] sm:$0xff] }
 0x1c6   :  { %v5048_v0 = vcombine.low %v470_v51, %v474_v15 }
 0x1c8   :  { %3709 = vmatpush1.bf16.msra.mxu0 %v4984_v55  ;;  %3921 = vmatpush1.bf16.msra.mxu1 %v4986_v57  ;;  %v5042_v55 = vcombine.low %v463_v43, %v467_v44  ;;  %v5049_v57 = vcombine.high %v470_v51, %v474_v15  ;;  %v5090_v43 = vcombine.low %v511_v31, %v515_v32 }
 0x1c9   :  { %3710 = vmatprep.subr.bf16.mxu0 %v4993_v59  ;;  %3922 = vmatprep.subr.bf16.mxu1 %v4995_v60  ;;  %v5051_v59 = vcombine.high %v471_v52, %v475_v53  ;;  %v478_v60 = vld [vmem:[#allocation5 + $0xc10] sm:$0xff] }
 0x1ca   :  { %v5056_v10 = vcombine.low %v478_v60, %v482_v25 }
 0x1cc   :  { %3711 = vmatpush1.bf16.msra.mxu0 %v4992_v1  ;;  %3923 = vmatpush1.bf16.msra.mxu1 %v4994_v2  ;;  %v5050_v1 = vcombine.low %v471_v52, %v475_v53  ;;  %v5057_v2 = vcombine.high %v478_v60, %v482_v25  ;;  %v535_v60 = vld [vmem:[#allocation5 + $0xdd8] sm:$0xff] }
 0x1cd   :  { %3712 = vmatprep.subr.bf16.mxu0 %v5001_v4  ;;  %3924 = vmatprep.subr.bf16.mxu1 %v5003_v5  ;;  %v5059_v4 = vcombine.high %v479_v62, %v483_v63  ;;  %v486_v5 = vld [vmem:[#allocation5 + $0xc50] sm:$0xff]  ;;  %v539_v25 = vld [vmem:[#allocation5 + $0xdf8] sm:$0xff] }
 0x1ce   :  { %v5064_v47 = vcombine.low %v486_v5, %v490_v7 }
 0x1d0   :  { %3713 = vmatpush1.bf16.msra.mxu0 %v5000_v11  ;;  %3925 = vmatpush1.bf16.msra.mxu1 %v5002_v12  ;;  %v5058_v11 = vcombine.low %v479_v62, %v483_v63  ;;  %v5065_v12 = vcombine.high %v486_v5, %v490_v7 }
 0x1d1   :  { %3714 = vmatprep.subr.bf16.mxu0 %v5009_v35  ;;  %3926 = vmatprep.subr.bf16.mxu1 %v5011_v13  ;;  %v5067_v35 = vcombine.high %v487_v38, %v491_v8  ;;  %v494_v13 = vld [vmem:[#allocation5 + $0xc90] sm:$0xff] }
 0x1d2   :  { %v5072_v26 = vcombine.low %v494_v13, %v498_v16 }
 0x1d4   :  { %3715 = vmatpush1.bf16.msra.mxu0 %v5008_v19  ;;  %3927 = vmatpush1.bf16.msra.mxu1 %v5010_v20  ;;  %v5066_v19 = vcombine.low %v487_v38, %v491_v8  ;;  %v5073_v20 = vcombine.high %v494_v13, %v498_v16  ;;  %v543_v16 = vld [vmem:[#allocation5 + $0xe18] sm:$0xff] }
 0x1d5   :  { %3716 = vmatprep.subr.bf16.mxu0 %v5017_v46  ;;  %3928 = vmatprep.subr.bf16.mxu1 %v5019_v21  ;;  %v5075_v46 = vcombine.high %v495_v17, %v499_v18  ;;  %v502_v21 = vld [vmem:[#allocation5 + $0xcd0] sm:$0xff] }
 0x1d6   :  { %v5080_v33 = vcombine.low %v502_v21, %v506_v22 }
 0x1d8   :  { %3717 = vmatpush1.bf16.msra.mxu0 %v5016_v27  ;;  %3929 = vmatpush1.bf16.msra.mxu1 %v5018_v28  ;;  %v5081_v27 = vcombine.high %v502_v21, %v506_v22  ;;  %v5083_v28 = vcombine.high %v503_v23, %v507_v24  ;;  %v550_v21 = vld [vmem:[#allocation5 + $0xe50] sm:$0xff] }
 0x1d9   :  { %3718 = vmatprep.subr.bf16.mxu0 %v5025_v30  ;;  %3930 = vmatprep.subr.bf16.mxu1 %v5027_v61  ;;  %v510_v30 = vld [vmem:[#allocation5 + $0xd10] sm:$0xff] }
 0x1da   :  { %v514_v61 = vld [vmem:[#allocation5 + $0xd30] sm:$0xff] }
 0x1db   :  { %v5089_v34 = vcombine.high %v510_v30, %v514_v61  ;;  %v5088_v42 = vcombine.low %v510_v30, %v514_v61  ;;  %v554_v22 = vld [vmem:[#allocation5 + $0xe70] sm:$0xff] }
 0x1dc   :  { %3719 = vmatpush1.bf16.msra.mxu0 %v5024_v36  ;;  %3931 = vmatpush1.bf16.msra.mxu1 %v5026_v37  ;;  %v5091_v36 = vcombine.high %v511_v31, %v515_v32  ;;  %v518_v37 = vld [vmem:[#allocation5 + $0xd50] sm:$0xff] }
 0x1dd   :  { %3720 = vmatprep.subr.bf16.mxu0 %v5033_v39  ;;  %3932 = vmatprep.subr.bf16.mxu1 %v5035_v41  ;;  %v522_v39 = vld [vmem:[#allocation5 + $0xd70] sm:$0xff]  ;;  %v519_v41 = vld [vmem:[#allocation5 + $0xd58] sm:$0xff] }
 0x1de   :  { %v5099_v44 = vcombine.high %v519_v41, %v523_v6  ;;  %v5096_v51 = vcombine.low %v518_v37, %v522_v39  ;;  %v5098_v15 = vcombine.low %v519_v41, %v523_v6 }
 0x1e0   :  { %3721 = vmatpush1.bf16.msra.mxu0 %v5032_v45  ;;  %3933 = vmatpush1.bf16.msra.mxu1 %v5034_v58  ;;  %v526_v45 = vld [vmem:[#allocation5 + $0xd90] sm:$0xff] }
 0x1e1   :  { %3722 = vmatprep.subr.bf16.mxu0 %v5041_v49  ;;  %3934 = vmatprep.subr.bf16.mxu1 %v5043_v50  ;;  %v530_v58 = vld [vmem:[#allocation5 + $0xdb0] sm:$0xff]  ;;  %v527_v49 = vld [vmem:[#allocation5 + $0xd98] sm:$0xff] }
 0x1e2   :  { %v531_v50 = vld [vmem:[#allocation5 + $0xdb8] sm:$0xff]  ;;  %v5105_v52 = vcombine.high %v526_v45, %v530_v58 }
 0x1e3   :  { %v5106_v5 = vcombine.low %v527_v49, %v531_v50 }
 0x1e4   :  { %3723 = vmatpush1.bf16.msra.mxu0 %v5040_v54  ;;  %3935 = vmatpush1.bf16.msra.mxu1 %v5042_v55  ;;  %v534_v54 = vld [vmem:[#allocation5 + $0xdd0] sm:$0xff] }
 0x1e5   :  { %3724 = vmatprep.subr.bf16.mxu0 %v5049_v57  ;;  %3936 = vmatprep.subr.bf16.mxu1 %v5051_v59  ;;  %v538_v55 = vld [vmem:[#allocation5 + $0xdf0] sm:$0xff] }
 0x1e6   :  { %v5113_v7 = vcombine.high %v534_v54, %v538_v55 }
 0x1e8   :  { %3725 = vmatpush1.bf16.msra.mxu0 %v5048_v0  ;;  %3937 = vmatpush1.bf16.msra.mxu1 %v5050_v1  ;;  %v5104_v0 = vcombine.low %v526_v45, %v530_v58 }
 0x1e9   :  { %3747 = vmatprep.subr.bf16.mxu0 %v5057_v2  ;;  %3959 = vmatprep.subr.bf16.mxu1 %v5059_v4 }
 0x1eb   :  { %3727 = vmatmul.mubr.bf16.vlgmr.msra.gmra.mrb[8].mxu0 %v5463_v3  ;;  %3939 = vmatmul.mubr.bf16.vlgmr.msra.gmra.mrb[8].mxu1 %v5463_v3  ;;  %v5074_v3 = vcombine.low %v495_v17, %v499_v18  ;;  %v547_v17 = vld [vmem:[#allocation5 + $0xe38] sm:$0xff]  ;;  %v5112_v18 = vcombine.low %v534_v54, %v538_v55 }
 0x1ec   :  { %3748 = vmatpush1.bf16.msra.mxu0 %v5056_v10  ;;  %3960 = vmatpush1.bf16.msra.mxu1 %v5058_v11  ;;  %v5115_v11 = vcombine.high %v535_v60, %v539_v25 }
 0x1ed   :  { %3749 = vmatprep.subr.bf16.mxu0 %v5065_v12  ;;  %3961 = vmatprep.subr.bf16.mxu1 %v5067_v35  ;;  %v542_v12 = vld [vmem:[#allocation5 + $0xe10] sm:$0xff] }
 0x1ee   :  { %3736 = vmatprep.mubr.bf16.mxu0 %v5465_v14  ;;  %3948 = vmatprep.mubr.bf16.mxu1 %v5465_v14  ;;  %v5082_v14 = vcombine.low %v503_v23, %v507_v24  ;;  %v546_v35 = vld [vmem:[#allocation5 + $0xe30] sm:$0xff] }
 0x1ef   :  { %v5120_v32 = vcombine.low %v542_v12, %v546_v35 }
 0x1f0   :  { %3750 = vmatpush1.bf16.msra.mxu0 %v5064_v47  ;;  %3962 = vmatpush1.bf16.msra.mxu1 %v5066_v19  ;;  %v5114_v47 = vcombine.low %v535_v60, %v539_v25  ;;  %v5121_v19 = vcombine.high %v542_v12, %v546_v35  ;;  %v5567_v12 = vld [vmem:[#allocation5 + $0xef8] sm:$0xff] }
 0x1f1   :  { %3751 = vmatprep.subr.bf16.mxu0 %v5073_v20  ;;  %3963 = vmatprep.subr.bf16.mxu1 %v5075_v46  ;;  %v5123_v46 = vcombine.high %v543_v16, %v547_v17 }
 0x1f3   :  { %3737 = vmatmul.mubr.bf16.gmra.mrb[12].mxu0 %v5471_v29  ;;  %3949 = vmatmul.mubr.bf16.gmra.mrb[12].mxu1 %v5471_v29  ;;  %v5097_v29 = vcombine.high %v518_v37, %v522_v39  ;;  %v5129_v39 = vcombine.high %v550_v21, %v554_v22 }
 0x1f4   :  { %3752 = vmatpush1.bf16.msra.mxu0 %v5072_v26  ;;  %3964 = vmatpush1.bf16.msra.mxu1 %v5074_v3  ;;  %v551_v3 = vld [vmem:[#allocation5 + $0xe58] sm:$0xff] }
 0x1f5   :  { %3753 = vmatprep.subr.bf16.mxu0 %v5081_v27  ;;  %3965 = vmatprep.subr.bf16.mxu1 %v5083_v28  ;;  %v555_v27 = vld [vmem:[#allocation5 + $0xe78] sm:$0xff] }
 0x1f6   :  { %3779 = vmatprep.mubr.bf16.mxu0 %v5473_v40  ;;  %3991 = vmatprep.mubr.bf16.mxu1 %v5473_v40  ;;  %v5107_v40 = vcombine.high %v527_v49, %v531_v50  ;;  %v559_v49 = vld [vmem:[#allocation5 + $0xe98] sm:$0xff]  ;;  %v5130_v55 = vcombine.low %v551_v3, %v555_v27 }
 0x1f7   :  { %v563_v50 = vld [vmem:[#allocation5 + $0xeb8] sm:$0xff] }
 0x1f8   :  { %3754 = vmatpush1.bf16.msra.mxu0 %v5080_v33  ;;  %3966 = vmatpush1.bf16.msra.mxu1 %v5082_v14  ;;  %v5122_v33 = vcombine.low %v543_v16, %v547_v17  ;;  %v5138_v17 = vcombine.low %v559_v49, %v563_v50 }
 0x1f9   :  { %3755 = vmatprep.subr.bf16.mxu0 %v5089_v34  ;;  %3967 = vmatprep.subr.bf16.mxu1 %v5091_v36 }
 0x1fc   :  { %3756 = vmatpush1.bf16.msra.mxu0 %v5088_v42  ;;  %3968 = vmatpush1.bf16.msra.mxu1 %v5090_v43  ;;  %v5131_v43 = vcombine.high %v551_v3, %v555_v27  ;;  %v5575_v3 = vld [vmem:[#allocation5 + $0xf38] sm:$0xff] }
 0x1fd   :  { %3757 = vmatprep.subr.bf16.mxu0 %v5097_v29  ;;  %3969 = vmatprep.subr.bf16.mxu1 %v5099_v44  ;;  %v558_v29 = vld [vmem:[#allocation5 + $0xe90] sm:$0xff] }
 0x1fe   :  { %v5517_v53 = vpop.f32.mrb[0].mxu0  ;;  %v5519_v57 = vpop.f32.mrb[0].mxu1  ;;  %v562_v44 = vld [vmem:[#allocation5 + $0xeb0] sm:$0xff] }
 0x1ff   :  { %v5521_v59 = vpop.f32.mrb[1].mxu0  ;;  %v5523_v62 = vpop.f32.mrb[1].mxu1  ;;  %v5137_v60 = vcombine.high %v558_v29, %v562_v44  ;;  %v5136_v16 = vcombine.low %v558_v29, %v562_v44  ;;  %v5591_v29 = vld [vmem:[#allocation5 + $0xf78] sm:$0xff]  ;;  %v5593_v44 = vld [vmem:[#allocation5 + $0xf90] sm:$0xff] }
 0x200   :  { %v5525_v63 = vpop.f32.mrb[2].mxu0  ;;  %3758 = vmatpush1.bf16.msra.mxu0 %v5096_v51  ;;  %v5529_v2 = vpop.f32.mrb[2].mxu1  ;;  %3970 = vmatpush1.bf16.msra.mxu1 %v5098_v15 }
 0x201   :  { %v4012_v1 = vadd.f32 %v5525_v63, %v5517_v53  ;;  %v5531_v4 = vpop.f32.mrb[3].mxu0  ;;  %3759 = vmatprep.subr.bf16.mxu0 %v5105_v52  ;;  %v4030_v38 = vadd.f32 %v5529_v2, %v5519_v57  ;;  %v5537_v10 = vpop.f32.mrb[3].mxu1  ;;  %3971 = vmatprep.subr.bf16.mxu1 %v5107_v40  ;;  %v5128_v52 = vcombine.low %v550_v21, %v554_v22 }
 0x202   :  { %v4021_v8 = vadd.f32 %v5531_v4, %v5521_v59  ;;  %v4039_v13 = vadd.f32 %v5537_v10, %v5523_v62 }
 0x204   :  { %3760 = vmatpush1.bf16.msra.mxu0 %v5104_v0  ;;  %3972 = vmatpush1.bf16.msra.mxu1 %v5106_v5  ;;  %v566_v5 = vld [vmem:[#allocation5 + $0xed0] sm:$0xff] }
 0x205   :  { %3761 = vmatprep.subr.bf16.mxu0 %v5113_v7  ;;  %3973 = vmatprep.subr.bf16.mxu1 %v5115_v11  ;;  %v570_v7 = vld [vmem:[#allocation5 + $0xef0] sm:$0xff]  ;;  %v5565_v11 = vld [vmem:[#allocation5 + $0xed8] sm:$0xff] }
 0x206   :  { %v5541_v20 = vpop.f32.mrb[4].mxu0  ;;  %v5544_v24 = vpop.f32.mrb[4].mxu1  ;;  %v5144_v21 = vcombine.low %v566_v5, %v570_v7  ;;  %v5145_v22 = vcombine.high %v566_v5, %v570_v7 }
 0x207   :  { %v4013_v23 = vadd.f32 %v4012_v1, %v5541_v20  ;;  %v5546_v26 = vpop.f32.mrb[5].mxu0  ;;  %v4031_v28 = vadd.f32 %v4030_v38, %v5544_v24  ;;  %v5550_v61 = vpop.f32.mrb[5].mxu1  ;;  %v5139_v1 = vcombine.high %v559_v49, %v563_v50 }
 0x208   :  { %v4022_v30 = vadd.f32 %v4021_v8, %v5546_v26  ;;  %v5552_v31 = vpop.f32.mrb[6].mxu0  ;;  %3762 = vmatpush1.bf16.msra.mxu0 %v5112_v18  ;;  %v4040_v14 = vadd.f32 %v4039_v13, %v5550_v61  ;;  %v5556_v36 = vpop.f32.mrb[6].mxu1  ;;  %3974 = vmatpush1.bf16.msra.mxu1 %v5114_v47  ;;  %v5569_v18 = vld [vmem:[#allocation5 + $0xf10] sm:$0xff] }
 0x209   :  { %v4014_v34 = vadd.f32 %v4013_v23, %v5552_v31  ;;  %v5558_v37 = vpop.f32.mrb[7].mxu0  ;;  %3763 = vmatprep.subr.bf16.mxu0 %v5121_v19  ;;  %v4032_v41 = vadd.f32 %v4031_v28, %v5556_v36  ;;  %v5562_v42 = vpop.f32.mrb[7].mxu1  ;;  %3975 = vmatprep.subr.bf16.mxu1 %v5123_v46  ;;  %v5571_v47 = vld [vmem:[#allocation5 + $0xf30] sm:$0xff]  ;;  %v5573_v23 = vld [vmem:[#allocation5 + $0xf18] sm:$0xff] }
 0x20a   :  { %v4023_v6 = vadd.f32 %v4022_v30, %v5558_v37  ;;  %v4041_v58 = vadd.f32 %v4040_v14, %v5562_v42  ;;  %v5146_v30 = vcombine.low %v5565_v11, %v5567_v12  ;;  %v5583_v14 = vld [vmem:[#allocation5 + $0xf70] sm:$0xff]  ;;  %v5154_v49 = vcombine.low %v5573_v23, %v5575_v3 }
 0x20b   :  { %v4015_v45 = vrot.slane %v4014_v34, 4  ;;  %v4033_v51 = vrot.slane %v4032_v41, 4  ;;  %v5155_v50 = vcombine.high %v5573_v23, %v5575_v3 }
 0x20c   :  { %v4024_v15 = vrot.slane %v4023_v6, 4  ;;  %3764 = vmatpush1.bf16.msra.mxu0 %v5120_v32  ;;  %v4042_v54 = vrot.slane %v4041_v58, 4  ;;  %3976 = vmatpush1.bf16.msra.mxu1 %v5122_v33  ;;  %v5147_v32 = vcombine.high %v5565_v11, %v5567_v12  ;;  %v5581_v33 = vld [vmem:[#allocation5 + $0xf50] sm:$0xff] }
 0x20d   :  { %v4016_v40 = vadd.f32 %v4015_v45, %v4014_v34  ;;  %3765 = vmatprep.subr.bf16.mxu0 %v5129_v39  ;;  %v4034_v25 = vadd.f32 %v4033_v51, %v4032_v41  ;;  %3977 = vmatprep.subr.bf16.mxu1 %v5131_v43  ;;  %v5152_v41 = vcombine.low %v5569_v18, %v5571_v47  ;;  %v5589_v43 = vld [vmem:[#allocation5 + $0xf58] sm:$0xff]  ;;  %v5599_v51 = vld [vmem:[#allocation5 + $0xfb0] sm:$0xff] }
 0x20e   :  { %v4025_v0 = vadd.f32 %v4024_v15, %v4023_v6  ;;  %v4043_v8 = vadd.f32 %v4042_v54, %v4041_v58  ;;  %v5153_v6 = vcombine.high %v5569_v18, %v5571_v47  ;;  %v5601_v15 = vld [vmem:[#allocation5 + $0xf98] sm:$0xff]  ;;  %v5163_v5 = vcombine.high %v5589_v43, %v5591_v29  ;;  %v5619_v12 = vld [vmem:[#allocation5 + $0xfd0] sm:$0xff] }
 0x20f   :  { %v4017_v38 = vrot.slane %v4016_v40, 2  ;;  %v4035_v35 = vrot.slane %v4034_v25, 2  ;;  %v5623_v18 = vld [vmem:[#allocation5 + $0xff0] sm:$0xff]  ;;  %v5625_v47 = vld [vmem:[#allocation5 + $0xfd8] sm:$0xff] }
 0x210   :  { %v4026_v13 = vrot.slane %v4025_v0, 2  ;;  %3766 = vmatpush1.bf16.msra.mxu0 %v5128_v52  ;;  %v4044_v46 = vrot.slane %v4043_v8, 2  ;;  %3978 = vmatpush1.bf16.msra.mxu1 %v5130_v55  ;;  %v5603_v52 = vld [vmem:[#allocation5 + $0xfb8] sm:$0xff]  ;;  %v5160_v55 = vcombine.low %v5581_v33, %v5583_v14 }
 0x211   :  { %v4018_v19 = vadd.f32 %v4017_v38, %v4016_v40  ;;  %3767 = vmatprep.subr.bf16.mxu0 %v5137_v60  ;;  %v4036_v27 = vadd.f32 %v4035_v35, %v4034_v25  ;;  %3979 = vmatprep.subr.bf16.mxu1 %v5139_v1  ;;  %v5161_v60 = vcombine.high %v5581_v33, %v5583_v14 }
 0x212   :  { %v4027_v28 = vadd.f32 %v4026_v13, %v4025_v0  ;;  %v4045_v39 = vadd.f32 %v4044_v46, %v4043_v8  ;;  %v5162_v1 = vcombine.low %v5589_v43, %v5591_v29  ;;  %v5168_v38 = vcombine.low %v5593_v44, %v5599_v51 }
 0x213   :  { %v4019_v34 = vrot.slane %v4018_v19, 1  ;;  %v4037_v45 = vrot.slane %v4036_v27, 1  ;;  %v5169_v8 = vcombine.high %v5593_v44, %v5599_v51  ;;  %v5170_v11 = vcombine.low %v5601_v15, %v5603_v52 }
 0x214   :  { %v4028_v58 = vrot.slane %v4027_v28, 1  ;;  %3768 = vmatpush1.bf16.msra.mxu0 %v5136_v16  ;;  %v4046_v54 = vrot.slane %v4045_v39, 1  ;;  %3980 = vmatpush1.bf16.msra.mxu1 %v5138_v17  ;;  %v5171_v17 = vcombine.high %v5601_v15, %v5603_v52 }
 0x215   :  { %v4020_v40 = vadd.f32 %v4019_v34, %v4018_v19  ;;  %3769 = vmatprep.subr.bf16.mxu0 %v5145_v22  ;;  %v4038_v25 = vadd.f32 %v4037_v45, %v4036_v27  ;;  %3981 = vmatprep.subr.bf16.mxu1 %v5147_v32  ;;  %v5627_v19 = vld [vmem:[#allocation5 + $0xff8] sm:$0xff] }
 0x216   :  { %v4029_v0 = vadd.f32 %v4028_v58, %v4027_v28  ;;  %v4047_v16 = vadd.f32 %v4046_v54, %v4045_v39 }
 0x217   :  { %v4084_v7 = vmul.f32 0.03125, %v4020_v40  ;;  %v4086_v35 = vmul.f32 0.03125, %v4038_v25 }
 0x218   :  { %v4085_v13 = vmul.f32 0.03125, %v4029_v0  ;;  %3770 = vmatpush1.bf16.msra.mxu0 %v5144_v21  ;;  %3982 = vmatpush1.bf16.msra.mxu1 %v5146_v30  ;;  %v4087_v29 = vmul.f32 0.03125, %v4047_v16 }
 0x219   :  { %v5630_v46 = vsub.f32 %v5517_v53, %v4084_v7  ;;  %v5633_v22 = vsub.f32 %v5525_v63, %v4084_v7  ;;  %v5636_v23 = vsub.f32 %v5541_v20, %v4084_v7  ;;  %v5639_v21 = vsub.f32 %v5552_v31, %v4084_v7  ;;  %3771 = vmatprep.subr.bf16.mxu0 %v5153_v6 }
 0x21a   :  { %v5642_v3 = vsub.f32 %v5519_v57, %v4086_v35  ;;  %v5645_v27 = vsub.f32 %v5529_v2, %v4086_v35  ;;  %v5648_v28 = vsub.f32 %v5544_v24, %v4086_v35  ;;  %v5651_v53 = vsub.f32 %v5556_v36, %v4086_v35  ;;  %3983 = vmatprep.subr.bf16.mxu1 %v5155_v50 }
 0x21b   :  { %v4124_v63 = vmul.f32 %v5630_v46, %v5630_v46  ;;  %v4132_v20 = vmul.f32 %v5633_v22, %v5633_v22  ;;  %v5177_v57 = vcombine.high %v5619_v12, %v5623_v18  ;;  %v5179_v2 = vcombine.high %v5625_v47, %v5627_v19 }
 0x21c   :  { %v4140_v24 = vmul.f32 %v5636_v23, %v5636_v23  ;;  %v4148_v31 = vmul.f32 %v5639_v21, %v5639_v21  ;;  %v4126_v36 = vmul.f32 %v5642_v3, %v5642_v3  ;;  %v4134_v30 = vmul.f32 %v5645_v27, %v5645_v27  ;;  %3772 = vmatpush1.bf16.msra.mxu0 %v5152_v41 }
 0x21d   :  { %v4156_v32 = vadd.f32 %v4132_v20, %v4124_v63  ;;  %v5670_v33 = vsub.f32 %v5521_v59, %v4085_v13  ;;  %v5673_v14 = vsub.f32 %v5531_v4, %v4085_v13  ;;  %v5676_v34 = vsub.f32 %v5546_v26, %v4085_v13  ;;  %3984 = vmatpush1.bf16.msra.mxu1 %v5154_v49 }
 0x21e   :  { %v4142_v39 = vmul.f32 %v5648_v28, %v5648_v28  ;;  %v4174_v6 = vadd.f32 %v4134_v30, %v4126_v36  ;;  %v5681_v43 = vsub.f32 %v5558_v37, %v4085_v13  ;;  %3773 = vmatprep.subr.bf16.mxu0 %v5161_v60  ;;  %3985 = vmatprep.subr.bf16.mxu1 %v5163_v5 }
 0x21f   :  { %v4157_v41 = vadd.f32 %v4156_v32, %v4140_v24  ;;  %v4150_v59 = vmul.f32 %v5651_v53, %v5651_v53  ;;  %v4125_v4 = vmul.f32 %v5670_v33, %v5670_v33  ;;  %v4133_v26 = vmul.f32 %v5673_v14, %v5673_v14 }
 0x220   :  { %v4175_v45 = vadd.f32 %v4174_v6, %v4142_v39  ;;  %v4141_v58 = vmul.f32 %v5676_v34, %v5676_v34  ;;  %v5692_v37 = vsub.f32 %v5523_v62, %v4087_v29  ;;  %v5695_v49 = vsub.f32 %v5537_v10, %v4087_v29  ;;  %3774 = vmatpush1.bf16.msra.mxu0 %v5160_v55 }
 0x221   :  { %v4158_v50 = vadd.f32 %v4157_v41, %v4148_v31  ;;  %v4165_v40 = vadd.f32 %v4133_v26, %v4125_v4  ;;  %v5698_v54 = vsub.f32 %v5550_v61, %v4087_v29  ;;  %v5701_v60 = vsub.f32 %v5562_v42, %v4087_v29  ;;  %3986 = vmatpush1.bf16.msra.mxu1 %v5162_v1 }
 0x222   :  { %v4176_v25 = vadd.f32 %v4175_v45, %v4150_v59  ;;  %v4127_v0 = vmul.f32 %v5692_v37, %v5692_v37  ;;  %v4135_v62 = vmul.f32 %v5695_v49, %v5695_v49  ;;  %3775 = vmatprep.subr.bf16.mxu0 %v5169_v8  ;;  %3987 = vmatprep.subr.bf16.mxu1 %v5171_v17 }
 0x223   :  { %v4159_v10 = vrot.slane %v4158_v50, 4  ;;  %v4149_v55 = vmul.f32 %v5681_v43, %v5681_v43  ;;  %v4166_v5 = vadd.f32 %v4165_v40, %v4141_v58  ;;  %v4143_v42 = vmul.f32 %v5698_v54, %v5698_v54 }
 0x224   :  { %v4177_v61 = vrot.slane %v4176_v25, 4  ;;  %v4183_v7 = vadd.f32 %v4135_v62, %v4127_v0  ;;  %3776 = vmatpush1.bf16.msra.mxu0 %v5168_v38  ;;  %v5176_v1 = vcombine.low %v5619_v12, %v5623_v18  ;;  %v5178_v13 = vcombine.low %v5625_v47, %v5627_v19 }
 0x225   :  { %v4160_v35 = vadd.f32 %v4159_v10, %v4158_v50  ;;  %v4167_v8 = vadd.f32 %v4166_v5, %v4149_v55  ;;  %3988 = vmatpush1.bf16.msra.mxu1 %v5170_v11  ;;  %3777 = vmatprep.subr.bf16.mxu0 %v5177_v57  ;;  %v4151_v17 = vmul.f32 %v5701_v60, %v5701_v60  ;;  %v5378_v50 = vmov 1983009808  }
 0x226   :  { %v4178_v16 = vadd.f32 %v4177_v61, %v4176_v25  ;;  %v4184_v63 = vadd.f32 %v4183_v7, %v4143_v42  ;;  %3989 = vmatprep.subr.bf16.mxu1 %v5179_v2  ;;  %v4269_v40 = vunpack.c.l.s4 %v5378_v50  ;;  %v4271_v25 = vlaneseq }
 0x227   :  { %v4161_v44 = vrot.slane %v4160_v35, 2  ;;  %v4168_v51 = vrot.slane %v4167_v8, 4 }
 0x228   :  { %v4179_v38 = vrot.slane %v4178_v16, 2  ;;  %v4185_v12 = vadd.f32 %v4184_v63, %v4151_v17  ;;  %3778 = vmatpush1.bf16.msra.mxu0 %v5176_v1  ;;  %v4270_v0 = vunpack.c.0.s8 %v4269_v40  ;;  %v5729_v62 = vshrl.u32 %v4271_v25, 7  ;;  %v4314_v40 = vld [vmem:[#allocation2 + $0x40] sm:$0xff]  ;;  %v4315_v25 = vld [vmem:[#allocation2 + $0x48] sm:$0xff] }
 0x229   :  { %v4162_v18 = vadd.f32 %v4161_v44, %v4160_v35  ;;  %v4169_v20 = vadd.f32 %v4168_v51, %v4167_v8  ;;  %3990 = vmatpush1.bf16.msra.mxu1 %v5178_v13  ;;  %v4240_v13 = vld [vmem:[%s5981_s2] sm:$0xff] }
 0x22a   :  { %v4180_v15 = vadd.f32 %v4179_v38, %v4178_v16  ;;  %v4186_v52 = vrot.slane %v4185_v12, 4  ;;  %v5732_v5 = vsub.s32 %v4270_v0, %v5729_v62  ;;  %v5737_v8 = vsub.s32 0, %v5729_v62  ;;  %v4316_v0 = vld [vmem:[#allocation2 + $0x50] sm:$0xff] }
 0x22b   :  { %v4163_v11 = vrot.slane %v4162_v18, 1  ;;  %v4170_v57 = vrot.slane %v4169_v20, 2  ;;  %3780 = vmatmul.mubr.bf16.vlgmr.msra.gmra.mrb[8].mxu0 %v5479_v48  ;;  %v5743_v16 = vsub.s32 1, %v5729_v62  ;;  %v4484_v17 = vsub.s32 3, %v5729_v62 }
 0x22c   :  { %v4181_v47 = vrot.slane %v4180_v15, 1  ;;  %v4187_v19 = vadd.f32 %v4186_v52, %v4185_v12  ;;  %3992 = vmatmul.mubr.bf16.vlgmr.msra.gmra.mrb[8].mxu1 %v5479_v48  ;;  %3789 = vmatprep.mubr.bf16.mxu0 %v5481_v56  ;;  %v4488_v63 = vsub.s32 5, %v5729_v62  ;;  %v4492_v44 = vsub.s32 7, %v5729_v62 }
 0x22d   :  { %v4164_v2 = vadd.f32 %v4163_v11, %v4162_v18  ;;  %v4171_v24 = vadd.f32 %v4170_v57, %v4169_v20  ;;  %4001 = vmatprep.mubr.bf16.mxu1 %v5481_v56  ;;  %v4346_v38 = vsub.s32 2, %v5729_v62  ;;  %v4350_v12 = vsub.s32 4, %v5729_v62 }
 0x22e   :  { %v4182_v31 = vadd.f32 %v4181_v47, %v4180_v15  ;;  %v4188_v36 = vrot.slane %v4187_v19, 2  ;;  %v4354_v18 = vsub.s32 6, %v5729_v62  ;;  %v4481_v15 = vrot.slane %v4240_v13, %v5743_v16 }
 0x22f   :  { %v4228_v30 = vmul.f32 0.03125, %v4164_v2  ;;  %v4172_v32 = vrot.slane %v4171_v24, 1  ;;  %v4485_v52 = vrot.slane %v4240_v13, %v4484_v17  ;;  %v4489_v11 = vrot.slane %v4240_v13, %v4488_v63 }
 0x230   :  { %v4230_v39 = vmul.f32 0.03125, %v4182_v31  ;;  %v4189_v6 = vadd.f32 %v4188_v36, %v4187_v19  ;;  %v4493_v57 = vrot.slane %v4240_v13, %v4492_v44 }
 0x231   :  { %v4242_v29 = vadd.f32 0.001, %v4228_v30  ;;  %v4173_v41 = vadd.f32 %v4172_v32, %v4171_v24 }
 0x232   :  { %v4190_v59 = vrot.slane %v4189_v6, 1  ;;  %v4244_v26 = vadd.f32 0.001, %v4230_v39  ;;  %v4306_v39 = vld [vmem:[#allocation2] sm:$0xff] }
 0x233   :  { %v4229_v4 = vmul.f32 0.03125, %v4173_v41  ;;  %3790 = vmatmul.mubr.bf16.gmra.mrb[12].mxu0 %v5487_v9  ;;  %5284 = vrsqrt.f32 %v4242_v29  ;;  %v5773_v29 = vrot.slane %v4485_v52, %v5743_v16  ;;  %v5776_v41 = vrot.slane %v4489_v11, %v5743_v16 }
 0x234   :  { %v4191_v48 = vadd.f32 %v4190_v59, %v4189_v6  ;;  %4002 = vmatmul.mubr.bf16.gmra.mrb[12].mxu1 %v5487_v9  ;;  %v5770_v6 = vrot.slane %v4481_v15, %v5743_v16  ;;  %v5779_v59 = vrot.slane %v4493_v57, %v5743_v16  ;;  %v4332_v15 = vld [vmem:[#allocation2 + $0xd0] sm:$0xff] }
 0x235   :  { %v4243_v45 = vadd.f32 0.001, %v4229_v4  ;;  %v4307_v4 = vld [vmem:[#allocation2 + $0x8] sm:$0xff] }
 0x236   :  { %v4231_v58 = vmul.f32 0.03125, %v4191_v48  ;;  %v4309_v48 = vld [vmem:[#allocation2 + $0x18] sm:$0xff] }
 0x237   :  { %5286 = vrsqrt.f32 %v4243_v45 }
 0x238   :  { %5288 = vrsqrt.f32 %v4244_v26  ;;  %v4245_v56 = vadd.f32 0.001, %v4231_v58  ;;  %v4308_v26 = vld [vmem:[#allocation2 + $0x10] sm:$0xff] }
 0x23a   :  { %5290 = vrsqrt.f32 %v4245_v56 }
 0x23d   :  { %v5285_v10 = vpop.eup %5284 }
 0x241   :  { %v5287_v55 = vpop.eup %5286 }
 0x242   :  { %v5289_v61 = vpop.eup %5288  ;;  %v4266_v9 = vcombine.low %v5285_v10, %v5287_v55 }
 0x244   :  { %v5291_v42 = vpop.eup %5290  ;;  %v4274_v1 = vrot.slane %v4266_v9, %v5732_v5 }
 0x245   :  { %v4267_v7 = vcombine.low %v5289_v61, %v5291_v42  ;;  %v4317_v42 = vld [vmem:[#allocation2 + $0x58] sm:$0xff] }
 0x247   :  { %v4281_v35 = vrot.slane %v4267_v7, %v5732_v5  ;;  %v4322_v7 = vld [vmem:[#allocation2 + $0x80] sm:$0xff] }
 0x249   :  { %v4282_v51 = vcombine.low %v4274_v1, %v4281_v35  ;;  %v4324_v35 = vld [vmem:[#allocation2 + $0x90] sm:$0xff] }
 0x24b   :  { %v4302_v20 = vmul.f32 %v4282_v51, %v4240_v13  ;;  %v4325_v13 = vld [vmem:[#allocation2 + $0x98] sm:$0xff] }
 0x24d   :  { %v4343_v47 = vrot.slane %v4302_v20, %v5737_v8  ;;  %v4347_v19 = vrot.slane %v4302_v20, %v4346_v38  ;;  %v4351_v2 = vrot.slane %v4302_v20, %v4350_v12  ;;  %v4355_v24 = vrot.slane %v4302_v20, %v4354_v18  ;;  %v4331_v20 = vld [vmem:[#allocation2 + $0xc8] sm:$0xff] }
 0x24f   :  { %v4383_v31 = vrot.slane %v4343_v47, %v5737_v8  ;;  %v4387_v36 = vrot.slane %v4347_v19, %v5737_v8  ;;  %v4391_v30 = vrot.slane %v4351_v2, %v5737_v8  ;;  %v4395_v32 = vrot.slane %v4355_v24, %v5737_v8 }
 0x251   :  { %v4412_v45 = vmul.f32 %v4383_v31, %v5630_v46  ;;  %v4413_v58 = vmul.f32 %v4387_v36, %v5670_v33  ;;  %v4414_v56 = vmul.f32 %v4391_v30, %v5642_v3  ;;  %v4415_v50 = vmul.f32 %v4395_v32, %v5692_v37  ;;  %v4323_v46 = vld [vmem:[#allocation2 + $0x88] sm:$0xff] }
 0x252   :  { %v4420_v10 = vmul.f32 %v4383_v31, %v5633_v22  ;;  %v4421_v55 = vmul.f32 %v4387_v36, %v5673_v14  ;;  %v4422_v61 = vmul.f32 %v4391_v30, %v5645_v27  ;;  %v4423_v9 = vmul.f32 %v4395_v32, %v5695_v49  ;;  %v4330_v22 = vld [vmem:[#allocation2 + $0xc0] sm:$0xff] }
 0x253   :  { %v4428_v33 = vmul.f32 %v4383_v31, %v5636_v23  ;;  %v4429_v3 = vmul.f32 %v4387_v36, %v5676_v34  ;;  %v4430_v37 = vmul.f32 %v4391_v30, %v5648_v28  ;;  %v4431_v1 = vmul.f32 %v4395_v32, %v5698_v54  ;;  %v4333_v23 = vld [vmem:[#allocation2 + $0xd8] sm:$0xff] }
 0x254   :  { %v4436_v14 = vmul.f32 %v4383_v31, %v5639_v21  ;;  %v4437_v27 = vmul.f32 %v4387_v36, %v5681_v43  ;;  %v4438_v49 = vmul.f32 %v4391_v30, %v5651_v53  ;;  %v4439_v51 = vmul.f32 %v4395_v32, %v5701_v60 }
 0x255   :  { %v4444_v52 = vadd.f32 %v4412_v45, %v4306_v39  ;;  %v4445_v34 = vadd.f32 %v4413_v58, %v4307_v4  ;;  %v4446_v11 = vadd.f32 %v4414_v56, %v4308_v26  ;;  %v4447_v28 = vadd.f32 %v4415_v50, %v4309_v48 }
 0x256   :  { %v4452_v57 = vadd.f32 %v4420_v10, %v4314_v40  ;;  %v4453_v54 = vadd.f32 %v4421_v55, %v4315_v25  ;;  %v4454_v47 = vadd.f32 %v4422_v61, %v4316_v0  ;;  %v4455_v19 = vadd.f32 %v4423_v9, %v4317_v42 }
 0x257   :  { %v4460_v2 = vadd.f32 %v4428_v33, %v4322_v7  ;;  %v4461_v24 = vadd.f32 %v4429_v3, %v4323_v46  ;;  %v4462_v21 = vadd.f32 %v4430_v37, %v4324_v35  ;;  %v4463_v31 = vadd.f32 %v4431_v1, %v4325_v13 }
 0x258   :  { %v4468_v43 = vadd.f32 %v4436_v14, %v4330_v22  ;;  %v4469_v36 = vadd.f32 %v4437_v27, %v4331_v20  ;;  %v4470_v53 = vadd.f32 %v4438_v49, %v4332_v15  ;;  %v4471_v30 = vadd.f32 %v4439_v51, %v4333_v23 }
 0x259   :  { %v4550_v60 = vadd.f32 %v5770_v6, %v4444_v52  ;;  %v4551_v32 = vadd.f32 %v5773_v29, %v4445_v34  ;;  %v4552_v39 = vadd.f32 %v5776_v41, %v4446_v11  ;;  %v4553_v4 = vadd.f32 %v5779_v59, %v4447_v28 }
 0x25a   :  { %v4558_v26 = vadd.f32 %v5770_v6, %v4452_v57  ;;  %v4559_v48 = vadd.f32 %v5773_v29, %v4453_v54  ;;  %v4560_v45 = vadd.f32 %v5776_v41, %v4454_v47  ;;  %v4561_v58 = vadd.f32 %v5779_v59, %v4455_v19 }
 0x25b   :  { %v4566_v56 = vadd.f32 %v5770_v6, %v4460_v2  ;;  %v4567_v50 = vadd.f32 %v5773_v29, %v4461_v24  ;;  %v4568_v40 = vadd.f32 %v5776_v41, %v4462_v21  ;;  %v4569_v25 = vadd.f32 %v5779_v59, %v4463_v31 }
 0x25c   :  { %v4574_v0 = vadd.f32 %v5770_v6, %v4468_v43  ;;  %v4575_v10 = vadd.f32 %v5773_v29, %v4469_v36  ;;  %v4576_v55 = vadd.f32 %v5776_v41, %v4470_v53  ;;  %v4577_v61 = vadd.f32 %v5779_v59, %v4471_v30 }
 0x25d   :  { %v4582_v9 = vmax.f32 %v4550_v60, 0.0  ;;  %v4583_v42 = vmax.f32 %v4551_v32, 0.0  ;;  %v4584_v7 = vmax.f32 %v4552_v39, 0.0  ;;  %v4585_v46 = vmax.f32 %v4553_v4, 0.0 }
 0x25e   :  { %v4590_v33 = vmax.f32 %v4558_v26, 0.0  ;;  %v4591_v3 = vmax.f32 %v4559_v48, 0.0  ;;  %v4592_v37 = vmax.f32 %v4560_v45, 0.0  ;;  %v4593_v1 = vmax.f32 %v4561_v58, 0.0 }
 0x25f   :  { %v4598_v35 = vmax.f32 %v4566_v56, 0.0  ;;  %v4599_v13 = vmax.f32 %v4567_v50, 0.0  ;;  %v4600_v22 = vmax.f32 %v4568_v40, 0.0  ;;  %v4601_v14 = vmax.f32 %v4569_v25, 0.0  ;;  %4614 = vst [vmem:[#allocation7] sm:$0xff] %v4582_v9  ;;  %4615 = vst [vmem:[#allocation7 + $0x8] sm:$0xff] %v4583_v42 }
 0x260   :  { %4616 = vst [vmem:[#allocation7 + $0x10] sm:$0xff] %v4584_v7  ;;  %4617 = vst [vmem:[#allocation7 + $0x18] sm:$0xff] %v4585_v46  ;;  %v4606_v6 = vmax.f32 %v4574_v0, 0.0  ;;  %v4607_v29 = vmax.f32 %v4575_v10, 0.0  ;;  %v4608_v41 = vmax.f32 %v4576_v55, 0.0  ;;  %v4609_v59 = vmax.f32 %v4577_v61, 0.0 }
 0x261   :  { %4622 = vst [vmem:[#allocation7 + $0x40] sm:$0xff] %v4590_v33  ;;  %4623 = vst [vmem:[#allocation7 + $0x48] sm:$0xff] %v4591_v3 }
 0x262   :  { %4624 = vst [vmem:[#allocation7 + $0x50] sm:$0xff] %v4592_v37  ;;  %4625 = vst [vmem:[#allocation7 + $0x58] sm:$0xff] %v4593_v1 }
 0x263   :  { %4630 = vst [vmem:[#allocation7 + $0x80] sm:$0xff] %v4598_v35  ;;  %4631 = vst [vmem:[#allocation7 + $0x88] sm:$0xff] %v4599_v13 }
 0x264   :  { %4632 = vst [vmem:[#allocation7 + $0x90] sm:$0xff] %v4600_v22  ;;  %4633 = vst [vmem:[#allocation7 + $0x98] sm:$0xff] %v4601_v14 }
 0x265   :  { %4638 = vst [vmem:[#allocation7 + $0xc0] sm:$0xff] %v4606_v6  ;;  %4639 = vst [vmem:[#allocation7 + $0xc8] sm:$0xff] %v4607_v29 }
 0x266   :  { %4640 = vst [vmem:[#allocation7 + $0xd0] sm:$0xff] %v4608_v41  ;;  %4641 = vst [vmem:[#allocation7 + $0xd8] sm:$0xff] %v4609_v59 }
 0x2fe   :  { %v3781_v27 = vpop.f32.mrb[8].mxu0 }
 0x2ff   :  { %v3993_v49 = vpop.f32.mrb[8].mxu1  ;;  %v5813_v51 = vpop.f32.mrb[9].mxu0 }
 0x300   :  { %v5815_v20 = vpop.f32.mrb[9].mxu1  ;;  %v3785_v15 = vpop.f32.mrb[10].mxu0 }
 0x301   :  { %v4048_v23 = vadd.f32 %v3785_v15, %v3781_v27  ;;  %v3997_v52 = vpop.f32.mrb[10].mxu1  ;;  %v5817_v34 = vpop.f32.mrb[11].mxu0 }
 0x302   :  { %v4066_v11 = vadd.f32 %v3997_v52, %v3993_v49  ;;  %v4057_v28 = vadd.f32 %v5817_v34, %v5813_v51  ;;  %v5821_v57 = vpop.f32.mrb[11].mxu1 }
 0x303   :  { %v4075_v54 = vadd.f32 %v5821_v57, %v5815_v20 }
 0x306   :  { %v3791_v47 = vpop.f32.mrb[12].mxu0 }
 0x307   :  { %v4049_v19 = vadd.f32 %v4048_v23, %v3791_v47  ;;  %v4003_v2 = vpop.f32.mrb[12].mxu1  ;;  %v3793_v24 = vpop.f32.mrb[13].mxu0 }
 0x308   :  { %v4067_v21 = vadd.f32 %v4066_v11, %v4003_v2  ;;  %v4058_v31 = vadd.f32 %v4057_v28, %v3793_v24  ;;  %v5825_v43 = vpop.f32.mrb[13].mxu1  ;;  %v3795_v36 = vpop.f32.mrb[14].mxu0 }
 0x309   :  { %v4076_v53 = vadd.f32 %v4075_v54, %v5825_v43  ;;  %v4050_v30 = vadd.f32 %v4049_v19, %v3795_v36  ;;  %v4007_v60 = vpop.f32.mrb[14].mxu1  ;;  %v3797_v32 = vpop.f32.mrb[15].mxu0 }
 0x30a   :  { %v4068_v39 = vadd.f32 %v4067_v21, %v4007_v60  ;;  %v4059_v4 = vadd.f32 %v4058_v31, %v3797_v32  ;;  %v4009_v26 = vpop.f32.mrb[15].mxu1 }
 0x30b   :  { %v4051_v48 = vrot.slane %v4050_v30, 4  ;;  %v4077_v45 = vadd.f32 %v4076_v53, %v4009_v26 }
 0x30c   :  { %v4069_v58 = vrot.slane %v4068_v39, 4  ;;  %v4060_v56 = vrot.slane %v4059_v4, 4 }
 0x30d   :  { %v4052_v50 = vadd.f32 %v4051_v48, %v4050_v30  ;;  %v4078_v40 = vrot.slane %v4077_v45, 4 }
 0x30e   :  { %v4070_v25 = vadd.f32 %v4069_v58, %v4068_v39  ;;  %v4061_v0 = vadd.f32 %v4060_v56, %v4059_v4 }
 0x30f   :  { %v4053_v10 = vrot.slane %v4052_v50, 2  ;;  %v4079_v55 = vadd.f32 %v4078_v40, %v4077_v45 }
 0x310   :  { %v4071_v61 = vrot.slane %v4070_v25, 2  ;;  %v4062_v9 = vrot.slane %v4061_v0, 2 }
 0x311   :  { %v4054_v42 = vadd.f32 %v4053_v10, %v4052_v50  ;;  %v4080_v7 = vrot.slane %v4079_v55, 2 }
 0x312   :  { %v4072_v46 = vadd.f32 %v4071_v61, %v4070_v25  ;;  %v4063_v33 = vadd.f32 %v4062_v9, %v4061_v0 }
 0x313   :  { %v4055_v3 = vrot.slane %v4054_v42, 1  ;;  %v4081_v37 = vadd.f32 %v4080_v7, %v4079_v55 }
 0x314   :  { %v4073_v1 = vrot.slane %v4072_v46, 1  ;;  %v4064_v35 = vrot.slane %v4063_v33, 1 }
 0x315   :  { %v4056_v13 = vadd.f32 %v4055_v3, %v4054_v42  ;;  %v4082_v22 = vrot.slane %v4081_v37, 1 }
 0x316   :  { %v4074_v14 = vadd.f32 %v4073_v1, %v4072_v46  ;;  %v4065_v6 = vadd.f32 %v4064_v35, %v4063_v33 }
 0x317   :  { %v4088_v29 = vmul.f32 0.03125, %v4056_v13  ;;  %v4083_v23 = vadd.f32 %v4082_v22, %v4081_v37 }
 0x318   :  { %v4090_v41 = vmul.f32 0.03125, %v4074_v14  ;;  %v4089_v59 = vmul.f32 0.03125, %v4065_v6 }
 0x319   :  { %v5828_v11 = vsub.f32 %v3781_v27, %v4088_v29  ;;  %v5830_v28 = vsub.f32 %v3785_v15, %v4088_v29  ;;  %v5832_v54 = vsub.f32 %v3791_v47, %v4088_v29  ;;  %v5834_v19 = vsub.f32 %v3795_v36, %v4088_v29 }
 0x31a   :  { %v5836_v21 = vsub.f32 %v3993_v49, %v4090_v41  ;;  %v5838_v31 = vsub.f32 %v3997_v52, %v4090_v41  ;;  %v5840_v53 = vsub.f32 %v4003_v2, %v4090_v41  ;;  %v5842_v30 = vsub.f32 %v4007_v60, %v4090_v41 }
 0x31b   :  { %v4128_v39 = vmul.f32 %v5828_v11, %v5828_v11  ;;  %v4136_v27 = vmul.f32 %v5830_v28, %v5830_v28  ;;  %v4144_v15 = vmul.f32 %v5832_v54, %v5832_v54  ;;  %v4152_v47 = vmul.f32 %v5834_v19, %v5834_v19 }
 0x31c   :  { %v4130_v49 = vmul.f32 %v5836_v21, %v5836_v21  ;;  %v4138_v52 = vmul.f32 %v5838_v31, %v5838_v31  ;;  %v5857_v36 = vsub.f32 %v5813_v51, %v4089_v59  ;;  %v5860_v60 = vsub.f32 %v5817_v34, %v4089_v59 }
 0x31d   :  { %v4192_v2 = vadd.f32 %v4136_v27, %v4128_v39  ;;  %v5862_v4 = vsub.f32 %v3793_v24, %v4089_v59  ;;  %v4146_v48 = vmul.f32 %v5840_v53, %v5840_v53  ;;  %v5866_v58 = vsub.f32 %v3797_v32, %v4089_v59 }
 0x31e   :  { %v4210_v45 = vadd.f32 %v4138_v52, %v4130_v49  ;;  %v4091_v56 = vmul.f32 0.03125, %v4083_v23  ;;  %v4154_v40 = vmul.f32 %v5842_v30, %v5842_v30  ;;  %v4129_v51 = vmul.f32 %v5857_v36, %v5857_v36 }
 0x31f   :  { %v4193_v50 = vadd.f32 %v4192_v2, %v4144_v15  ;;  %v4137_v34 = vmul.f32 %v5860_v60, %v5860_v60  ;;  %v4145_v24 = vmul.f32 %v5862_v4, %v5862_v4 }
 0x320   :  { %v4211_v25 = vadd.f32 %v4210_v45, %v4146_v48  ;;  %v5877_v0 = vsub.f32 %v5815_v20, %v4091_v56  ;;  %v5880_v32 = vsub.f32 %v5821_v57, %v4091_v56  ;;  %v5883_v61 = vsub.f32 %v5825_v43, %v4091_v56 }
 0x321   :  { %v4194_v10 = vadd.f32 %v4193_v50, %v4152_v47  ;;  %v4201_v55 = vadd.f32 %v4137_v34, %v4129_v51  ;;  %v5885_v9 = vsub.f32 %v4009_v26, %v4091_v56  ;;  %v4153_v20 = vmul.f32 %v5866_v58, %v5866_v58 }
 0x322   :  { %v4212_v42 = vadd.f32 %v4211_v25, %v4154_v40  ;;  %v4131_v7 = vmul.f32 %v5877_v0, %v5877_v0  ;;  %v4139_v46 = vmul.f32 %v5880_v32, %v5880_v32  ;;  %v4147_v37 = vmul.f32 %v5883_v61, %v5883_v61 }
 0x323   :  { %v4195_v33 = vrot.slane %v4194_v10, 4  ;;  %v4202_v57 = vadd.f32 %v4201_v55, %v4145_v24  ;;  %v4155_v13 = vmul.f32 %v5885_v9, %v5885_v9 }
 0x324   :  { %v4213_v3 = vrot.slane %v4212_v42, 4  ;;  %v4219_v43 = vadd.f32 %v4139_v46, %v4131_v7 }
 0x325   :  { %v4196_v1 = vadd.f32 %v4195_v33, %v4194_v10  ;;  %v4203_v26 = vadd.f32 %v4202_v57, %v4153_v20 }
 0x326   :  { %v4214_v35 = vadd.f32 %v4213_v3, %v4212_v42  ;;  %v4220_v22 = vadd.f32 %v4219_v43, %v4147_v37 }
 0x327   :  { %v4197_v14 = vrot.slane %v4196_v1, 2  ;;  %v4204_v6 = vrot.slane %v4203_v26, 4 }
 0x328   :  { %v4215_v29 = vrot.slane %v4214_v35, 2  ;;  %v4221_v41 = vadd.f32 %v4220_v22, %v4155_v13  ;;  %v4241_v22 = vld [vmem:[%s5981_s2 + $0x8] sm:$0xff]  ;;  %s5379_s2 = smov [#allocation7]  }
 0x329   :  { %v4198_v59 = vadd.f32 %v4197_v14, %v4196_v1  ;;  %v4205_v23 = vadd.f32 %v4204_v6, %v4203_v26  ;;  %s4651_s15 = sshll.u32 %s5379_s2, 4  ;;  %s4652_s15 = int_to_ptr.vmem [resolvable:$true] %s4651_s15 }
 0x32a   :  { %v4216_v39 = vadd.f32 %v4215_v29, %v4214_v35  ;;  %v4222_v27 = vrot.slane %v4221_v41, 4  ;;  %v4497_v29 = vrot.slane %v4241_v22, %v5743_v16  ;;  %s5344_s16 = scalar_lea.vmem %s4652_s15, 4096  ;;  %p5349_p3 = scmp.lt.s32.totalorder %s4652_s15, %s4652_s15 }
 0x32b   :  { %v4199_v15 = vrot.slane %v4198_v59, 1  ;;  %v4206_v47 = vrot.slane %v4205_v23, 2  ;;  %p5345_p2 = scmp.ne.s32.totalorder %s4652_s15, %s5344_s16  ;;  %p5350_p4 = scmp.lt.s32.totalorder %s5344_s16, %s5344_s16 }
 0x32c   :  { %v4217_v49 = vrot.slane %v4216_v39, 1  ;;  %v4223_v52 = vadd.f32 %v4222_v27, %v4221_v41  ;;  %v4501_v41 = vrot.slane %v4241_v22, %v4484_v17 }
 0x32d   :  { %v4200_v2 = vadd.f32 %v4199_v15, %v4198_v59  ;;  %v4207_v48 = vadd.f32 %v4206_v47, %v4205_v23  ;;  %v4505_v59 = vrot.slane %v4241_v22, %v4488_v63  ;;  %v4509_v23 = vrot.slane %v4241_v22, %v4492_v44  ;;  %v4310_v44 = vld [vmem:[#allocation2 + $0x20] sm:$0xff]  ;;  %p5351_p5 = por %p5350_p4, %p5349_p3 }
 0x32e   :  { %v4218_v45 = vadd.f32 %v4217_v49, %v4216_v39  ;;  %v4224_v56 = vrot.slane %v4223_v52, 2 }
 0x32f   :  { %v4232_v50 = vmul.f32 0.03125, %v4200_v2  ;;  %v4208_v40 = vrot.slane %v4207_v48, 1  ;;  %v5930_v62 = vrot.slane %v4509_v23, %v5743_v16  ;;  %v4312_v2 = vld [vmem:[#allocation2 + $0x30] sm:$0xff]  ;;  %p5352_p6 = pnand %p5351_p5, %p5345_p2 }
 0x330   :  { %v4234_v51 = vmul.f32 0.03125, %v4218_v45  ;;  %v4225_v34 = vadd.f32 %v4224_v56, %v4223_v52  ;;  %v5921_v52 = vrot.slane %v4497_v29, %v5743_v16 }
 0x331   :  { %v4246_v25 = vadd.f32 0.001, %v4232_v50  ;;  %v4209_v24 = vadd.f32 %v4208_v40, %v4207_v48  ;;  %v4313_v48 = vld [vmem:[#allocation2 + $0x38] sm:$0xff]  ;;  %v4318_v40 = vld [vmem:[#allocation2 + $0x60] sm:$0xff] }
 0x332   :  { %v4226_v10 = vrot.slane %v4225_v34, 1  ;;  %v4248_v42 = vadd.f32 0.001, %v4234_v51  ;;  %v4319_v51 = vld [vmem:[#allocation2 + $0x68] sm:$0xff] }
 0x333   :  { %v4233_v55 = vmul.f32 0.03125, %v4209_v24  ;;  %5292 = vrsqrt.f32 %v4246_v25 }
 0x334   :  { %v4227_v7 = vadd.f32 %v4226_v10, %v4225_v34  ;;  %v4320_v34 = vld [vmem:[#allocation2 + $0x70] sm:$0xff] }
 0x335   :  { %v4247_v46 = vadd.f32 0.001, %v4233_v55  ;;  %v4321_v55 = vld [vmem:[#allocation2 + $0x78] sm:$0xff] }
 0x336   :  { %v4235_v33 = vmul.f32 0.03125, %v4227_v7 }
 0x337   :  { %5294 = vrsqrt.f32 %v4247_v46  ;;  %v4328_v46 = vld [vmem:[#allocation2 + $0xb0] sm:$0xff] }
 0x338   :  { %5296 = vrsqrt.f32 %v4248_v42  ;;  %v4249_v20 = vadd.f32 0.001, %v4235_v33  ;;  %v4326_v42 = vld [vmem:[#allocation2 + $0xa0] sm:$0xff]  ;;  %v4329_v33 = vld [vmem:[#allocation2 + $0xb8] sm:$0xff] }
 0x33a   :  { %5298 = vrsqrt.f32 %v4249_v20 }
 0x33d   :  { %v5293_v57 = vpop.eup %5292 }
 0x341   :  { %v5295_v3 = vpop.eup %5294 }
 0x342   :  { %v5297_v37 = vpop.eup %5296  ;;  %v4283_v43 = vcombine.low %v5293_v57, %v5295_v3  ;;  %v4335_v57 = vld [vmem:[#allocation2 + $0xe8] sm:$0xff]  ;;  %v4336_v3 = vld [vmem:[#allocation2 + $0xf0] sm:$0xff] }
 0x344   :  { %v5299_v1 = vpop.eup %5298  ;;  %v4291_v35 = vrot.slane %v4283_v43, %v5732_v5 }
 0x345   :  { %v4284_v26 = vcombine.low %v5297_v37, %v5299_v1 }
 0x347   :  { %v4298_v13 = vrot.slane %v4284_v26, %v5732_v5 }
 0x349   :  { %v4299_v14 = vcombine.low %v4291_v35, %v4298_v13 }
 0x34b   :  { %v4303_v6 = vmul.f32 %v4299_v14, %v4241_v22 }
 0x34d   :  { %v4359_v39 = vrot.slane %v4303_v6, %v5737_v8  ;;  %v4363_v5 = vrot.slane %v4303_v6, %v4346_v38  ;;  %v4367_v27 = vrot.slane %v4303_v6, %v4350_v12  ;;  %v4371_v15 = vrot.slane %v4303_v6, %v4354_v18  ;;  %v4311_v18 = vld [vmem:[#allocation2 + $0x28] sm:$0xff] }
 0x34e   :  { %v5924_v38 = vrot.slane %v4501_v41, %v5743_v16  ;;  %v5927_v12 = vrot.slane %v4505_v59, %v5743_v16 }
 0x34f   :  { %v4399_v47 = vrot.slane %v4359_v39, %v5737_v8  ;;  %v4403_v17 = vrot.slane %v4363_v5, %v5737_v8  ;;  %v4407_v63 = vrot.slane %v4367_v27, %v5737_v8  ;;  %v4411_v49 = vrot.slane %v4371_v15, %v5737_v8 }
 0x351   :  { %v4416_v45 = vmul.f32 %v4399_v47, %v5828_v11  ;;  %v4417_v8 = vmul.f32 %v4403_v17, %v5857_v36  ;;  %v4418_v56 = vmul.f32 %v4407_v63, %v5836_v21  ;;  %v4419_v50 = vmul.f32 %v4411_v49, %v5877_v0  ;;  %v4327_v11 = vld [vmem:[#allocation2 + $0xa8] sm:$0xff] }
 0x352   :  { %v4424_v25 = vmul.f32 %v4399_v47, %v5830_v28  ;;  %v4425_v24 = vmul.f32 %v4403_v17, %v5860_v60  ;;  %v4426_v16 = vmul.f32 %v4407_v63, %v5838_v31  ;;  %v4427_v10 = vmul.f32 %v4411_v49, %v5880_v32  ;;  %v4334_v28 = vld [vmem:[#allocation2 + $0xe0] sm:$0xff] }
 0x353   :  { %v4432_v36 = vmul.f32 %v4399_v47, %v5832_v54  ;;  %v4433_v21 = vmul.f32 %v4403_v17, %v5862_v4  ;;  %v4434_v0 = vmul.f32 %v4407_v63, %v5840_v53  ;;  %v4435_v7 = vmul.f32 %v4411_v49, %v5883_v61  ;;  %v4337_v54 = vld [vmem:[#allocation2 + $0xf8] sm:$0xff] }
 0x354   :  { %v4440_v60 = vmul.f32 %v4399_v47, %v5834_v19  ;;  %v4441_v31 = vmul.f32 %v4403_v17, %v5866_v58  ;;  %v4442_v32 = vmul.f32 %v4407_v63, %v5842_v30  ;;  %v4443_v20 = vmul.f32 %v4411_v49, %v5885_v9 }
 0x355   :  { %v4448_v37 = vadd.f32 %v4416_v45, %v4310_v44  ;;  %v4449_v4 = vadd.f32 %v4417_v8, %v4311_v18  ;;  %v4450_v43 = vadd.f32 %v4418_v56, %v4312_v2  ;;  %v4451_v53 = vadd.f32 %v4419_v50, %v4313_v48 }
 0x356   :  { %v4456_v1 = vadd.f32 %v4424_v25, %v4318_v40  ;;  %v4457_v61 = vadd.f32 %v4425_v24, %v4319_v51  ;;  %v4458_v26 = vadd.f32 %v4426_v16, %v4320_v34  ;;  %v4459_v35 = vadd.f32 %v4427_v10, %v4321_v55 }
 0x357   :  { %v4464_v13 = vadd.f32 %v4432_v36, %v4326_v42  ;;  %v4465_v22 = vadd.f32 %v4433_v21, %v4327_v11  ;;  %v4466_v19 = vadd.f32 %v4434_v0, %v4328_v46  ;;  %v4467_v14 = vadd.f32 %v4435_v7, %v4329_v33 }
 0x358   :  { %v4472_v58 = vadd.f32 %v4440_v60, %v4334_v28  ;;  %v4473_v6 = vadd.f32 %v4441_v31, %v4335_v57  ;;  %v4474_v30 = vadd.f32 %v4442_v32, %v4336_v3  ;;  %v4475_v29 = vadd.f32 %v4443_v20, %v4337_v54 }
 0x359   :  { %v4554_v9 = vadd.f32 %v5921_v52, %v4448_v37  ;;  %v4555_v41 = vadd.f32 %v5924_v38, %v4449_v4  ;;  %v4556_v59 = vadd.f32 %v5927_v12, %v4450_v43  ;;  %v4557_v23 = vadd.f32 %v5930_v62, %v4451_v53 }
 0x35a   :  { %v4562_v39 = vadd.f32 %v5921_v52, %v4456_v1  ;;  %v4563_v5 = vadd.f32 %v5924_v38, %v4457_v61  ;;  %v4564_v27 = vadd.f32 %v5927_v12, %v4458_v26  ;;  %v4565_v15 = vadd.f32 %v5930_v62, %v4459_v35 }
 0x35b   :  { %v4570_v47 = vadd.f32 %v5921_v52, %v4464_v13  ;;  %v4571_v17 = vadd.f32 %v5924_v38, %v4465_v22  ;;  %v4572_v63 = vadd.f32 %v5927_v12, %v4466_v19  ;;  %v4573_v49 = vadd.f32 %v5930_v62, %v4467_v14 }
 0x35c   :  { %v4578_v44 = vadd.f32 %v5921_v52, %v4472_v58  ;;  %v4579_v18 = vadd.f32 %v5924_v38, %v4473_v6  ;;  %v4580_v2 = vadd.f32 %v5927_v12, %v4474_v30  ;;  %v4581_v48 = vadd.f32 %v5930_v62, %v4475_v29 }
 0x35d   :  { %v4586_v45 = vmax.f32 %v4554_v9, 0.0  ;;  %v4587_v8 = vmax.f32 %v4555_v41, 0.0  ;;  %v4588_v56 = vmax.f32 %v4556_v59, 0.0  ;;  %v4589_v50 = vmax.f32 %v4557_v23, 0.0 }
 0x35e   :  { %v4594_v40 = vmax.f32 %v4562_v39, 0.0  ;;  %v4595_v51 = vmax.f32 %v4563_v5, 0.0  ;;  %v4596_v34 = vmax.f32 %v4564_v27, 0.0  ;;  %v4597_v25 = vmax.f32 %v4565_v15, 0.0 }
 0x35f   :  { %v4602_v24 = vmax.f32 %v4570_v47, 0.0  ;;  %v4603_v16 = vmax.f32 %v4571_v17, 0.0  ;;  %v4604_v10 = vmax.f32 %v4572_v63, 0.0  ;;  %v4605_v52 = vmax.f32 %v4573_v49, 0.0  ;;  %4618 = vst [vmem:[#allocation7 + $0x20] sm:$0xff] %v4586_v45  ;;  %4619 = vst [vmem:[#allocation7 + $0x28] sm:$0xff] %v4587_v8 }
 0x360   :  { %4620 = vst [vmem:[#allocation7 + $0x30] sm:$0xff] %v4588_v56  ;;  %4621 = vst [vmem:[#allocation7 + $0x38] sm:$0xff] %v4589_v50  ;;  %v4610_v38 = vmax.f32 %v4578_v44, 0.0  ;;  %v4611_v12 = vmax.f32 %v4579_v18, 0.0  ;;  %v4612_v62 = vmax.f32 %v4580_v2, 0.0  ;;  %v4613_v55 = vmax.f32 %v4581_v48, 0.0 }
 0x361   :  { %4626 = vst [vmem:[#allocation7 + $0x60] sm:$0xff] %v4594_v40  ;;  %4627 = vst [vmem:[#allocation7 + $0x68] sm:$0xff] %v4595_v51 }
 0x362   :  { %4628 = vst [vmem:[#allocation7 + $0x70] sm:$0xff] %v4596_v34  ;;  %4629 = vst [vmem:[#allocation7 + $0x78] sm:$0xff] %v4597_v25 }
 0x363   :  { %4634 = vst [vmem:[#allocation7 + $0xa0] sm:$0xff] %v4602_v24  ;;  %4635 = vst [vmem:[#allocation7 + $0xa8] sm:$0xff] %v4603_v16 }
 0x364   :  { %4636 = vst [vmem:[#allocation7 + $0xb0] sm:$0xff] %v4604_v10  ;;  %4637 = vst [vmem:[#allocation7 + $0xb8] sm:$0xff] %v4605_v52 }
 0x365   :  { %4642 = vst [vmem:[#allocation7 + $0xe0] sm:$0xff] %v4610_v38  ;;  %4643 = vst [vmem:[#allocation7 + $0xe8] sm:$0xff] %v4611_v12 }
 0x366   :  { %4644 = vst [vmem:[#allocation7 + $0xf0] sm:$0xff] %v4612_v62  ;;  %4645 = vst [vmem:[#allocation7 + $0xf8] sm:$0xff] %v4613_v55 }
 0x367   :  { %5355 = shalt.err (!%p5352_p6)
}
 0x368   :  { %s5356_s19 = scalar_lea.hbm %s5982_s3, 4096 }
 0x369   :  { %p5357_p7 = scmp.ne.s32.totalorder %s5982_s3, %s5356_s19  ;;  %p5360_p8 = scmp.lt.u32.totalorder %s5356_s19, %s5982_s3 }
 0x36b   :  { %p5362_p9 = pnand %p5360_p8, %p5357_p7 }
 0x36d   :  { %5365 = shalt.err (!%p5362_p9)
}
 0x36e   :  { %4657 = dma.vmem_to_hbm [thread:$0]  %s4652_s15, 4096, %s5982_s3, [#allocation4], %s5373_s22, %s5373_s22, %s5374_s23  }
 0x36f   :  { %5370 = dma.done.wait [#allocation4], 4096  }
 0x370   :  { %5371 = vsyncadd [#allocation4], 4294963200 }
 0x371   :  { %4661 = vsyncpa [#allocation3], 1 }
 0x372   :  { %4662 = vsyncpa [#allocation6], 1 }
 0x373   :  { %4663 = vsyncpa [#allocation4], 1 }

</bundles_post_ra>
